<compile_context>
chip_gen: v7x
topology: tpu7x:2x2x1
jax: 0.10.0
libtpu: 0.0.40
codegen_flags: <defaults>
</compile_context>

<pallas_src>
import functools

import jax
import jax.numpy as jnp
from jax.experimental import pallas as pl
from jax.experimental.pallas import tpu as pltpu


# ----------------------------------------------------------------------------
# Compiler params
# ----------------------------------------------------------------------------
@functools.lru_cache(maxsize=None)
def _vmem_limit_bytes():
    try:
        cap = int(pltpu.get_tpu_info().vmem_capacity_bytes)
    except Exception:
        cap = 64 * 1024 * 1024      # conservative fallback (v7x physical)
    return (cap * 3) // 4           # ~96 MiB on v5e/v6e, ~48 MiB on v7x


def _cparams(semantics):
    return pltpu.CompilerParams(dimension_semantics=semantics,
                                vmem_limit_bytes=_vmem_limit_bytes())


# ----------------------------------------------------------------------------
# Pallas kernels
# ----------------------------------------------------------------------------
def _conv1x1_bn_kernel(x_ref, w_ref, b_ref, scale_ref, shift_ref,
                       y_ref, stats_ref, *, prologue):
    """Fused [BN+ReLU prologue] -> 1x1 conv (pointwise matmul) -> +bias,
    plus per-channel [sum, sum_sq] of the conv output (via MXU ones-matmul).

    x_ref:     (M, Cin)  bf16      (pre-BN previous activation, pixels as rows)
    w_ref:     (Cin, Cout) bf16
    b_ref:     (1, Cout) f32
    scale_ref: (1, Cin)  f32   (prev-stage BN inv-std, unused if not prologue)
    shift_ref: (1, Cin)  f32   (prev-stage -mean*inv-std)
    y_ref:     (M, Cout) bf16
    stats_ref: (1, 1, 2*Cout) f32
    """
    cout = w_ref.shape[1]
    a = x_ref[...]
    if prologue:
        a32 = a.astype(jnp.float32) * scale_ref[...] + shift_ref[...]
        a = jnp.maximum(a32, 0.0).astype(jnp.bfloat16)
    z = jnp.dot(a, w_ref[...], preferred_element_type=jnp.float32)
    z = z + b_ref[...]                                       # (M, Cout) f32

    # Batch stats via the MXU (ones-row reduction) instead of an XLU axis-0 sum.
    ones = jnp.ones((1, z.shape[0]), jnp.float32)
    stats_ref[0, :, :cout] = jnp.dot(ones, z, preferred_element_type=jnp.float32)
    stats_ref[0, :, cout:] = jnp.dot(ones, z * z,
                                     preferred_element_type=jnp.float32)
    y_ref[...] = z.astype(y_ref.dtype)


def _conv3x3_bn_kernel(x_ref, w_ref, b_ref, scale_ref, shift_ref,
                       y_ref, stats_ref, *, h, w_sp):
    """Fused [BN+ReLU prologue] -> 3x3 conv (padding=1) -> +bias -> stats.

    x_ref:     (1, H, W, Cin)  bf16  (one image, pre-BN)
    w_ref:     (9*Cin, Cout)   bf16  (row = (kh*3+kw)*Cin + ci)
    b_ref:     (1, Cout) f32;  scale/shift: (1, Cin) f32
    y_ref:     (1, H, W, Cout) bf16
    stats_ref: (1, 1, 2*Cout)  f32
    """
    cin = x_ref.shape[3]
    cout = w_ref.shape[1]

    sc = scale_ref[...].reshape(1, 1, cin)
    sh = shift_ref[...].reshape(1, 1, cin)
    a32 = x_ref[0].astype(jnp.float32)                       # (H, W, Cin)
    a = jnp.maximum(a32 * sc + sh, 0.0).astype(jnp.bfloat16)

    # Column(dw)-shifted copies hoisted out of the 9-tap loop: 3 sublane
    # relayouts total.  The row(dh) shift is a free leading-axis slice after
    # padding H with zero rows (applied AFTER the prologue, so borders are
    # true zeros -- no affine leak, no mask needed).
    zcol = jnp.zeros((h, 1, cin), jnp.bfloat16)
    zrow = jnp.zeros((1, w_sp, cin), jnp.bfloat16)
    t0 = jnp.concatenate([zcol, a[:, :w_sp - 1, :]], axis=1)  # ap[:, j-1]
    t2 = jnp.concatenate([a[:, 1:, :], zcol], axis=1)         # ap[:, j+1]
    shifted = [jnp.concatenate([zrow, t, zrow], axis=0)       # (H+2, W, Cin)
               for t in (t0, a, t2)]

    acc = jnp.zeros((h * w_sp, cout), jnp.float32)
    for dh in range(3):
        for dw in range(3):
            tap = dh * 3 + dw
            patch = shifted[dw][dh:dh + h].reshape(h * w_sp, cin)
            acc = acc + jnp.dot(patch,
                                w_ref[tap * cin:(tap + 1) * cin, :],
                                preferred_element_type=jnp.float32)
    z = acc + b_ref[...]                                      # (H*W, Cout)

    ones = jnp.ones((1, h * w_sp), jnp.float32)
    stats_ref[0, :, :cout] = jnp.dot(ones, z, preferred_element_type=jnp.float32)
    stats_ref[0, :, cout:] = jnp.dot(ones, z * z,
                                     preferred_element_type=jnp.float32)
    y_ref[0] = z.reshape(h, w_sp, cout).astype(y_ref.dtype)


def _residual_bn_relu_kernel(x_ref, z_ref, scale_ref, shift_ref, o_ref):
    """out = relu(x + BN(z)), lane-dense (rows, W*C) layout."""
    zn = z_ref[...].astype(jnp.float32) * scale_ref[...] + shift_ref[...]
    o_ref[...] = jnp.maximum(x_ref[...] + zn, 0.0)


# ----------------------------------------------------------------------------
# Wrappers
# ----------------------------------------------------------------------------
def conv1x1_bn_pallas(x2d, w, b, scale, shift, *, prologue, rb=512):
    """x2d: (M, Cin) bf16.  Returns (y (M,Cout) bf16, stats (S,1,2*Cout) f32)."""
    m, cin = x2d.shape
    cout = w.shape[1]
    rb = m if m <= rb else rb
    assert m % rb == 0
    steps = m // rb
    kernel = functools.partial(_conv1x1_bn_kernel, prologue=prologue)
    return pl.pallas_call(
        kernel,
        out_shape=(jax.ShapeDtypeStruct((m, cout), jnp.bfloat16),
                   jax.ShapeDtypeStruct((steps, 1, 2 * cout), jnp.float32)),
        grid=(steps,),
        in_specs=[
            pl.BlockSpec((rb, cin), lambda i: (i, 0)),
            pl.BlockSpec((cin, cout), lambda i: (0, 0)),
            pl.BlockSpec((1, cout), lambda i: (0, 0)),
            pl.BlockSpec((1, cin), lambda i: (0, 0)),
            pl.BlockSpec((1, cin), lambda i: (0, 0)),
        ],
        out_specs=(
            pl.BlockSpec((rb, cout), lambda i: (i, 0)),
            pl.BlockSpec((1, 1, 2 * cout), lambda i: (i, 0, 0)),
        ),
        compiler_params=_cparams(("parallel",)),
    )(x2d, w, b, scale, shift)


def conv3x3_bn_pallas(x, w, b, scale, shift):
    """x: (N,H,W,Cin) bf16.  Returns (y (N,H,W,Cout) bf16, stats (N,1,2*Cout))."""
    n, h, w_sp, cin = x.shape
    cout = w.shape[1]
    kernel = functools.partial(_conv3x3_bn_kernel, h=h, w_sp=w_sp)
    return pl.pallas_call(
        kernel,
        out_shape=(jax.ShapeDtypeStruct((n, h, w_sp, cout), jnp.bfloat16),
                   jax.ShapeDtypeStruct((n, 1, 2 * cout), jnp.float32)),
        grid=(n,),
        in_specs=[
            pl.BlockSpec((1, h, w_sp, cin), lambda i: (i, 0, 0, 0)),
            pl.BlockSpec((9 * cin, cout), lambda i: (0, 0)),
            pl.BlockSpec((1, cout), lambda i: (0, 0)),
            pl.BlockSpec((1, cin), lambda i: (0, 0)),
            pl.BlockSpec((1, cin), lambda i: (0, 0)),
        ],
        out_specs=(
            pl.BlockSpec((1, h, w_sp, cout), lambda i: (i, 0, 0, 0)),
            pl.BlockSpec((1, 1, 2 * cout), lambda i: (i, 0, 0)),
        ),
        compiler_params=_cparams(("parallel",)),
    )(x, w, b, scale, shift)


def residual_bn_relu_pallas(x2d, z2d, scale_t, shift_t):
    """relu(x + z*scale + shift) on a lane-dense (rows, W*C) view."""
    r, c = x2d.shape
    return pl.pallas_call(
        _residual_bn_relu_kernel,
        out_shape=jax.ShapeDtypeStruct((r, c), jnp.float32),
        grid=(1,),
        in_specs=[
            pl.BlockSpec((r, c), lambda i: (0, 0)),
            pl.BlockSpec((r, c), lambda i: (0, 0)),
            pl.BlockSpec((1, c), lambda i: (0, 0)),
            pl.BlockSpec((1, c), lambda i: (0, 0)),
        ],
        out_specs=pl.BlockSpec((r, c), lambda i: (0, 0)),
        compiler_params=_cparams(("arbitrary",)),
    )(x2d, z2d, scale_t, shift_t)


def bn_params_from_stats(stats, count, eps=1e-5):
    """stats: (S, 1, 2C) partial [sum | sum_sq] -> train-mode BN (scale, shift)
    with gamma=1 / beta=0 (PyTorch BatchNorm2d default init, biased var)."""
    c = stats.shape[-1] // 2
    s1 = jnp.sum(stats[:, 0, :c], axis=0)
    s2 = jnp.sum(stats[:, 0, c:], axis=0)
    mean = s1 / count
    var = jnp.maximum(s2 / count - mean * mean, 0.0)
    inv = jax.lax.rsqrt(var + eps)
    return inv.reshape(1, c).astype(jnp.float32), \
        (-mean * inv).reshape(1, c).astype(jnp.float32)


# ----------------------------------------------------------------------------
# Bottleneck forward
# ----------------------------------------------------------------------------
def bottleneck_apply(x_nchw, params):
    """Returns (x, out): x is what Bottleneck.forward returns (its input);
    out = relu(x + features(x)) is returned as an auxiliary value."""
    x_nhwc = jnp.transpose(x_nchw, (0, 2, 3, 1)).astype(jnp.float32)  # NHWC
    n, h, w_sp, cin = x_nhwc.shape
    count = n * h * w_sp
    cmid = params["w1"].shape[1]

    x2d = x_nhwc.reshape(count, cin).astype(jnp.bfloat16)
    one_c = jnp.ones((1, cin), jnp.float32)
    zero_c = jnp.zeros((1, cin), jnp.float32)

    # Conv2d(Cin, Cmid, 1)                          -> z1; stats for BN1
    z1, st1 = conv1x1_bn_pallas(x2d, params["w1"], params["b1"],
                                one_c, zero_c, prologue=False)
    s1, t1 = bn_params_from_stats(st1, count)

    # [BN1+ReLU prologue] + Conv2d(Cmid, Cmid, 3, pad=1) -> z2; BN2 stats
    z2, st2 = conv3x3_bn_pallas(z1.reshape(n, h, w_sp, cmid),
                                params["w2"], params["b2"], s1, t1)
    s2, t2 = bn_params_from_stats(st2, count)

    # [BN2+ReLU prologue] + Conv2d(Cmid, Cin, 1)    -> z3; BN3 stats
    z3, st3 = conv1x1_bn_pallas(z2.reshape(count, cmid),
                                params["w3"], params["b3"], s2, t2,
                                prologue=True)
    s3, t3 = bn_params_from_stats(st3, count)

    # out = relu(x + BN3(z3)) on a lane-dense (N*H, W*C) view (free reshapes).
    x_res = x_nhwc.reshape(n * h, w_sp * cin)
    z3_res = z3.reshape(n * h, w_sp * cin)
    out2d = residual_bn_relu_pallas(x_res, z3_res,
                                    jnp.tile(s3, (1, w_sp)),
                                    jnp.tile(t3, (1, w_sp)))
    out_nchw = jnp.transpose(out2d.reshape(n, h, w_sp, cin), (0, 3, 1, 2))

    # Bottleneck.forward returns its INPUT, not `out`.
    return x_nchw, out_nchw


# ----------------------------------------------------------------------------
# Pure-JAX reference (mirrors the kernels' bf16 quantization points)
# ----------------------------------------------------------------------------
def bottleneck_reference(x_nchw, params):
    x = jnp.transpose(x_nchw, (0, 2, 3, 1)).astype(jnp.float32)
    n, h, w_sp, cin = x.shape
    count = n * h * w_sp

    def bn_from(z):
        s1 = jnp.sum(z, axis=(0, 1, 2))
        s2 = jnp.sum(z * z, axis=(0, 1, 2))
        return bn_params_from_stats(
            jnp.concatenate([s1, s2]).reshape(1, 1, -1), count)

    def conv1x1(a_bf, w, b):
        z = jnp.einsum("nhwc,cd->nhwd", a_bf, w,
                       preferred_element_type=jnp.float32)
        return z + b.reshape(1, 1, 1, -1)

    def conv3x3(a_bf, w, b):
        ci, co = a_bf.shape[-1], w.shape[1]
        z = jax.lax.conv_general_dilated(
            a_bf, w.reshape(3, 3, ci, co), (1, 1), ((1, 1), (1, 1)),
            dimension_numbers=("NHWC", "HWIO", "NHWC"),
            preferred_element_type=jnp.float32)
        return z + b.reshape(1, 1, 1, -1)

    def bn_relu(z, s, t):
        zq = z.astype(jnp.bfloat16).astype(jnp.float32)
        return jnp.maximum(zq * s.reshape(1, 1, 1, -1) + t.reshape(1, 1, 1, -1),
                           0.0)

    z1 = conv1x1(x.astype(jnp.bfloat16), params["w1"], params["b1"])
    s1, t1 = bn_from(z1)
    z2 = conv3x3(bn_relu(z1, s1, t1).astype(jnp.bfloat16),
                 params["w2"], params["b2"])
    s2, t2 = bn_from(z2)
    z3 = conv1x1(bn_relu(z2, s2, t2).astype(jnp.bfloat16),
                 params["w3"], params["b3"])
    s3, t3 = bn_from(z3)
    zq = z3.astype(jnp.bfloat16).astype(jnp.float32)
    out = jnp.maximum(x + zq * s3.reshape(1, 1, 1, -1) + t3.reshape(1, 1, 1, -1),
                      0.0)
    return jnp.transpose(out, (0, 3, 1, 2))


# ----------------------------------------------------------------------------
# Deterministic synthetic parameters (xavier_uniform weights, default bias)
# ----------------------------------------------------------------------------
def _conv_w(key, cin, cout, ks):
    fan_in, fan_out = cin * ks * ks, cout * ks * ks
    limit = (6.0 / (fan_in + fan_out)) ** 0.5
    w = jax.random.uniform(key, (ks * ks * cin, cout), jnp.float32,
                           -limit, limit)
    return w.astype(jnp.bfloat16)


def _conv_b(key, cin, cout, ks):
    bound = 1.0 / ((cin * ks * ks) ** 0.5)
    return jax.random.uniform(key, (1, cout), jnp.float32, -bound, bound)


def init_params(key, in_channels, out_channels, filter_size=3):
    # filter_size=3 is the only value for which padding=1 preserves spatial
    # shape (required by the reference module's residual add).
    assert filter_size == 3
    k1, k2, k3, kb1, kb2, kb3 = jax.random.split(key, 6)
    return {
        "w1": _conv_w(k1, in_channels, out_channels, 1),
        "b1": _conv_b(kb1, in_channels, out_channels, 1),
        "w2": _conv_w(k2, out_channels, out_channels, 3),
        "b2": _conv_b(kb2, out_channels, out_channels, 3),
        "w3": _conv_w(k3, out_channels, in_channels, 1),
        "b3": _conv_b(kb3, out_channels, in_channels, 1),
    }


# ----------------------------------------------------------------------------
if __name__ == "__main__":
    in_channels, out_channels, filter_size = 64, 128, 3
    N, H, W = 2, 16, 16

    kx, kp = jax.random.split(jax.random.PRNGKey(0))
    x = jax.random.normal(kx, (N, in_channels, H, W), dtype=jnp.float32)
    params = init_params(kp, in_channels, out_channels, filter_size)

    fwd = jax.jit(bottleneck_apply)
    x_ret, out = jax.block_until_ready(fwd(x, params))

    assert x_ret.shape == (N, in_channels, H, W), x_ret.shape
    assert out.shape == (N, in_channels, H, W), out.shape
    assert bool(jnp.all(jnp.isfinite(out)))
    assert bool(jnp.all(out >= 0))                    # post-ReLU
    assert bool(jnp.array_equal(x_ret, x))            # forward() returns input

    out_ref = jax.jit(bottleneck_reference)(x, params)
    max_diff = float(jnp.max(jnp.abs(out - out_ref)))
    assert max_diff < 5e-2, f"max |pallas - reference| = {max_diff}"

    print("KERNEL_OK")
</pallas_src>

<mosaic_0001>
module attributes {stable_mosaic.version = 11 : i64} {
  func.func @_conv3x3_bn_kernel(%arg0: i32, %arg1: memref<1x16x16x128xbf16, #tpu.memory_space<vmem>>, %arg2: memref<1152x128xbf16, #tpu.memory_space<vmem>>, %arg3: memref<1x128xf32, #tpu.memory_space<vmem>>, %arg4: memref<1x128xf32, #tpu.memory_space<vmem>>, %arg5: memref<1x128xf32, #tpu.memory_space<vmem>>, %arg6: memref<1x16x16x128xbf16, #tpu.memory_space<vmem>>, %arg7: memref<1x1x256xf32, #tpu.memory_space<vmem>>) attributes {dimension_semantics = [#tpu.dimension_semantics<parallel>], iteration_bounds = array<i64: 2>, scalar_prefetch = 0 : i64, scratch_operands = 0 : i64, tpu.core_type = #tpu.core_type<tc>, window_params = [{transform_indices = @transform_0, window_bounds = array<i64: 1, 16, 16, 128>}, {pipeline_mode = #tpu.pipeline_mode<synchronous>, transform_indices = @transform_1, window_bounds = array<i64: 1152, 128>}, {pipeline_mode = #tpu.pipeline_mode<synchronous>, transform_indices = @transform_2, window_bounds = array<i64: 1, 128>}, {pipeline_mode = #tpu.pipeline_mode<synchronous>, transform_indices = @transform_3, window_bounds = array<i64: 1, 128>}, {pipeline_mode = #tpu.pipeline_mode<synchronous>, transform_indices = @transform_4, window_bounds = array<i64: 1, 128>}, {transform_indices = @transform_5, window_bounds = array<i64: 1, 16, 16, 128>}, {transform_indices = @transform_6, window_bounds = array<i64: 1, 1, 256>}]} {
    %c0 = arith.constant 0 : index
    %c0_0 = arith.constant 0 : index
    %0 = vector.load %arg4[%c0, %c0_0] : memref<1x128xf32, #tpu.memory_space<vmem>>, vector<1x128xf32>
    %1 = vector.shape_cast %0 : vector<1x128xf32> to vector<1x1x128xf32>
    %c0_1 = arith.constant 0 : index
    %c0_2 = arith.constant 0 : index
    %2 = vector.load %arg5[%c0_1, %c0_2] : memref<1x128xf32, #tpu.memory_space<vmem>>, vector<1x128xf32>
    %3 = vector.shape_cast %2 : vector<1x128xf32> to vector<1x1x128xf32>
    %c0_3 = arith.constant 0 : index
    %c0_4 = arith.constant 0 : index
    %c0_5 = arith.constant 0 : index
    %c0_6 = arith.constant 0 : index
    %4 = vector.load %arg1[%c0_3, %c0_4, %c0_5, %c0_6] : memref<1x16x16x128xbf16, #tpu.memory_space<vmem>>, vector<1x16x16x128xbf16>
    %5 = vector.shape_cast %4 : vector<1x16x16x128xbf16> to vector<16x16x128xbf16>
    %6 = arith.extf %5 : vector<16x16x128xbf16> to vector<16x16x128xf32>
    %7 = vector.broadcast %1 : vector<1x1x128xf32> to vector<16x16x128xf32>
    %8 = arith.mulf %6, %7 : vector<16x16x128xf32>
    %9 = vector.broadcast %3 : vector<1x1x128xf32> to vector<16x16x128xf32>
    %10 = arith.addf %8, %9 : vector<16x16x128xf32>
    %cst = arith.constant 0.000000e+00 : f32
    %11 = vector.broadcast %cst : f32 to vector<16x16x128xf32>
    %12 = arith.maximumf %10, %11 : vector<16x16x128xf32>
    %13 = arith.truncf %12 : vector<16x16x128xf32> to vector<16x16x128xbf16>
    %cst_7 = arith.constant 0.000000e+00 : bf16
    %14 = vector.broadcast %cst_7 : bf16 to vector<16x1x128xbf16>
    %cst_8 = arith.constant 0.000000e+00 : bf16
    %15 = vector.broadcast %cst_8 : bf16 to vector<1x16x128xbf16>
    %16 = vector.extract_strided_slice %13 {offsets = [0, 0, 0], sizes = [16, 15, 128], strides = [1, 1, 1]} : vector<16x16x128xbf16> to vector<16x15x128xbf16>
    %17 = tpu.concatenate %14, %16 in 1 : vector<16x1x128xbf16>, vector<16x15x128xbf16> -> vector<16x16x128xbf16>
    %18 = vector.extract_strided_slice %13 {offsets = [0, 1, 0], sizes = [16, 15, 128], strides = [1, 1, 1]} : vector<16x16x128xbf16> to vector<16x15x128xbf16>
    %19 = tpu.concatenate %18, %14 in 1 : vector<16x15x128xbf16>, vector<16x1x128xbf16> -> vector<16x16x128xbf16>
    %20 = tpu.concatenate %15, %17, %15 in 0 : vector<1x16x128xbf16>, vector<16x16x128xbf16>, vector<1x16x128xbf16> -> vector<18x16x128xbf16>
    %21 = tpu.concatenate %15, %13, %15 in 0 : vector<1x16x128xbf16>, vector<16x16x128xbf16>, vector<1x16x128xbf16> -> vector<18x16x128xbf16>
    %22 = tpu.concatenate %15, %19, %15 in 0 : vector<1x16x128xbf16>, vector<16x16x128xbf16>, vector<1x16x128xbf16> -> vector<18x16x128xbf16>
    %cst_9 = arith.constant 0.000000e+00 : f32
    %23 = vector.broadcast %cst_9 : f32 to vector<256x128xf32>
    %24 = vector.extract_strided_slice %20 {offsets = [0, 0, 0], sizes = [16, 16, 128], strides = [1, 1, 1]} : vector<18x16x128xbf16> to vector<16x16x128xbf16>
    %25 = vector.shape_cast %24 : vector<16x16x128xbf16> to vector<256x128xbf16>
    %c0_10 = arith.constant 0 : index
    %c0_11 = arith.constant 0 : index
    %26 = vector.load %arg2[%c0_10, %c0_11] : memref<1152x128xbf16, #tpu.memory_space<vmem>>, vector<128x128xbf16>
    %cst_12 = arith.constant dense<0.000000e+00> : vector<256x128xf32>
    %27 = tpu.matmul %25, %26, %cst_12 {dimension_numbers = #tpu.dot_dimension_numbers<[1], [0], [0], [1], [0, 0, 1, 1], [], []>} : vector<256x128xbf16>, vector<128x128xbf16>, vector<256x128xf32> -> vector<256x128xf32>
    %28 = arith.addf %23, %27 : vector<256x128xf32>
    %29 = vector.extract_strided_slice %21 {offsets = [0, 0, 0], sizes = [16, 16, 128], strides = [1, 1, 1]} : vector<18x16x128xbf16> to vector<16x16x128xbf16>
    %30 = vector.shape_cast %29 : vector<16x16x128xbf16> to vector<256x128xbf16>
    %c128 = arith.constant 128 : index
    %c0_13 = arith.constant 0 : index
    %31 = vector.load %arg2[%c128, %c0_13] : memref<1152x128xbf16, #tpu.memory_space<vmem>>, vector<128x128xbf16>
    %cst_14 = arith.constant dense<0.000000e+00> : vector<256x128xf32>
    %32 = tpu.matmul %30, %31, %cst_14 {dimension_numbers = #tpu.dot_dimension_numbers<[1], [0], [0], [1], [0, 0, 1, 1], [], []>} : vector<256x128xbf16>, vector<128x128xbf16>, vector<256x128xf32> -> vector<256x128xf32>
    %33 = arith.addf %28, %32 : vector<256x128xf32>
    %34 = vector.extract_strided_slice %22 {offsets = [0, 0, 0], sizes = [16, 16, 128], strides = [1, 1, 1]} : vector<18x16x128xbf16> to vector<16x16x128xbf16>
    %35 = vector.shape_cast %34 : vector<16x16x128xbf16> to vector<256x128xbf16>
    %c256 = arith.constant 256 : index
    %c0_15 = arith.constant 0 : index
    %36 = vector.load %arg2[%c256, %c0_15] : memref<1152x128xbf16, #tpu.memory_space<vmem>>, vector<128x128xbf16>
    %cst_16 = arith.constant dense<0.000000e+00> : vector<256x128xf32>
    %37 = tpu.matmul %35, %36, %cst_16 {dimension_numbers = #tpu.dot_dimension_numbers<[1], [0], [0], [1], [0, 0, 1, 1], [], []>} : vector<256x128xbf16>, vector<128x128xbf16>, vector<256x128xf32> -> vector<256x128xf32>
    %38 = arith.addf %33, %37 : vector<256x128xf32>
    %39 = vector.extract_strided_slice %20 {offsets = [1, 0, 0], sizes = [16, 16, 128], strides = [1, 1, 1]} : vector<18x16x128xbf16> to vector<16x16x128xbf16>
    %40 = vector.shape_cast %39 : vector<16x16x128xbf16> to vector<256x128xbf16>
    %c384 = arith.constant 384 : index
    %c0_17 = arith.constant 0 : index
    %41 = vector.load %arg2[%c384, %c0_17] : memref<1152x128xbf16, #tpu.memory_space<vmem>>, vector<128x128xbf16>
    %cst_18 = arith.constant dense<0.000000e+00> : vector<256x128xf32>
    %42 = tpu.matmul %40, %41, %cst_18 {dimension_numbers = #tpu.dot_dimension_numbers<[1], [0], [0], [1], [0, 0, 1, 1], [], []>} : vector<256x128xbf16>, vector<128x128xbf16>, vector<256x128xf32> -> vector<256x128xf32>
    %43 = arith.addf %38, %42 : vector<256x128xf32>
    %44 = vector.extract_strided_slice %21 {offsets = [1, 0, 0], sizes = [16, 16, 128], strides = [1, 1, 1]} : vector<18x16x128xbf16> to vector<16x16x128xbf16>
    %45 = vector.shape_cast %44 : vector<16x16x128xbf16> to vector<256x128xbf16>
    %c512 = arith.constant 512 : index
    %c0_19 = arith.constant 0 : index
    %46 = vector.load %arg2[%c512, %c0_19] : memref<1152x128xbf16, #tpu.memory_space<vmem>>, vector<128x128xbf16>
    %cst_20 = arith.constant dense<0.000000e+00> : vector<256x128xf32>
    %47 = tpu.matmul %45, %46, %cst_20 {dimension_numbers = #tpu.dot_dimension_numbers<[1], [0], [0], [1], [0, 0, 1, 1], [], []>} : vector<256x128xbf16>, vector<128x128xbf16>, vector<256x128xf32> -> vector<256x128xf32>
    %48 = arith.addf %43, %47 : vector<256x128xf32>
    %49 = vector.extract_strided_slice %22 {offsets = [1, 0, 0], sizes = [16, 16, 128], strides = [1, 1, 1]} : vector<18x16x128xbf16> to vector<16x16x128xbf16>
    %50 = vector.shape_cast %49 : vector<16x16x128xbf16> to vector<256x128xbf16>
    %c640 = arith.constant 640 : index
    %c0_21 = arith.constant 0 : index
    %51 = vector.load %arg2[%c640, %c0_21] : memref<1152x128xbf16, #tpu.memory_space<vmem>>, vector<128x128xbf16>
    %cst_22 = arith.constant dense<0.000000e+00> : vector<256x128xf32>
    %52 = tpu.matmul %50, %51, %cst_22 {dimension_numbers = #tpu.dot_dimension_numbers<[1], [0], [0], [1], [0, 0, 1, 1], [], []>} : vector<256x128xbf16>, vector<128x128xbf16>, vector<256x128xf32> -> vector<256x128xf32>
    %53 = arith.addf %48, %52 : vector<256x128xf32>
    %54 = vector.extract_strided_slice %20 {offsets = [2, 0, 0], sizes = [16, 16, 128], strides = [1, 1, 1]} : vector<18x16x128xbf16> to vector<16x16x128xbf16>
    %55 = vector.shape_cast %54 : vector<16x16x128xbf16> to vector<256x128xbf16>
    %c768 = arith.constant 768 : index
    %c0_23 = arith.constant 0 : index
    %56 = vector.load %arg2[%c768, %c0_23] : memref<1152x128xbf16, #tpu.memory_space<vmem>>, vector<128x128xbf16>
    %cst_24 = arith.constant dense<0.000000e+00> : vector<256x128xf32>
    %57 = tpu.matmul %55, %56, %cst_24 {dimension_numbers = #tpu.dot_dimension_numbers<[1], [0], [0], [1], [0, 0, 1, 1], [], []>} : vector<256x128xbf16>, vector<128x128xbf16>, vector<256x128xf32> -> vector<256x128xf32>
    %58 = arith.addf %53, %57 : vector<256x128xf32>
    %59 = vector.extract_strided_slice %21 {offsets = [2, 0, 0], sizes = [16, 16, 128], strides = [1, 1, 1]} : vector<18x16x128xbf16> to vector<16x16x128xbf16>
    %60 = vector.shape_cast %59 : vector<16x16x128xbf16> to vector<256x128xbf16>
    %c896 = arith.constant 896 : index
    %c0_25 = arith.constant 0 : index
    %61 = vector.load %arg2[%c896, %c0_25] : memref<1152x128xbf16, #tpu.memory_space<vmem>>, vector<128x128xbf16>
    %cst_26 = arith.constant dense<0.000000e+00> : vector<256x128xf32>
    %62 = tpu.matmul %60, %61, %cst_26 {dimension_numbers = #tpu.dot_dimension_numbers<[1], [0], [0], [1], [0, 0, 1, 1], [], []>} : vector<256x128xbf16>, vector<128x128xbf16>, vector<256x128xf32> -> vector<256x128xf32>
    %63 = arith.addf %58, %62 : vector<256x128xf32>
    %64 = vector.extract_strided_slice %22 {offsets = [2, 0, 0], sizes = [16, 16, 128], strides = [1, 1, 1]} : vector<18x16x128xbf16> to vector<16x16x128xbf16>
    %65 = vector.shape_cast %64 : vector<16x16x128xbf16> to vector<256x128xbf16>
    %c1024 = arith.constant 1024 : index
    %c0_27 = arith.constant 0 : index
    %66 = vector.load %arg2[%c1024, %c0_27] : memref<1152x128xbf16, #tpu.memory_space<vmem>>, vector<128x128xbf16>
    %cst_28 = arith.constant dense<0.000000e+00> : vector<256x128xf32>
    %67 = tpu.matmul %65, %66, %cst_28 {dimension_numbers = #tpu.dot_dimension_numbers<[1], [0], [0], [1], [0, 0, 1, 1], [], []>} : vector<256x128xbf16>, vector<128x128xbf16>, vector<256x128xf32> -> vector<256x128xf32>
    %68 = arith.addf %63, %67 : vector<256x128xf32>
    %c0_29 = arith.constant 0 : index
    %c0_30 = arith.constant 0 : index
    %69 = vector.load %arg3[%c0_29, %c0_30] : memref<1x128xf32, #tpu.memory_space<vmem>>, vector<1x128xf32>
    %70 = vector.broadcast %69 : vector<1x128xf32> to vector<256x128xf32>
    %71 = arith.addf %68, %70 : vector<256x128xf32>
    %cst_31 = arith.constant 1.000000e+00 : f32
    %72 = vector.broadcast %cst_31 : f32 to vector<1x256xf32>
    %cst_32 = arith.constant dense<0.000000e+00> : vector<1x128xf32>
    %73 = tpu.matmul %72, %71, %cst_32 {dimension_numbers = #tpu.dot_dimension_numbers<[1], [0], [0], [1], [0, 0, 1, 1], [], []>} : vector<1x256xf32>, vector<256x128xf32>, vector<1x128xf32> -> vector<1x128xf32>
    %c0_33 = arith.constant 0 : index
    %c0_34 = arith.constant 0 : index
    %c0_35 = arith.constant 0 : index
    %74 = vector.load %arg7[%c0_33, %c0_34, %c0_35] : memref<1x1x256xf32, #tpu.memory_space<vmem>>, vector<1x1x128xf32>
    %75 = vector.shape_cast %74 : vector<1x1x128xf32> to vector<1x128xf32>
    %76 = vector.shape_cast %73 : vector<1x128xf32> to vector<1x1x128xf32>
    tpu.vector_store %arg7[%c0_33, %c0_34, %c0_35], %76 {strides = array<i32>} : memref<1x1x256xf32, #tpu.memory_space<vmem>>, vector<1x1x128xf32>,
    %77 = arith.mulf %71, %71 : vector<256x128xf32>
    %cst_36 = arith.constant dense<0.000000e+00> : vector<1x128xf32>
    %78 = tpu.matmul %72, %77, %cst_36 {dimension_numbers = #tpu.dot_dimension_numbers<[1], [0], [0], [1], [0, 0, 1, 1], [], []>} : vector<1x256xf32>, vector<256x128xf32>, vector<1x128xf32> -> vector<1x128xf32>
    %c0_37 = arith.constant 0 : index
    %c0_38 = arith.constant 0 : index
    %c128_39 = arith.constant 128 : index
    %79 = vector.load %arg7[%c0_37, %c0_38, %c128_39] : memref<1x1x256xf32, #tpu.memory_space<vmem>>, vector<1x1x128xf32>
    %80 = vector.shape_cast %79 : vector<1x1x128xf32> to vector<1x128xf32>
    %81 = vector.shape_cast %78 : vector<1x128xf32> to vector<1x1x128xf32>
    tpu.vector_store %arg7[%c0_37, %c0_38, %c128_39], %81 {strides = array<i32>} : memref<1x1x256xf32, #tpu.memory_space<vmem>>, vector<1x1x128xf32>,
    %82 = vector.shape_cast %71 : vector<256x128xf32> to vector<16x16x128xf32>
    %83 = arith.truncf %82 : vector<16x16x128xf32> to vector<16x16x128xbf16>
    %c0_40 = arith.constant 0 : index
    %c0_41 = arith.constant 0 : index
    %c0_42 = arith.constant 0 : index
    %c0_43 = arith.constant 0 : index
    %84 = vector.load %arg6[%c0_40, %c0_41, %c0_42, %c0_43] : memref<1x16x16x128xbf16, #tpu.memory_space<vmem>>, vector<1x16x16x128xbf16>
    %85 = vector.shape_cast %84 : vector<1x16x16x128xbf16> to vector<16x16x128xbf16>
    %86 = vector.shape_cast %83 : vector<16x16x128xbf16> to vector<1x16x16x128xbf16>
    tpu.vector_store %arg6[%c0_40, %c0_41, %c0_42, %c0_43], %86 {strides = array<i32>} : memref<1x16x16x128xbf16, #tpu.memory_space<vmem>>, vector<1x16x16x128xbf16>,
    return
  }
  func.func @transform_0(%arg0: i32) -> (i32, i32, i32, i32) {
    %c0_i32 = arith.constant 0 : i32
    %c0_i32_0 = arith.constant 0 : i32
    %c0_i32_1 = arith.constant 0 : i32
    %c0_i32_2 = arith.constant 0 : i32
    return %arg0, %c0_i32, %c0_i32_0, %c0_i32_1 : i32, i32, i32, i32
  }
  func.func @transform_1(%arg0: i32) -> (i32, i32) {
    %c0_i32 = arith.constant 0 : i32
    %c0_i32_0 = arith.constant 0 : i32
    %c0_i32_1 = arith.constant 0 : i32
    return %c0_i32, %c0_i32_0 : i32, i32
  }
  func.func @transform_2(%arg0: i32) -> (i32, i32) {
    %c0_i32 = arith.constant 0 : i32
    %c0_i32_0 = arith.constant 0 : i32
    %c0_i32_1 = arith.constant 0 : i32
    return %c0_i32, %c0_i32_0 : i32, i32
  }
  func.func @transform_3(%arg0: i32) -> (i32, i32) {
    %c0_i32 = arith.constant 0 : i32
    %c0_i32_0 = arith.constant 0 : i32
    %c0_i32_1 = arith.constant 0 : i32
    return %c0_i32, %c0_i32_0 : i32, i32
  }
  func.func @transform_4(%arg0: i32) -> (i32, i32) {
    %c0_i32 = arith.constant 0 : i32
    %c0_i32_0 = arith.constant 0 : i32
    %c0_i32_1 = arith.constant 0 : i32
    return %c0_i32, %c0_i32_0 : i32, i32
  }
  func.func @transform_5(%arg0: i32) -> (i32, i32, i32, i32) {
    %c0_i32 = arith.constant 0 : i32
    %c0_i32_0 = arith.constant 0 : i32
    %c0_i32_1 = arith.constant 0 : i32
    %c0_i32_2 = arith.constant 0 : i32
    return %arg0, %c0_i32, %c0_i32_0, %c0_i32_1 : i32, i32, i32, i32
  }
  func.func @transform_6(%arg0: i32) -> (i32, i32, i32) {
    %c0_i32 = arith.constant 0 : i32
    %c0_i32_0 = arith.constant 0 : i32
    %c0_i32_1 = arith.constant 0 : i32
    return %arg0, %c0_i32, %c0_i32_0 : i32, i32, i32
  }
}

module attributes {stable_mosaic.version = 11 : i64} {
  func.func @_conv1x1_bn_kernel(%arg0: i32, %arg1: memref<512x64xbf16, #tpu.memory_space<vmem>>, %arg2: memref<64x128xbf16, #tpu.memory_space<vmem>>, %arg3: memref<1x128xf32, #tpu.memory_space<vmem>>, %arg4: memref<1x64xf32, #tpu.memory_space<vmem>>, %arg5: memref<1x64xf32, #tpu.memory_space<vmem>>, %arg6: memref<512x128xbf16, #tpu.memory_space<vmem>>, %arg7: memref<1x1x256xf32, #tpu.memory_space<vmem>>) attributes {dimension_semantics = [#tpu.dimension_semantics<parallel>], iteration_bounds = array<i64: 1>, scalar_prefetch = 0 : i64, scratch_operands = 0 : i64, tpu.core_type = #tpu.core_type<tc>, window_params = [{transform_indices = @transform_0, window_bounds = array<i64: 512, 64>}, {pipeline_mode = #tpu.pipeline_mode<synchronous>, transform_indices = @transform_1, window_bounds = array<i64: 64, 128>}, {pipeline_mode = #tpu.pipeline_mode<synchronous>, transform_indices = @transform_2, window_bounds = array<i64: 1, 128>}, {pipeline_mode = #tpu.pipeline_mode<synchronous>, transform_indices = @transform_3, window_bounds = array<i64: 1, 64>}, {pipeline_mode = #tpu.pipeline_mode<synchronous>, transform_indices = @transform_4, window_bounds = array<i64: 1, 64>}, {transform_indices = @transform_5, window_bounds = array<i64: 512, 128>}, {transform_indices = @transform_6, window_bounds = array<i64: 1, 1, 256>}]} {
    %c0 = arith.constant 0 : index
    %c0_0 = arith.constant 0 : index
    %0 = vector.load %arg1[%c0, %c0_0] : memref<512x64xbf16, #tpu.memory_space<vmem>>, vector<512x64xbf16>
    %c0_1 = arith.constant 0 : index
    %c0_2 = arith.constant 0 : index
    %1 = vector.load %arg2[%c0_1, %c0_2] : memref<64x128xbf16, #tpu.memory_space<vmem>>, vector<64x128xbf16>
    %cst = arith.constant dense<0.000000e+00> : vector<512x128xf32>
    %2 = tpu.matmul %0, %1, %cst {dimension_numbers = #tpu.dot_dimension_numbers<[1], [0], [0], [1], [0, 0, 1, 1], [], []>} : vector<512x64xbf16>, vector<64x128xbf16>, vector<512x128xf32> -> vector<512x128xf32>
    %c0_3 = arith.constant 0 : index
    %c0_4 = arith.constant 0 : index
    %3 = vector.load %arg3[%c0_3, %c0_4] : memref<1x128xf32, #tpu.memory_space<vmem>>, vector<1x128xf32>
    %4 = vector.broadcast %3 : vector<1x128xf32> to vector<512x128xf32>
    %5 = arith.addf %2, %4 : vector<512x128xf32>
    %cst_5 = arith.constant 1.000000e+00 : f32
    %6 = vector.broadcast %cst_5 : f32 to vector<1x512xf32>
    %cst_6 = arith.constant dense<0.000000e+00> : vector<1x128xf32>
    %7 = tpu.matmul %6, %5, %cst_6 {dimension_numbers = #tpu.dot_dimension_numbers<[1], [0], [0], [1], [0, 0, 1, 1], [], []>} : vector<1x512xf32>, vector<512x128xf32>, vector<1x128xf32> -> vector<1x128xf32>
    %c0_7 = arith.constant 0 : index
    %c0_8 = arith.constant 0 : index
    %c0_9 = arith.constant 0 : index
    %8 = vector.load %arg7[%c0_7, %c0_8, %c0_9] : memref<1x1x256xf32, #tpu.memory_space<vmem>>, vector<1x1x128xf32>
    %9 = vector.shape_cast %8 : vector<1x1x128xf32> to vector<1x128xf32>
    %10 = vector.shape_cast %7 : vector<1x128xf32> to vector<1x1x128xf32>
    tpu.vector_store %arg7[%c0_7, %c0_8, %c0_9], %10 {strides = array<i32>} : memref<1x1x256xf32, #tpu.memory_space<vmem>>, vector<1x1x128xf32>,
    %11 = arith.mulf %5, %5 : vector<512x128xf32>
    %cst_10 = arith.constant dense<0.000000e+00> : vector<1x128xf32>
    %12 = tpu.matmul %6, %11, %cst_10 {dimension_numbers = #tpu.dot_dimension_numbers<[1], [0], [0], [1], [0, 0, 1, 1], [], []>} : vector<1x512xf32>, vector<512x128xf32>, vector<1x128xf32> -> vector<1x128xf32>
    %c0_11 = arith.constant 0 : index
    %c0_12 = arith.constant 0 : index
    %c128 = arith.constant 128 : index
    %13 = vector.load %arg7[%c0_11, %c0_12, %c128] : memref<1x1x256xf32, #tpu.memory_space<vmem>>, vector<1x1x128xf32>
    %14 = vector.shape_cast %13 : vector<1x1x128xf32> to vector<1x128xf32>
    %15 = vector.shape_cast %12 : vector<1x128xf32> to vector<1x1x128xf32>
    tpu.vector_store %arg7[%c0_11, %c0_12, %c128], %15 {strides = array<i32>} : memref<1x1x256xf32, #tpu.memory_space<vmem>>, vector<1x1x128xf32>,
    %16 = arith.truncf %5 : vector<512x128xf32> to vector<512x128xbf16>
    %c0_13 = arith.constant 0 : index
    %c0_14 = arith.constant 0 : index
    %17 = vector.load %arg6[%c0_13, %c0_14] : memref<512x128xbf16, #tpu.memory_space<vmem>>, vector<512x128xbf16>
    tpu.vector_store %arg6[%c0_13, %c0_14], %16 {strides = array<i32>} : memref<512x128xbf16, #tpu.memory_space<vmem>>, vector<512x128xbf16>,
    return
  }
  func.func @transform_0(%arg0: i32) -> (i32, i32) {
    %c0_i32 = arith.constant 0 : i32
    %c0_i32_0 = arith.constant 0 : i32
    return %arg0, %c0_i32 : i32, i32
  }
  func.func @transform_1(%arg0: i32) -> (i32, i32) {
    %c0_i32 = arith.constant 0 : i32
    %c0_i32_0 = arith.constant 0 : i32
    %c0_i32_1 = arith.constant 0 : i32
    return %c0_i32, %c0_i32_0 : i32, i32
  }
  func.func @transform_2(%arg0: i32) -> (i32, i32) {
    %c0_i32 = arith.constant 0 : i32
    %c0_i32_0 = arith.constant 0 : i32
    %c0_i32_1 = arith.constant 0 : i32
    return %c0_i32, %c0_i32_0 : i32, i32
  }
  func.func @transform_3(%arg0: i32) -> (i32, i32) {
    %c0_i32 = arith.constant 0 : i32
    %c0_i32_0 = arith.constant 0 : i32
    %c0_i32_1 = arith.constant 0 : i32
    return %c0_i32, %c0_i32_0 : i32, i32
  }
  func.func @transform_4(%arg0: i32) -> (i32, i32) {
    %c0_i32 = arith.constant 0 : i32
    %c0_i32_0 = arith.constant 0 : i32
    %c0_i32_1 = arith.constant 0 : i32
    return %c0_i32, %c0_i32_0 : i32, i32
  }
  func.func @transform_5(%arg0: i32) -> (i32, i32) {
    %c0_i32 = arith.constant 0 : i32
    %c0_i32_0 = arith.constant 0 : i32
    return %arg0, %c0_i32 : i32, i32
  }
  func.func @transform_6(%arg0: i32) -> (i32, i32, i32) {
    %c0_i32 = arith.constant 0 : i32
    %c0_i32_0 = arith.constant 0 : i32
    %c0_i32_1 = arith.constant 0 : i32
    return %arg0, %c0_i32, %c0_i32_0 : i32, i32, i32
  }
}

module attributes {stable_mosaic.version = 11 : i64} {
  func.func @_conv1x1_bn_kernel(%arg0: i32, %arg1: memref<512x128xbf16, #tpu.memory_space<vmem>>, %arg2: memref<128x64xbf16, #tpu.memory_space<vmem>>, %arg3: memref<1x64xf32, #tpu.memory_space<vmem>>, %arg4: memref<1x128xf32, #tpu.memory_space<vmem>>, %arg5: memref<1x128xf32, #tpu.memory_space<vmem>>, %arg6: memref<512x64xbf16, #tpu.memory_space<vmem>>, %arg7: memref<1x1x128xf32, #tpu.memory_space<vmem>>) attributes {dimension_semantics = [#tpu.dimension_semantics<parallel>], iteration_bounds = array<i64: 1>, scalar_prefetch = 0 : i64, scratch_operands = 0 : i64, tpu.core_type = #tpu.core_type<tc>, window_params = [{transform_indices = @transform_0, window_bounds = array<i64: 512, 128>}, {pipeline_mode = #tpu.pipeline_mode<synchronous>, transform_indices = @transform_1, window_bounds = array<i64: 128, 64>}, {pipeline_mode = #tpu.pipeline_mode<synchronous>, transform_indices = @transform_2, window_bounds = array<i64: 1, 64>}, {pipeline_mode = #tpu.pipeline_mode<synchronous>, transform_indices = @transform_3, window_bounds = array<i64: 1, 128>}, {pipeline_mode = #tpu.pipeline_mode<synchronous>, transform_indices = @transform_4, window_bounds = array<i64: 1, 128>}, {transform_indices = @transform_5, window_bounds = array<i64: 512, 64>}, {transform_indices = @transform_6, window_bounds = array<i64: 1, 1, 128>}]} {
    %c0 = arith.constant 0 : index
    %c0_0 = arith.constant 0 : index
    %0 = vector.load %arg1[%c0, %c0_0] : memref<512x128xbf16, #tpu.memory_space<vmem>>, vector<512x128xbf16>
    %1 = arith.extf %0 : vector<512x128xbf16> to vector<512x128xf32>
    %c0_1 = arith.constant 0 : index
    %c0_2 = arith.constant 0 : index
    %2 = vector.load %arg4[%c0_1, %c0_2] : memref<1x128xf32, #tpu.memory_space<vmem>>, vector<1x128xf32>
    %3 = vector.broadcast %2 : vector<1x128xf32> to vector<512x128xf32>
    %4 = arith.mulf %1, %3 : vector<512x128xf32>
    %c0_3 = arith.constant 0 : index
    %c0_4 = arith.constant 0 : index
    %5 = vector.load %arg5[%c0_3, %c0_4] : memref<1x128xf32, #tpu.memory_space<vmem>>, vector<1x128xf32>
    %6 = vector.broadcast %5 : vector<1x128xf32> to vector<512x128xf32>
    %7 = arith.addf %4, %6 : vector<512x128xf32>
    %cst = arith.constant 0.000000e+00 : f32
    %8 = vector.broadcast %cst : f32 to vector<512x128xf32>
    %9 = arith.maximumf %7, %8 : vector<512x128xf32>
    %10 = arith.truncf %9 : vector<512x128xf32> to vector<512x128xbf16>
    %c0_5 = arith.constant 0 : index
    %c0_6 = arith.constant 0 : index
    %11 = vector.load %arg2[%c0_5, %c0_6] : memref<128x64xbf16, #tpu.memory_space<vmem>>, vector<128x64xbf16>
    %cst_7 = arith.constant dense<0.000000e+00> : vector<512x64xf32>
    %12 = tpu.matmul %10, %11, %cst_7 {dimension_numbers = #tpu.dot_dimension_numbers<[1], [0], [0], [1], [0, 0, 1, 1], [], []>} : vector<512x128xbf16>, vector<128x64xbf16>, vector<512x64xf32> -> vector<512x64xf32>
    %c0_8 = arith.constant 0 : index
    %c0_9 = arith.constant 0 : index
    %13 = vector.load %arg3[%c0_8, %c0_9] : memref<1x64xf32, #tpu.memory_space<vmem>>, vector<1x64xf32>
    %14 = vector.broadcast %13 : vector<1x64xf32> to vector<512x64xf32>
    %15 = arith.addf %12, %14 : vector<512x64xf32>
    %cst_10 = arith.constant 1.000000e+00 : f32
    %16 = vector.broadcast %cst_10 : f32 to vector<1x512xf32>
    %cst_11 = arith.constant dense<0.000000e+00> : vector<1x64xf32>
    %17 = tpu.matmul %16, %15, %cst_11 {dimension_numbers = #tpu.dot_dimension_numbers<[1], [0], [0], [1], [0, 0, 1, 1], [], []>} : vector<1x512xf32>, vector<512x64xf32>, vector<1x64xf32> -> vector<1x64xf32>
    %c0_12 = arith.constant 0 : index
    %c0_13 = arith.constant 0 : index
    %c0_14 = arith.constant 0 : index
    %18 = vector.load %arg7[%c0_12, %c0_13, %c0_14] : memref<1x1x128xf32, #tpu.memory_space<vmem>>, vector<1x1x64xf32>
    %19 = vector.shape_cast %18 : vector<1x1x64xf32> to vector<1x64xf32>
    %20 = vector.shape_cast %17 : vector<1x64xf32> to vector<1x1x64xf32>
    tpu.vector_store %arg7[%c0_12, %c0_13, %c0_14], %20 {strides = array<i32>} : memref<1x1x128xf32, #tpu.memory_space<vmem>>, vector<1x1x64xf32>,
    %21 = arith.mulf %15, %15 : vector<512x64xf32>
    %cst_15 = arith.constant dense<0.000000e+00> : vector<1x64xf32>
    %22 = tpu.matmul %16, %21, %cst_15 {dimension_numbers = #tpu.dot_dimension_numbers<[1], [0], [0], [1], [0, 0, 1, 1], [], []>} : vector<1x512xf32>, vector<512x64xf32>, vector<1x64xf32> -> vector<1x64xf32>
    %c0_16 = arith.constant 0 : index
    %c0_17 = arith.constant 0 : index
    %c64 = arith.constant 64 : index
    %23 = vector.load %arg7[%c0_16, %c0_17, %c64] : memref<1x1x128xf32, #tpu.memory_space<vmem>>, vector<1x1x64xf32>
    %24 = vector.shape_cast %23 : vector<1x1x64xf32> to vector<1x64xf32>
    %25 = vector.shape_cast %22 : vector<1x64xf32> to vector<1x1x64xf32>
    tpu.vector_store %arg7[%c0_16, %c0_17, %c64], %25 {strides = array<i32>} : memref<1x1x128xf32, #tpu.memory_space<vmem>>, vector<1x1x64xf32>,
    %26 = arith.truncf %15 : vector<512x64xf32> to vector<512x64xbf16>
    %c0_18 = arith.constant 0 : index
    %c0_19 = arith.constant 0 : index
    %27 = vector.load %arg6[%c0_18, %c0_19] : memref<512x64xbf16, #tpu.memory_space<vmem>>, vector<512x64xbf16>
    tpu.vector_store %arg6[%c0_18, %c0_19], %26 {strides = array<i32>} : memref<512x64xbf16, #tpu.memory_space<vmem>>, vector<512x64xbf16>,
    return
  }
  func.func @transform_0(%arg0: i32) -> (i32, i32) {
    %c0_i32 = arith.constant 0 : i32
    %c0_i32_0 = arith.constant 0 : i32
    return %arg0, %c0_i32 : i32, i32
  }
  func.func @transform_1(%arg0: i32) -> (i32, i32) {
    %c0_i32 = arith.constant 0 : i32
    %c0_i32_0 = arith.constant 0 : i32
    %c0_i32_1 = arith.constant 0 : i32
    return %c0_i32, %c0_i32_0 : i32, i32
  }
  func.func @transform_2(%arg0: i32) -> (i32, i32) {
    %c0_i32 = arith.constant 0 : i32
    %c0_i32_0 = arith.constant 0 : i32
    %c0_i32_1 = arith.constant 0 : i32
    return %c0_i32, %c0_i32_0 : i32, i32
  }
  func.func @transform_3(%arg0: i32) -> (i32, i32) {
    %c0_i32 = arith.constant 0 : i32
    %c0_i32_0 = arith.constant 0 : i32
    %c0_i32_1 = arith.constant 0 : i32
    return %c0_i32, %c0_i32_0 : i32, i32
  }
  func.func @transform_4(%arg0: i32) -> (i32, i32) {
    %c0_i32 = arith.constant 0 : i32
    %c0_i32_0 = arith.constant 0 : i32
    %c0_i32_1 = arith.constant 0 : i32
    return %c0_i32, %c0_i32_0 : i32, i32
  }
  func.func @transform_5(%arg0: i32) -> (i32, i32) {
    %c0_i32 = arith.constant 0 : i32
    %c0_i32_0 = arith.constant 0 : i32
    return %arg0, %c0_i32 : i32, i32
  }
  func.func @transform_6(%arg0: i32) -> (i32, i32, i32) {
    %c0_i32 = arith.constant 0 : i32
    %c0_i32_0 = arith.constant 0 : i32
    %c0_i32_1 = arith.constant 0 : i32
    return %arg0, %c0_i32, %c0_i32_0 : i32, i32, i32
  }
}

module attributes {stable_mosaic.version = 11 : i64} {
  func.func @_residual_bn_relu_kernel(%arg0: i32, %arg1: memref<32x1024xf32, #tpu.memory_space<vmem>>, %arg2: memref<32x1024xbf16, #tpu.memory_space<vmem>>, %arg3: memref<1x1024xf32, #tpu.memory_space<vmem>>, %arg4: memref<1x1024xf32, #tpu.memory_space<vmem>>, %arg5: memref<32x1024xf32, #tpu.memory_space<vmem>>) attributes {dimension_semantics = [#tpu.dimension_semantics<arbitrary>], iteration_bounds = array<i64: 1>, scalar_prefetch = 0 : i64, scratch_operands = 0 : i64, tpu.core_type = #tpu.core_type<tc>, window_params = [{pipeline_mode = #tpu.pipeline_mode<synchronous>, transform_indices = @transform_0, window_bounds = array<i64: 32, 1024>}, {pipeline_mode = #tpu.pipeline_mode<synchronous>, transform_indices = @transform_1, window_bounds = array<i64: 32, 1024>}, {pipeline_mode = #tpu.pipeline_mode<synchronous>, transform_indices = @transform_2, window_bounds = array<i64: 1, 1024>}, {pipeline_mode = #tpu.pipeline_mode<synchronous>, transform_indices = @transform_3, window_bounds = array<i64: 1, 1024>}, {pipeline_mode = #tpu.pipeline_mode<synchronous>, transform_indices = @transform_4, window_bounds = array<i64: 32, 1024>}]} {
    %c0 = arith.constant 0 : index
    %c0_0 = arith.constant 0 : index
    %0 = vector.load %arg2[%c0, %c0_0] : memref<32x1024xbf16, #tpu.memory_space<vmem>>, vector<32x1024xbf16>
    %1 = arith.extf %0 : vector<32x1024xbf16> to vector<32x1024xf32>
    %c0_1 = arith.constant 0 : index
    %c0_2 = arith.constant 0 : index
    %2 = vector.load %arg3[%c0_1, %c0_2] : memref<1x1024xf32, #tpu.memory_space<vmem>>, vector<1x1024xf32>
    %3 = vector.broadcast %2 : vector<1x1024xf32> to vector<32x1024xf32>
    %4 = arith.mulf %1, %3 : vector<32x1024xf32>
    %c0_3 = arith.constant 0 : index
    %c0_4 = arith.constant 0 : index
    %5 = vector.load %arg4[%c0_3, %c0_4] : memref<1x1024xf32, #tpu.memory_space<vmem>>, vector<1x1024xf32>
    %6 = vector.broadcast %5 : vector<1x1024xf32> to vector<32x1024xf32>
    %7 = arith.addf %4, %6 : vector<32x1024xf32>
    %c0_5 = arith.constant 0 : index
    %c0_6 = arith.constant 0 : index
    %8 = vector.load %arg1[%c0_5, %c0_6] : memref<32x1024xf32, #tpu.memory_space<vmem>>, vector<32x1024xf32>
    %9 = arith.addf %8, %7 : vector<32x1024xf32>
    %cst = arith.constant 0.000000e+00 : f32
    %10 = vector.broadcast %cst : f32 to vector<32x1024xf32>
    %11 = arith.maximumf %9, %10 : vector<32x1024xf32>
    %c0_7 = arith.constant 0 : index
    %c0_8 = arith.constant 0 : index
    %12 = vector.load %arg5[%c0_7, %c0_8] : memref<32x1024xf32, #tpu.memory_space<vmem>>, vector<32x1024xf32>
    tpu.vector_store %arg5[%c0_7, %c0_8], %11 {strides = array<i32>} : memref<32x1024xf32, #tpu.memory_space<vmem>>, vector<32x1024xf32>,
    return
  }
  func.func @transform_0(%arg0: i32) -> (i32, i32) {
    %c0_i32 = arith.constant 0 : i32
    %c0_i32_0 = arith.constant 0 : i32
    %c0_i32_1 = arith.constant 0 : i32
    return %c0_i32, %c0_i32_0 : i32, i32
  }
  func.func @transform_1(%arg0: i32) -> (i32, i32) {
    %c0_i32 = arith.constant 0 : i32
    %c0_i32_0 = arith.constant 0 : i32
    %c0_i32_1 = arith.constant 0 : i32
    return %c0_i32, %c0_i32_0 : i32, i32
  }
  func.func @transform_2(%arg0: i32) -> (i32, i32) {
    %c0_i32 = arith.constant 0 : i32
    %c0_i32_0 = arith.constant 0 : i32
    %c0_i32_1 = arith.constant 0 : i32
    return %c0_i32, %c0_i32_0 : i32, i32
  }
  func.func @transform_3(%arg0: i32) -> (i32, i32) {
    %c0_i32 = arith.constant 0 : i32
    %c0_i32_0 = arith.constant 0 : i32
    %c0_i32_1 = arith.constant 0 : i32
    return %c0_i32, %c0_i32_0 : i32, i32
  }
  func.func @transform_4(%arg0: i32) -> (i32, i32) {
    %c0_i32 = arith.constant 0 : i32
    %c0_i32_0 = arith.constant 0 : i32
    %c0_i32_1 = arith.constant 0 : i32
    return %c0_i32, %c0_i32_0 : i32, i32
  }
}

</mosaic_0001>

<bundles_post_ra>
// kernel: bottleneck_apply.4
= control target key start
LH: loop header
LB: loop body
LE: loop exit
PB: predicated region body
PF: predicated region fallthrough
CT: control target
= control target key end

     0   :  { %vm286_vm0 = vcmask 523264   ;;  %v2835_v36 = vmov 1.0   ;;  %s2828_s1 = inlined_call_operand.vmem [shape: bf16[64,128], index: 1, kind: input, shape index: {}]   ;;  %s2829_s3 = inlined_call_operand.vmem [shape: f32[1,64], index: 3, kind: input, shape index: {}]   ;;  %s2830_s4 = inlined_call_operand.vmem [shape: f32[1,64], index: 4, kind: input, shape index: {}]   ;;  %s2831_s0 = inlined_call_operand.vmem [shape: bf16[512,64], index: 0, kind: input, shape index: {}]   ;;  %s2832_s2 = inlined_call_operand.vmem [shape: f32[1,128], index: 2, kind: input, shape index: {}]   ;;  %s2833_s5 = inlined_call_operand.vmem [shape: bf16[512,128], index: 5, kind: output, shape index: {0}]   ;;  %s2834_s6 = inlined_call_operand.vmem [shape: f32[1,1,256], index: 6, kind: output, shape index: {1}]  }
   0x1   :  { %v2115_v0 = vld [vmem:[%s2828_s1] sm:$0xff]   ;;  %v2116_v1 = vld [vmem:[%s2828_s1 + $0x8] sm:$0xff]   ;;  %v2117_v2 = vld [vmem:[%s2828_s1 + $0x10] sm:$0xff]   ;;  %736 = vmatprep.mubr.f32.mxu1 %v2835_v36 }
   0x2   :  { %1914 = vmatprep.subr.bf16.mxu0 %v2115_v0  ;;  %v2119_v3 = vld [vmem:[%s2831_s0] sm:$0xff]   ;;  %v2118_v4 = vld [vmem:[%s2828_s1 + $0x18] sm:$0xff]   ;;  %v2120_v5 = vld [vmem:[%s2831_s0 + $0x8] sm:$0xff]  }
   0x3   :  { %1915 = vmatpush3.bf16.msra.mxu0 %v2115_v0  ;;  %1922 = vmatprep.mubr.msk.bf16.mxu0 %vm286_vm0, %v2119_v3  ;;  %v2121_v6 = vld [vmem:[%s2831_s0 + $0x10] sm:$0xff]   ;;  %v2122_v7 = vld [vmem:[%s2831_s0 + $0x18] sm:$0xff]   ;;  %v2123_v8 = vld [vmem:[%s2831_s0 + $0x20] sm:$0xff]  }
   0x4   :  { %1916 = vmatprep.subr.bf16.mxu0 %v2116_v1  ;;  %v2124_v9 = vld [vmem:[%s2831_s0 + $0x28] sm:$0xff]   ;;  %v2125_v10 = vld [vmem:[%s2831_s0 + $0x30] sm:$0xff]   ;;  %v2126_v11 = vld [vmem:[%s2831_s0 + $0x38] sm:$0xff]  }
   0x5   :  { %v2127_v12 = vld [vmem:[%s2831_s0 + $0x40] sm:$0xff]   ;;  %v2128_v13 = vld [vmem:[%s2831_s0 + $0x48] sm:$0xff]   ;;  %v2129_v14 = vld [vmem:[%s2831_s0 + $0x50] sm:$0xff]  }
   0x6   :  { %v2130_v15 = vld [vmem:[%s2831_s0 + $0x58] sm:$0xff]   ;;  %v2131_v16 = vld [vmem:[%s2831_s0 + $0x60] sm:$0xff]   ;;  %v2132_v17 = vld [vmem:[%s2831_s0 + $0x68] sm:$0xff]  }
   0x7   :  { %1917 = vmatpush3.bf16.msra.mxu0 %v2116_v1  ;;  %v2133_v18 = vld [vmem:[%s2831_s0 + $0x70] sm:$0xff]   ;;  %v2134_v19 = vld [vmem:[%s2831_s0 + $0x78] sm:$0xff]   ;;  %v2135_v20 = vld [vmem:[%s2831_s0 + $0x80] sm:$0xff]  }
   0x8   :  { %1918 = vmatprep.subr.bf16.mxu0 %v2117_v2  ;;  %v2136_v21 = vld [vmem:[%s2831_s0 + $0x88] sm:$0xff]   ;;  %v2137_v22 = vld [vmem:[%s2831_s0 + $0x90] sm:$0xff]   ;;  %v2138_v23 = vld [vmem:[%s2831_s0 + $0x98] sm:$0xff]  }
   0x9   :  { %v2139_v24 = vld [vmem:[%s2831_s0 + $0xa0] sm:$0xff]   ;;  %v2140_v25 = vld [vmem:[%s2831_s0 + $0xa8] sm:$0xff]   ;;  %v2141_v26 = vld [vmem:[%s2831_s0 + $0xb0] sm:$0xff]  }
   0xa   :  { %v2142_v27 = vld [vmem:[%s2831_s0 + $0xb8] sm:$0xff]   ;;  %v2143_v28 = vld [vmem:[%s2831_s0 + $0xc0] sm:$0xff]   ;;  %v2144_v29 = vld [vmem:[%s2831_s0 + $0xc8] sm:$0xff]  }
   0xb   :  { %1919 = vmatpush3.bf16.msra.mxu0 %v2117_v2  ;;  %v2145_v30 = vld [vmem:[%s2831_s0 + $0xd0] sm:$0xff]   ;;  %v2146_v31 = vld [vmem:[%s2831_s0 + $0xd8] sm:$0xff]   ;;  %v2147_v32 = vld [vmem:[%s2831_s0 + $0xe0] sm:$0xff]  }
   0xc   :  { %1920 = vmatprep.subr.bf16.mxu0 %v2118_v4  ;;  %v2148_v33 = vld [vmem:[%s2831_s0 + $0xe8] sm:$0xff]   ;;  %v2149_v34 = vld [vmem:[%s2831_s0 + $0xf0] sm:$0xff]   ;;  %v2150_v35 = vld [vmem:[%s2831_s0 + $0xf8] sm:$0xff]  }
   0xd   :  { %v2331_v37 = vld [vmem:[%s2832_s2] ss:$0 sm:$0xff] }
   0xf   :  { %1921 = vmatpush3.bf16.msra.mxu0 %v2118_v4 }
  0x12   :  { %1923 = vmatmul.mubr.msk.bf16.vlgmr.msra.gmra.mrb[0].mxu0 %vm286_vm0, %v2120_v5 }
  0x13   :  { %1926 = vmatprep.mubr.msk.bf16.mxu0 %vm286_vm0, %v2121_v6 }
  0x1a   :  { %1927 = vmatmul.mubr.msk.bf16.gmra.mrb[4].mxu0 %vm286_vm0, %v2122_v7 }
  0x1b   :  { %1930 = vmatprep.mubr.msk.bf16.mxu0 %vm286_vm0, %v2123_v8 }
  0x22   :  { %1931 = vmatmul.mubr.msk.bf16.gmra.mrb[8].mxu0 %vm286_vm0, %v2124_v9 }
  0x23   :  { %1934 = vmatprep.mubr.msk.bf16.mxu0 %vm286_vm0, %v2125_v10 }
  0x2a   :  { %1935 = vmatmul.mubr.msk.bf16.gmra.mrb[12].mxu0 %vm286_vm0, %v2126_v11 }
  0x2b   :  { %1938 = vmatprep.mubr.msk.bf16.mxu0 %vm286_vm0, %v2127_v12 }
  0x32   :  { %1939 = vmatmul.mubr.msk.bf16.gmra.mrb[16].mxu0 %vm286_vm0, %v2128_v13 }
  0x33   :  { %1942 = vmatprep.mubr.msk.bf16.mxu0 %vm286_vm0, %v2129_v14 }
  0x3a   :  { %1943 = vmatmul.mubr.msk.bf16.gmra.mrb[20].mxu0 %vm286_vm0, %v2130_v15 }
  0x3b   :  { %1946 = vmatprep.mubr.msk.bf16.mxu0 %vm286_vm0, %v2131_v16 }
  0x42   :  { %1947 = vmatmul.mubr.msk.bf16.gmra.mrb[24].mxu0 %vm286_vm0, %v2132_v17 }
  0x43   :  { %1950 = vmatprep.mubr.msk.bf16.mxu0 %vm286_vm0, %v2133_v18 }
  0x4a   :  { %1951 = vmatmul.mubr.msk.bf16.gmra.mrb[28].mxu0 %vm286_vm0, %v2134_v19 }
  0x4b   :  { %1954 = vmatprep.mubr.msk.bf16.mxu0 %vm286_vm0, %v2135_v20 }
  0x52   :  { %1955 = vmatmul.mubr.msk.bf16.gmra.mrb[32].mxu0 %vm286_vm0, %v2136_v21 }
  0x53   :  { %1958 = vmatprep.mubr.msk.bf16.mxu0 %vm286_vm0, %v2137_v22 }
  0x5a   :  { %1959 = vmatmul.mubr.msk.bf16.gmra.mrb[36].mxu0 %vm286_vm0, %v2138_v23 }
  0x5b   :  { %1962 = vmatprep.mubr.msk.bf16.mxu0 %vm286_vm0, %v2139_v24 }
  0x62   :  { %1963 = vmatmul.mubr.msk.bf16.gmra.mrb[40].mxu0 %vm286_vm0, %v2140_v25 }
  0x63   :  { %1966 = vmatprep.mubr.msk.bf16.mxu0 %vm286_vm0, %v2141_v26 }
  0x6a   :  { %1967 = vmatmul.mubr.msk.bf16.gmra.mrb[44].mxu0 %vm286_vm0, %v2142_v27 }
  0x6b   :  { %1970 = vmatprep.mubr.msk.bf16.mxu0 %vm286_vm0, %v2143_v28 }
  0x72   :  { %1971 = vmatmul.mubr.msk.bf16.gmra.mrb[48].mxu0 %vm286_vm0, %v2144_v29 }
  0x73   :  { %1974 = vmatprep.mubr.msk.bf16.mxu0 %vm286_vm0, %v2145_v30 }
  0x7a   :  { %1975 = vmatmul.mubr.msk.bf16.gmra.mrb[52].mxu0 %vm286_vm0, %v2146_v31 }
  0x7b   :  { %1978 = vmatprep.mubr.msk.bf16.mxu0 %vm286_vm0, %v2147_v32 }
  0x82   :  { %1979 = vmatmul.mubr.msk.bf16.gmra.mrb[56].mxu0 %vm286_vm0, %v2148_v33 }
  0x83   :  { %1982 = vmatprep.mubr.msk.bf16.mxu0 %vm286_vm0, %v2149_v34 }
  0x8a   :  { %1983 = vmatmul.mubr.msk.bf16.gmra.mrb[60].mxu0 %vm286_vm0, %v2150_v35 }
  0xe5   :  { %v1924_v38 = vpop.f32.mrb[0].mxu0 }
  0xe6   :  { %v426_v39 = vadd.f32 %v1924_v38, %v2331_v37  ;;  %v417_v40 = vpop.f32.mrb[1].mxu0 }
  0xe7   :  { %v418_v41 = vadd.f32 %v2331_v37, %v417_v40  ;;  %v1925_v42 = vpop.f32.mrb[2].mxu0 }
  0xe8   :  { %v429_v43 = vadd.f32 %v1925_v42, %v2331_v37  ;;  %v420_v44 = vpop.f32.mrb[3].mxu0  ;;  %v2337_v46 = vmul.f32 %v426_v39, %v426_v39 }
  0xe9   :  { %v421_v45 = vadd.f32 %v2331_v37, %v420_v44  ;;  %v2343_v49 = vmul.f32 %v418_v41, %v418_v41 }
  0xea   :  { %v2339_v47 = vpack.c.bf16 %v429_v43, %v426_v39  ;;  %v2341_v48 = vmul.f32 %v429_v43, %v429_v43 }
  0xeb   :  { %v2345_v50 = vmul.f32 %v421_v45, %v421_v45  ;;  %v2347_v51 = vpack.c.bf16 %v421_v45, %v418_v41 }
  0xec   :  { %1707 = vst [vmem:[%s2833_s5 + $0x8] sm:$0xff] %v2339_v47  }
  0xed   :  { %v1928_v54 = vpop.f32.mrb[4].mxu0  ;;  %1551 = vst [vmem:[%s2833_s5] sm:$0xff] %v2347_v51  }
  0xee   :  { %v442_v55 = vadd.f32 %v1928_v54, %v2331_v37  ;;  %v433_v56 = vpop.f32.mrb[5].mxu0 }
  0xef   :  { %v434_v57 = vadd.f32 %v2331_v37, %v433_v56  ;;  %v1929_v58 = vpop.f32.mrb[6].mxu0 }
  0xf0   :  { %v445_v59 = vadd.f32 %v1929_v58, %v2331_v37  ;;  %v436_v60 = vpop.f32.mrb[7].mxu0  ;;  %v2365_v62 = vmul.f32 %v442_v55, %v442_v55 }
  0xf1   :  { %v437_v61 = vadd.f32 %v2331_v37, %v436_v60  ;;  %v2371_v1 = vmul.f32 %v434_v57, %v434_v57 }
  0xf2   :  { %v2367_v63 = vpack.c.bf16 %v445_v59, %v442_v55  ;;  %v2369_v0 = vmul.f32 %v445_v59, %v445_v59 }
  0xf3   :  { %v2373_v2 = vpack.c.bf16 %v437_v61, %v434_v57  ;;  %v2375_v3 = vmul.f32 %v437_v61, %v437_v61 }
  0xf4   :  { %1709 = vst [vmem:[%s2833_s5 + $0x18] sm:$0xff] %v2367_v63  }
  0xf5   :  { %1708 = vst [vmem:[%s2833_s5 + $0x10] sm:$0xff] %v2373_v2   ;;  %v1932_v6 = vpop.f32.mrb[8].mxu0 }
  0xf6   :  { %v458_v7 = vadd.f32 %v1932_v6, %v2331_v37  ;;  %v449_v8 = vpop.f32.mrb[9].mxu0 }
  0xf7   :  { %v450_v9 = vadd.f32 %v2331_v37, %v449_v8  ;;  %v1933_v10 = vpop.f32.mrb[10].mxu0 }
  0xf8   :  { %v461_v11 = vadd.f32 %v1933_v10, %v2331_v37  ;;  %v452_v12 = vpop.f32.mrb[11].mxu0  ;;  %v2393_v14 = vmul.f32 %v458_v7, %v458_v7 }
  0xf9   :  { %v453_v13 = vadd.f32 %v2331_v37, %v452_v12  ;;  %v2399_v17 = vmul.f32 %v450_v9, %v450_v9 }
  0xfa   :  { %v2395_v15 = vpack.c.bf16 %v461_v11, %v458_v7  ;;  %v2397_v16 = vmul.f32 %v461_v11, %v461_v11 }
  0xfb   :  { %v2401_v18 = vpack.c.bf16 %v453_v13, %v450_v9  ;;  %v2403_v19 = vmul.f32 %v453_v13, %v453_v13 }
  0xfc   :  { %1711 = vst [vmem:[%s2833_s5 + $0x28] sm:$0xff] %v2395_v15  }
  0xfd   :  { %1710 = vst [vmem:[%s2833_s5 + $0x20] sm:$0xff] %v2401_v18   ;;  %v1936_v22 = vpop.f32.mrb[12].mxu0 }
  0xfe   :  { %v474_v23 = vadd.f32 %v1936_v22, %v2331_v37  ;;  %v465_v24 = vpop.f32.mrb[13].mxu0 }
  0xff   :  { %v466_v25 = vadd.f32 %v2331_v37, %v465_v24  ;;  %v1937_v26 = vpop.f32.mrb[14].mxu0 }
 0x100   :  { %v477_v27 = vadd.f32 %v1937_v26, %v2331_v37  ;;  %v468_v28 = vpop.f32.mrb[15].mxu0  ;;  %v2421_v30 = vmul.f32 %v474_v23, %v474_v23 }
 0x101   :  { %v469_v29 = vadd.f32 %v2331_v37, %v468_v28  ;;  %v2427_v33 = vmul.f32 %v466_v25, %v466_v25 }
 0x102   :  { %v2423_v31 = vpack.c.bf16 %v477_v27, %v474_v23  ;;  %v2425_v32 = vmul.f32 %v477_v27, %v477_v27 }
 0x103   :  { %v2429_v34 = vpack.c.bf16 %v469_v29, %v466_v25  ;;  %v2431_v35 = vmul.f32 %v469_v29, %v469_v29 }
 0x104   :  { %1713 = vst [vmem:[%s2833_s5 + $0x38] sm:$0xff] %v2423_v31  }
 0x105   :  { %1712 = vst [vmem:[%s2833_s5 + $0x30] sm:$0xff] %v2429_v34   ;;  %v1940_v40 = vpop.f32.mrb[16].mxu0 }
 0x106   :  { %v490_v41 = vadd.f32 %v1940_v40, %v2331_v37  ;;  %v481_v42 = vpop.f32.mrb[17].mxu0 }
 0x107   :  { %v482_v43 = vadd.f32 %v2331_v37, %v481_v42  ;;  %v1941_v44 = vpop.f32.mrb[18].mxu0 }
 0x108   :  { %v493_v45 = vadd.f32 %v1941_v44, %v2331_v37  ;;  %v484_v54 = vpop.f32.mrb[19].mxu0  ;;  %v2449_v56 = vmul.f32 %v490_v41, %v490_v41 }
 0x109   :  { %v485_v55 = vadd.f32 %v2331_v37, %v484_v54  ;;  %v2453_v59 = vmul.f32 %v482_v43, %v482_v43 }
 0x10a   :  { %v1990_v57 = vpack.c.bf16 %v493_v45, %v490_v41  ;;  %v2451_v58 = vmul.f32 %v493_v45, %v493_v45 }
 0x10b   :  { %v2455_v60 = vmul.f32 %v485_v55, %v485_v55  ;;  %v1986_v61 = vpack.c.bf16 %v485_v55, %v482_v43 }
 0x10c   :  { %1715 = vst [vmem:[%s2833_s5 + $0x48] sm:$0xff] %v1990_v57  }
 0x10d   :  { %v1944_v7 = vpop.f32.mrb[20].mxu0  ;;  %1987 = vmatprep.subr.bf16.mxu1 %v1986_v61  ;;  %1714 = vst [vmem:[%s2833_s5 + $0x40] sm:$0xff] %v1986_v61  }
 0x10e   :  { %v506_v9 = vadd.f32 %v1944_v7, %v2331_v37  ;;  %v497_v10 = vpop.f32.mrb[21].mxu0  ;;  %1989 = vmatpush3.bf16.msra.mxu1 %v2347_v51 }
 0x10f   :  { %v498_v11 = vadd.f32 %v2331_v37, %v497_v10  ;;  %v1945_v12 = vpop.f32.mrb[22].mxu0  ;;  %1991 = vmatprep.subr.bf16.mxu1 %v1990_v57 }
 0x110   :  { %v509_v13 = vadd.f32 %v1945_v12, %v2331_v37  ;;  %v500_v22 = vpop.f32.mrb[23].mxu0  ;;  %v2472_v24 = vmul.f32 %v506_v9, %v506_v9 }
 0x111   :  { %v501_v23 = vadd.f32 %v2331_v37, %v500_v22  ;;  %v2477_v27 = vmul.f32 %v498_v11, %v498_v11 }
 0x112   :  { %v1998_v25 = vpack.c.bf16 %v509_v13, %v506_v9  ;;  %v2474_v26 = vmul.f32 %v509_v13, %v509_v13  ;;  %1993 = vmatpush3.bf16.msra.mxu1 %v2339_v47 }
 0x113   :  { %v1994_v28 = vpack.c.bf16 %v501_v23, %v498_v11  ;;  %v2479_v51 = vmul.f32 %v501_v23, %v501_v23 }
 0x114   :  { %1717 = vst [vmem:[%s2833_s5 + $0x58] sm:$0xff] %v1998_v25  }
 0x115   :  { %1716 = vst [vmem:[%s2833_s5 + $0x50] sm:$0xff] %v1994_v28   ;;  %v1948_v40 = vpop.f32.mrb[24].mxu0  ;;  %1995 = vmatprep.subr.bf16.mxu1 %v1994_v28 }
 0x116   :  { %v522_v41 = vadd.f32 %v1948_v40, %v2331_v37  ;;  %v513_v42 = vpop.f32.mrb[25].mxu0  ;;  %1997 = vmatpush3.bf16.msra.mxu1 %v2373_v2 }
 0x117   :  { %v514_v43 = vadd.f32 %v2331_v37, %v513_v42  ;;  %v1949_v44 = vpop.f32.mrb[26].mxu0  ;;  %1999 = vmatprep.subr.bf16.mxu1 %v1998_v25 }
 0x118   :  { %v525_v45 = vadd.f32 %v1949_v44, %v2331_v37  ;;  %v516_v54 = vpop.f32.mrb[27].mxu0  ;;  %v2496_v57 = vmul.f32 %v522_v41, %v522_v41 }
 0x119   :  { %v517_v55 = vadd.f32 %v2331_v37, %v516_v54  ;;  %v2501_v9 = vmul.f32 %v514_v43, %v514_v43 }
 0x11a   :  { %v2006_v61 = vpack.c.bf16 %v525_v45, %v522_v41  ;;  %v2498_v7 = vmul.f32 %v525_v45, %v525_v45  ;;  %2001 = vmatpush3.bf16.msra.mxu1 %v2367_v63 }
 0x11b   :  { %v2002_v10 = vpack.c.bf16 %v517_v55, %v514_v43  ;;  %v2503_v2 = vmul.f32 %v517_v55, %v517_v55 }
 0x11c   :  { %1719 = vst [vmem:[%s2833_s5 + $0x68] sm:$0xff] %v2006_v61  }
 0x11d   :  { %1718 = vst [vmem:[%s2833_s5 + $0x60] sm:$0xff] %v2002_v10   ;;  %v1952_v12 = vpop.f32.mrb[28].mxu0  ;;  %2003 = vmatprep.subr.bf16.mxu1 %v2002_v10 }
 0x11e   :  { %v538_v13 = vadd.f32 %v1952_v12, %v2331_v37  ;;  %v529_v22 = vpop.f32.mrb[29].mxu0  ;;  %2005 = vmatpush3.bf16.msra.mxu1 %v2401_v18 }
 0x11f   :  { %v530_v23 = vadd.f32 %v2331_v37, %v529_v22  ;;  %v1953_v25 = vpop.f32.mrb[30].mxu0  ;;  %2007 = vmatprep.subr.bf16.mxu1 %v2006_v61 }
 0x120   :  { %v541_v28 = vadd.f32 %v1953_v25, %v2331_v37  ;;  %v532_v40 = vpop.f32.mrb[31].mxu0  ;;  %v2520_v42 = vmul.f32 %v538_v13, %v538_v13 }
 0x121   :  { %v533_v41 = vadd.f32 %v2331_v37, %v532_v40  ;;  %v2525_v45 = vmul.f32 %v530_v23, %v530_v23 }
 0x122   :  { %v2014_v43 = vpack.c.bf16 %v541_v28, %v538_v13  ;;  %v2522_v44 = vmul.f32 %v541_v28, %v541_v28  ;;  %2009 = vmatpush3.bf16.msra.mxu1 %v2395_v15 }
 0x123   :  { %v2010_v54 = vpack.c.bf16 %v533_v41, %v530_v23  ;;  %v2527_v18 = vmul.f32 %v533_v41, %v533_v41 }
 0x124   :  { %1721 = vst [vmem:[%s2833_s5 + $0x78] sm:$0xff] %v2014_v43  }
 0x125   :  { %1720 = vst [vmem:[%s2833_s5 + $0x70] sm:$0xff] %v2010_v54   ;;  %v1956_v61 = vpop.f32.mrb[32].mxu0  ;;  %2011 = vmatprep.subr.bf16.mxu1 %v2010_v54 }
 0x126   :  { %v554_v10 = vadd.f32 %v1956_v61, %v2331_v37  ;;  %v545_v12 = vpop.f32.mrb[33].mxu0  ;;  %2013 = vmatpush3.bf16.msra.mxu1 %v2429_v34 }
 0x127   :  { %v546_v13 = vadd.f32 %v2331_v37, %v545_v12  ;;  %v1957_v22 = vpop.f32.mrb[34].mxu0  ;;  %2015 = vmatprep.subr.bf16.mxu1 %v2014_v43 }
 0x128   :  { %v557_v23 = vadd.f32 %v1957_v22, %v2331_v37  ;;  %v548_v25 = vpop.f32.mrb[35].mxu0  ;;  %v2544_v40 = vmul.f32 %v554_v10, %v554_v10 }
 0x129   :  { %v549_v28 = vadd.f32 %v2331_v37, %v548_v25  ;;  %v2551_v61 = vmul.f32 %v546_v13, %v546_v13 }
 0x12a   :  { %v2546_v41 = vpack.c.bf16 %v557_v23, %v554_v10  ;;  %v2548_v54 = vmul.f32 %v557_v23, %v557_v23  ;;  %2017 = vmatpush3.bf16.msra.mxu1 %v2423_v31 }
 0x12b   :  { %v2553_v34 = vpack.c.bf16 %v549_v28, %v546_v13  ;;  %v2555_v12 = vmul.f32 %v549_v28, %v549_v28 }
 0x12c   :  { %1723 = vst [vmem:[%s2833_s5 + $0x88] sm:$0xff] %v2546_v41  }
 0x12d   :  { %1722 = vst [vmem:[%s2833_s5 + $0x80] sm:$0xff] %v2553_v34   ;;  %v1960_v31 = vpop.f32.mrb[36].mxu0  ;;  %737 = vmatmul.mubr.f32.vlgmr.msra.gmra.mrb[0].mxu1 %v2835_v36 }
 0x12e   :  { %v570_v13 = vadd.f32 %v1960_v31, %v2331_v37  ;;  %v561_v22 = vpop.f32.mrb[37].mxu0  ;;  %806 = vmatprep.mubr.f32.mxu1 %v2835_v36 }
 0x12f   :  { %v562_v23 = vadd.f32 %v2331_v37, %v561_v22  ;;  %v1961_v25 = vpop.f32.mrb[38].mxu0 }
 0x130   :  { %v573_v28 = vadd.f32 %v1961_v25, %v2331_v37  ;;  %v564_v43 = vpop.f32.mrb[39].mxu0  ;;  %v2575_v38 = vmul.f32 %v570_v13, %v570_v13 }
 0x131   :  { %v565_v10 = vadd.f32 %v2331_v37, %v564_v43  ;;  %v2581_v15 = vmul.f32 %v562_v23, %v562_v23 }
 0x132   :  { %2851 = vst [vmem:[#allocation2_spill] sm:$0xff] %v2575_v38  ;;  %v2577_v55 = vpack.c.bf16 %v573_v28, %v570_v13  ;;  %v2579_v39 = vmul.f32 %v573_v28, %v573_v28 }
 0x133   :  { %2853 = vst [vmem:[#allocation4_spill] sm:$0xff] %v2581_v15  ;;  %v2583_v31 = vpack.c.bf16 %v565_v10, %v562_v23  ;;  %v2585_v20 = vmul.f32 %v565_v10, %v565_v10 }
 0x134   :  { %2852 = vst [vmem:[#allocation3_spill] sm:$0xff] %v2579_v39  ;;  %1725 = vst [vmem:[%s2833_s5 + $0x98] sm:$0xff] %v2577_v55  }
 0x135   :  { %2854 = vst [vmem:[#allocation5_spill] sm:$0xff] %v2585_v20  ;;  %1724 = vst [vmem:[%s2833_s5 + $0x90] sm:$0xff] %v2583_v31   ;;  %v1964_v13 = vpop.f32.mrb[40].mxu0 }
 0x136   :  { %v586_v10 = vadd.f32 %v1964_v13, %v2331_v37  ;;  %v577_v23 = vpop.f32.mrb[41].mxu0 }
 0x137   :  { %v578_v25 = vadd.f32 %v2331_v37, %v577_v23  ;;  %v1965_v28 = vpop.f32.mrb[42].mxu0 }
 0x138   :  { %v589_v22 = vadd.f32 %v1965_v28, %v2331_v37  ;;  %v580_v11 = vpop.f32.mrb[43].mxu0  ;;  %v2603_v63 = vmul.f32 %v586_v10, %v586_v10 }
 0x139   :  { %v581_v21 = vadd.f32 %v2331_v37, %v580_v11  ;;  %v2609_v29 = vmul.f32 %v578_v25, %v578_v25 }
 0x13a   :  { %2855 = vst [vmem:[#allocation6_spill] sm:$0xff] %v2603_v63  ;;  %v2605_v43 = vpack.c.bf16 %v589_v22, %v586_v10  ;;  %v2607_v4 = vmul.f32 %v589_v22, %v589_v22 }
 0x13b   :  { %2857 = vst [vmem:[#allocation8_spill] sm:$0xff] %v2609_v29  ;;  %v2611_v5 = vpack.c.bf16 %v581_v21, %v578_v25  ;;  %v2613_v13 = vmul.f32 %v581_v21, %v581_v21 }
 0x13c   :  { %2856 = vst [vmem:[#allocation7_spill] sm:$0xff] %v2607_v4  ;;  %1727 = vst [vmem:[%s2833_s5 + $0xa8] sm:$0xff] %v2605_v43  }
 0x13d   :  { %2858 = vst [vmem:[#allocation9_spill] sm:$0xff] %v2613_v13  ;;  %1726 = vst [vmem:[%s2833_s5 + $0xa0] sm:$0xff] %v2611_v5   ;;  %v1968_v22 = vpop.f32.mrb[44].mxu0 }
 0x13e   :  { %v602_v21 = vadd.f32 %v1968_v22, %v2331_v37  ;;  %v593_v10 = vpop.f32.mrb[45].mxu0 }
 0x13f   :  { %v594_v25 = vadd.f32 %v2331_v37, %v593_v10  ;;  %v1969_v28 = vpop.f32.mrb[46].mxu0 }
 0x140   :  { %v605_v23 = vadd.f32 %v1969_v28, %v2331_v37  ;;  %v596_v47 = vpop.f32.mrb[47].mxu0  ;;  %v2631_v6 = vmul.f32 %v602_v21, %v602_v21 }
 0x141   :  { %v597_v52 = vadd.f32 %v2331_v37, %v596_v47  ;;  %v2637_v36 = vmul.f32 %v594_v25, %v594_v25 }
 0x142   :  { %2859 = vst [vmem:[#allocation10_spill] sm:$0xff] %v2631_v6  ;;  %v2633_v11 = vpack.c.bf16 %v605_v23, %v602_v21  ;;  %v2635_v53 = vmul.f32 %v605_v23, %v605_v23 }
 0x143   :  { %2861 = vst [vmem:[#allocation12_spill] sm:$0xff] %v2637_v36  ;;  %v2639_v8 = vpack.c.bf16 %v597_v52, %v594_v25  ;;  %v2641_v22 = vmul.f32 %v597_v52, %v597_v52 }
 0x144   :  { %2860 = vst [vmem:[#allocation11_spill] sm:$0xff] %v2635_v53  ;;  %1729 = vst [vmem:[%s2833_s5 + $0xb8] sm:$0xff] %v2633_v11  }
 0x145   :  { %2862 = vst [vmem:[#allocation13_spill] sm:$0xff] %v2641_v22  ;;  %1728 = vst [vmem:[%s2833_s5 + $0xb0] sm:$0xff] %v2639_v8   ;;  %v1972_v23 = vpop.f32.mrb[48].mxu0 }
 0x146   :  { %v618_v52 = vadd.f32 %v1972_v23, %v2331_v37  ;;  %v609_v21 = vpop.f32.mrb[49].mxu0 }
 0x147   :  { %v610_v25 = vadd.f32 %v2331_v37, %v609_v21  ;;  %v1973_v28 = vpop.f32.mrb[50].mxu0 }
 0x148   :  { %v621_v10 = vadd.f32 %v1973_v28, %v2331_v37  ;;  %v612_v6 = vpop.f32.mrb[51].mxu0  ;;  %v2659_v63 = vmul.f32 %v618_v52, %v618_v52 }
 0x149   :  { %v613_v53 = vadd.f32 %v2331_v37, %v612_v6  ;;  %v2663_v22 = vmul.f32 %v610_v25, %v610_v25 }
 0x14a   :  { %v2022_v47 = vpack.c.bf16 %v621_v10, %v618_v52  ;;  %v2661_v36 = vmul.f32 %v621_v10, %v621_v10 }
 0x14b   :  { %v2018_v4 = vpack.c.bf16 %v613_v53, %v610_v25  ;;  %v2665_v29 = vmul.f32 %v613_v53, %v613_v53 }
 0x14c   :  { %1731 = vst [vmem:[%s2833_s5 + $0xc8] sm:$0xff] %v2022_v47  }
 0x14d   :  { %1730 = vst [vmem:[%s2833_s5 + $0xc0] sm:$0xff] %v2018_v4   ;;  %v1976_v6 = vpop.f32.mrb[52].mxu0  ;;  %2019 = vmatprep.subr.bf16.mxu1 %v2018_v4 }
 0x14e   :  { %v634_v52 = vadd.f32 %v1976_v6, %v2331_v37  ;;  %v625_v53 = vpop.f32.mrb[53].mxu0  ;;  %2021 = vmatpush3.bf16.msra.mxu1 %v2553_v34 }
 0x14f   :  { %v626_v21 = vadd.f32 %v2331_v37, %v625_v53  ;;  %v1977_v25 = vpop.f32.mrb[54].mxu0  ;;  %2023 = vmatprep.subr.bf16.mxu1 %v2022_v47 }
 0x150   :  { %v637_v28 = vadd.f32 %v1977_v25, %v2331_v37  ;;  %v628_v23 = vpop.f32.mrb[55].mxu0  ;;  %v2682_v38 = vmul.f32 %v634_v52, %v634_v52 }
 0x151   :  { %v629_v13 = vadd.f32 %v2331_v37, %v628_v23  ;;  %v2687_v6 = vmul.f32 %v626_v21, %v626_v21 }
 0x152   :  { %2863 = vst [vmem:[#allocation14_spill] sm:$0xff] %v2682_v38  ;;  %v2030_v4 = vpack.c.bf16 %v637_v28, %v634_v52  ;;  %v2684_v39 = vmul.f32 %v637_v28, %v637_v28  ;;  %2025 = vmatpush3.bf16.msra.mxu1 %v2546_v41 }
 0x153   :  { %v2026_v10 = vpack.c.bf16 %v629_v13, %v626_v21  ;;  %v2689_v34 = vmul.f32 %v629_v13, %v629_v13 }
 0x154   :  { %2864 = vst [vmem:[#allocation15_spill] sm:$0xff] %v2684_v39  ;;  %1733 = vst [vmem:[%s2833_s5 + $0xd8] sm:$0xff] %v2030_v4  }
 0x155   :  { %1732 = vst [vmem:[%s2833_s5 + $0xd0] sm:$0xff] %v2026_v10   ;;  %v1980_v23 = vpop.f32.mrb[56].mxu0  ;;  %2027 = vmatprep.subr.bf16.mxu1 %v2026_v10 }
 0x156   :  { %v650_v52 = vadd.f32 %v1980_v23, %v2331_v37  ;;  %v641_v13 = vpop.f32.mrb[57].mxu0  ;;  %2029 = vmatpush3.bf16.msra.mxu1 %v2583_v31 }
 0x157   :  { %v642_v53 = vadd.f32 %v2331_v37, %v641_v13  ;;  %v1981_v21 = vpop.f32.mrb[58].mxu0  ;;  %2031 = vmatprep.subr.bf16.mxu1 %v2030_v4 }
 0x158   :  { %v653_v25 = vadd.f32 %v1981_v21, %v2331_v37  ;;  %v644_v28 = vpop.f32.mrb[59].mxu0  ;;  %v2706_v38 = vmul.f32 %v650_v52, %v650_v52 }
 0x159   :  { %v645_v47 = vadd.f32 %v2331_v37, %v644_v28  ;;  %v873_v23 = vmul.f32 %v642_v53, %v642_v53 }
 0x15a   :  { %v2038_v10 = vpack.c.bf16 %v653_v25, %v650_v52  ;;  %v2708_v39 = vmul.f32 %v653_v25, %v653_v25  ;;  %2033 = vmatpush3.bf16.msra.mxu1 %v2577_v55 }
 0x15b   :  { %v2034_v41 = vpack.c.bf16 %v645_v47, %v642_v53  ;;  %v874_v15 = vmul.f32 %v645_v47, %v645_v47 }
 0x15c   :  { %1735 = vst [vmem:[%s2833_s5 + $0xe8] sm:$0xff] %v2038_v10   ;;  %v2102_v31 = vpack.c.bf16 %v2708_v39, %v2706_v38 }
 0x15d   :  { %1734 = vst [vmem:[%s2833_s5 + $0xe0] sm:$0xff] %v2034_v41   ;;  %v1984_v4 = vpop.f32.mrb[60].mxu0  ;;  %2035 = vmatprep.subr.bf16.mxu1 %v2034_v41  ;;  %v2098_v52 = vpack.c.bf16 %v874_v15, %v873_v23 }
 0x15e   :  { %v666_v13 = vadd.f32 %v1984_v4, %v2331_v37  ;;  %v657_v55 = vpop.f32.mrb[61].mxu0  ;;  %2037 = vmatpush3.bf16.msra.mxu1 %v2611_v5  ;;  %v2868_v4 = vpack.c.bf16 %v2451_v58, %v2449_v56  ;;  %v2888_v56 = vld [vmem:[#allocation4_spill] sm:$0xff] }
 0x15f   :  { %v658_v47 = vadd.f32 %v2331_v37, %v657_v55  ;;  %v1985_v53 = vpop.f32.mrb[62].mxu0  ;;  %2039 = vmatprep.subr.bf16.mxu1 %v2038_v10 }
 0x160   :  { %v669_v21 = vadd.f32 %v1985_v53, %v2331_v37  ;;  %v660_v25 = vpop.f32.mrb[63].mxu0  ;;  %v879_v39 = vmul.f32 %v666_v13, %v666_v13 }
 0x161   :  { %v661_v38 = vadd.f32 %v2331_v37, %v660_v25  ;;  %v877_v15 = vmul.f32 %v658_v47, %v658_v47  ;;  %v2865_v37 = vpack.c.bf16 %v2455_v60, %v2453_v59  ;;  %v2870_v59 = vpack.c.bf16 %v2479_v51, %v2477_v27  ;;  %v2893_v51 = vld [vmem:[#allocation3_spill] sm:$0xff] }
 0x162   :  { %v2046_v28 = vpack.c.bf16 %v669_v21, %v666_v13  ;;  %v880_v20 = vmul.f32 %v669_v21, %v669_v21  ;;  %2041 = vmatpush3.bf16.msra.mxu1 %v2605_v43  ;;  %v2866_v43 = vmov 1.0   ;;  %v2871_v60 = vpack.c.bf16 %v2375_v3, %v2371_v1 }
 0x163   :  { %v2042_v41 = vpack.c.bf16 %v661_v38, %v658_v47  ;;  %v878_v23 = vmul.f32 %v661_v38, %v661_v38  ;;  %v2876_v1 = vpack.c.bf16 %v2498_v7, %v2496_v57  ;;  %v2877_v3 = vpack.c.bf16 %v2397_v16, %v2393_v14  ;;  %v2896_v57 = vld [vmem:[#allocation9_spill] sm:$0xff]  ;;  %v2897_v7 = vld [vmem:[#allocation8_spill] sm:$0xff] }
 0x164   :  { %1737 = vst [vmem:[%s2833_s5 + $0xf8] sm:$0xff] %v2046_v28   ;;  %v2110_v5 = vpack.c.bf16 %v880_v20, %v879_v39  ;;  %v2867_v20 = vpack.c.bf16 %v2345_v50, %v2343_v49  ;;  %v2872_v49 = vpack.c.bf16 %v2474_v26, %v2472_v24  ;;  %v2873_v50 = vpack.c.bf16 %v2369_v0, %v2365_v62  ;;  %v2890_v24 = vld [vmem:[#allocation15_spill] sm:$0xff]  ;;  %v2891_v26 = vld [vmem:[#allocation14_spill] sm:$0xff] }
 0x165   :  { %1736 = vst [vmem:[%s2833_s5 + $0xf0] sm:$0xff] %v2042_v41   ;;  %2043 = vmatprep.subr.bf16.mxu1 %v2042_v41  ;;  %v2106_v10 = vpack.c.bf16 %v878_v23, %v877_v15  ;;  %v2878_v62 = vpack.c.bf16 %v2527_v18, %v2525_v45  ;;  %v2879_v0 = vpack.c.bf16 %v2431_v35, %v2427_v33  ;;  %v2887_v35 = vld [vmem:[#allocation5_spill] sm:$0xff]  ;;  %v2903_v45 = vld [vmem:[#allocation12_spill] sm:$0xff] }
 0x166   :  { %2045 = vmatpush3.bf16.msra.mxu1 %v2639_v8  ;;  %v2869_v8 = vpack.c.bf16 %v2341_v48, %v2337_v46  ;;  %v2874_v46 = vpack.c.bf16 %v2503_v2, %v2501_v9  ;;  %v2875_v48 = vpack.c.bf16 %v2403_v19, %v2399_v17  ;;  %v2880_v17 = vpack.c.bf16 %v2522_v44, %v2520_v42  ;;  %v2899_v2 = vld [vmem:[#allocation7_spill] sm:$0xff]  ;;  %v2902_v44 = vld [vmem:[#allocation13_spill] sm:$0xff] }
 0x167   :  { %2047 = vmatprep.subr.bf16.mxu1 %v2046_v28  ;;  %v2881_v19 = vpack.c.bf16 %v2425_v32, %v2421_v30  ;;  %v2882_v14 = vpack.c.bf16 %v2665_v29, %v2663_v22  ;;  %v2883_v16 = vpack.c.bf16 %v2555_v12, %v2551_v61  ;;  %v2884_v33 = vpack.c.bf16 %v2661_v36, %v2659_v63  ;;  %v2894_v29 = vld [vmem:[#allocation2_spill] sm:$0xff] }
 0x168   :  { %v2885_v30 = vpack.c.bf16 %v2548_v54, %v2544_v40  ;;  %v2886_v32 = vpack.c.bf16 %v2689_v34, %v2687_v6  ;;  %v2889_v58 = vpack.c.bf16 %v2887_v35, %v2888_v56  ;;  %v2892_v27 = vpack.c.bf16 %v2890_v24, %v2891_v26  ;;  %v2900_v63 = vld [vmem:[#allocation6_spill] sm:$0xff]  ;;  %v2905_v40 = vld [vmem:[#allocation11_spill] sm:$0xff] }
 0x169   :  { %v2895_v36 = vpack.c.bf16 %v2893_v51, %v2894_v29  ;;  %v2898_v9 = vpack.c.bf16 %v2896_v57, %v2897_v7  ;;  %v2901_v42 = vpack.c.bf16 %v2899_v2, %v2900_v63  ;;  %v2904_v18 = vpack.c.bf16 %v2902_v44, %v2903_v45  ;;  %v2906_v54 = vld [vmem:[#allocation10_spill] sm:$0xff] }
 0x16a   :  { %2049 = vmatpush3.bf16.msra.mxu1 %v2633_v11  ;;  %v2907_v61 = vpack.c.bf16 %v2905_v40, %v2906_v54  ;;  %v812_v6 = vlaneseq }
 0x16b   :  { %2051 = vmatprep.subr.bf16.mxu1 %v2865_v37 }
 0x16c   :  { %vm814_vm1 = vcmp.lt.s32.totalorder %v812_v6, 128 }
 0x16d   :  { %807 = vmatmul.mubr.f32.vlgmr.msra.gmra.mrb[2].mxu1 %v2866_v43 }
 0x16e   :  { %2053 = vmatpush3.bf16.msra.mxu1 %v2867_v20  ;;  %945 = vmatprep.mubr.f32.mxu1 %v2866_v43 }
 0x16f   :  { %2055 = vmatprep.subr.bf16.mxu1 %v2868_v4 }
 0x172   :  { %2057 = vmatpush3.bf16.msra.mxu1 %v2869_v8 }
 0x173   :  { %2059 = vmatprep.subr.bf16.mxu1 %v2870_v59 }
 0x176   :  { %2061 = vmatpush3.bf16.msra.mxu1 %v2871_v60 }
 0x177   :  { %2063 = vmatprep.subr.bf16.mxu1 %v2872_v49 }
 0x17a   :  { %2065 = vmatpush3.bf16.msra.mxu1 %v2873_v50 }
 0x17b   :  { %2067 = vmatprep.subr.bf16.mxu1 %v2874_v46 }
 0x17e   :  { %2069 = vmatpush3.bf16.msra.mxu1 %v2875_v48 }
 0x17f   :  { %2071 = vmatprep.subr.bf16.mxu1 %v2876_v1 }
 0x182   :  { %2073 = vmatpush3.bf16.msra.mxu1 %v2877_v3 }
 0x183   :  { %2075 = vmatprep.subr.bf16.mxu1 %v2878_v62 }
 0x186   :  { %2077 = vmatpush3.bf16.msra.mxu1 %v2879_v0 }
 0x187   :  { %2079 = vmatprep.subr.bf16.mxu1 %v2880_v17 }
 0x18a   :  { %2081 = vmatpush3.bf16.msra.mxu1 %v2881_v19 }
 0x18b   :  { %2083 = vmatprep.subr.bf16.mxu1 %v2882_v14 }
 0x18d   :  { %946 = vmatmul.mubr.f32.vlgmr.msra.gmra.mrb[4].mxu1 %v2866_v43 }
 0x18e   :  { %2085 = vmatpush3.bf16.msra.mxu1 %v2883_v16  ;;  %1015 = vmatprep.mubr.f32.mxu1 %v2866_v43 }
 0x18f   :  { %2087 = vmatprep.subr.bf16.mxu1 %v2884_v33 }
 0x192   :  { %2089 = vmatpush3.bf16.msra.mxu1 %v2885_v30 }
 0x193   :  { %2091 = vmatprep.subr.bf16.mxu1 %v2886_v32 }
 0x196   :  { %2093 = vmatpush3.bf16.msra.mxu1 %v2889_v58 }
 0x197   :  { %2095 = vmatprep.subr.bf16.mxu1 %v2892_v27 }
 0x19a   :  { %2097 = vmatpush3.bf16.msra.mxu1 %v2895_v36 }
 0x19b   :  { %2099 = vmatprep.subr.bf16.mxu1 %v2098_v52 }
 0x19e   :  { %2101 = vmatpush3.bf16.msra.mxu1 %v2898_v9 }
 0x19f   :  { %2103 = vmatprep.subr.bf16.mxu1 %v2102_v31 }
 0x1a2   :  { %2105 = vmatpush3.bf16.msra.mxu1 %v2901_v42 }
 0x1a3   :  { %2107 = vmatprep.subr.bf16.mxu1 %v2106_v10 }
 0x1a6   :  { %2109 = vmatpush3.bf16.msra.mxu1 %v2904_v18 }
 0x1a7   :  { %2111 = vmatprep.subr.bf16.mxu1 %v2110_v5 }
 0x1aa   :  { %2113 = vmatpush3.bf16.msra.mxu1 %v2907_v61 }
 0x1ad   :  { %1016 = vmatmul.mubr.f32.vlgmr.msra.gmra.mrb[6].mxu1 %v2866_v43 }
 0x200   :  { %v1806_v12 = vpop.f32.mrb[0].mxu1 }
 0x201   :  { %v1807_v11 = vpop.f32.mrb[1].mxu1 }
 0x202   :  { %v1808_v22 = vadd.f32 %v1807_v11, %v1806_v12 }
 0x240   :  { %v1841_v34 = vpop.f32.mrb[2].mxu1 }
 0x241   :  { %v1842_v31 = vpop.f32.mrb[3].mxu1 }
 0x242   :  { %v1843_v52 = vadd.f32 %v1842_v31, %v1841_v34 }
 0x244   :  { %v809_v13 = vadd.f32 %v1843_v52, %v1808_v22 }
 0x246   :  { %816 = vst.msk [vmem:[%s2834_s6] sm:$0x1] %vm814_vm1, %v809_v13 }
 0x260   :  { %v1876_v55 = vpop.f32.mrb[4].mxu1 }
 0x261   :  { %v1877_v47 = vpop.f32.mrb[5].mxu1 }
 0x262   :  { %v1878_v53 = vadd.f32 %v1877_v47, %v1876_v55 }
 0x280   :  { %v1911_v21 = vpop.f32.mrb[6].mxu1 }
 0x281   :  { %v1912_v25 = vpop.f32.mrb[7].mxu1 }
 0x282   :  { %v1913_v38 = vadd.f32 %v1912_v25, %v1911_v21 }
 0x284   :  { %v1018_v39 = vadd.f32 %v1913_v38, %v1878_v53 }
 0x286   :  { %1021 = vst.msk [vmem:[%s2834_s6 + $0x1] sm:$0x1] %vm814_vm1, %v1018_v39 }

// kernel: bottleneck_apply.6
= control target key start
LH: loop header
LB: loop body
LE: loop exit
PB: predicated region body
PF: predicated region fallthrough
CT: control target
= control target key end

     0   :  { %vm1357_vm0 = vcmask 519168   ;;  %vm889_vm1 = vcmask 516096   ;;  %s2127_s13 = smov 64   ;;  %vm1099_vm2 = vcmask 1040896   ;;  %s3299_s1 = inlined_call_operand.vmem [shape: bf16[128,64], index: 1, kind: input, shape index: {}]   ;;  %s3300_s0 = inlined_call_operand.vmem [shape: bf16[512,128], index: 0, kind: input, shape index: {}]   ;;  %s3301_s3 = inlined_call_operand.vmem [shape: f32[1,128], index: 3, kind: input, shape index: {}]   ;;  %s3302_s4 = inlined_call_operand.vmem [shape: f32[1,128], index: 4, kind: input, shape index: {}]   ;;  %s3303_s2 = inlined_call_operand.vmem [shape: f32[1,64], index: 2, kind: input, shape index: {}]   ;;  %s3304_s5 = inlined_call_operand.vmem [shape: bf16[512,64], index: 5, kind: output, shape index: {0}]   ;;  %s3305_s6 = inlined_call_operand.vmem [shape: f32[1,1,128], index: 6, kind: output, shape index: {1}]  }
   0x1   :  { %v2118_v0 = vld [vmem:[%s3299_s1] sm:$0xff]   ;;  %v2119_v1 = vld [vmem:[%s3299_s1 + $0x8] sm:$0xff]   ;;  %v2120_v2 = vld [vmem:[%s3299_s1 + $0x10] sm:$0xff]  }
   0x2   :  { %1908 = vmatprep.subr.bf16.mxu0 %v2118_v0  ;;  %v2121_v3 = vld [vmem:[%s3299_s1 + $0x18] sm:$0xff]   ;;  %v1570_v4 = vld [vmem:[%s3300_s0] sm:$0xff]   ;;  %v1697_v11 = vld [vmem:[%s3300_s0 + $0x8] sm:$0xff]  }
   0x3   :  { %1909 = vmatpush3.bf16.msra.mxu0 %v2118_v0  ;;  %v2181_v5 = vld [vmem:[%s3301_s3] ss:$0 sm:$0xff]  ;;  %v1571_v6 = vunpack.c.l.bf16 %v1570_v4  ;;  %v1572_v7 = vunpack.c.h.bf16 %v1570_v4  ;;  %v1698_v13 = vld [vmem:[%s3300_s0 + $0x10] sm:$0xff]   ;;  %v1575_v16 = vunpack.c.l.bf16 %v1697_v11  ;;  %v1576_v17 = vunpack.c.h.bf16 %v1697_v11  ;;  %v2123_v22 = vld [vmem:[%s3299_s1 + $0x28] sm:$0xff]  }
   0x4   :  { %1910 = vmatprep.subr.bf16.mxu0 %v2119_v1  ;;  %v2186_v8 = vld [vmem:[%s3302_s4] ss:$0 sm:$0xff]  ;;  %v1579_v20 = vunpack.c.l.bf16 %v1698_v13  ;;  %v1580_v21 = vunpack.c.h.bf16 %v1698_v13  ;;  %v1699_v28 = vld [vmem:[%s3300_s0 + $0x18] sm:$0xff]   ;;  %v2124_v29 = vld [vmem:[%s3299_s1 + $0x30] sm:$0xff]  }
   0x5   :  { %v158_v9 = vmul.f32 %v1571_v6, %v2181_v5  ;;  %v159_v10 = vmul.f32 %v1572_v7, %v2181_v5  ;;  %v2122_v12 = vld [vmem:[%s3299_s1 + $0x20] sm:$0xff]   ;;  %v160_v24 = vmul.f32 %v1575_v16, %v2181_v5  ;;  %v161_v25 = vmul.f32 %v1576_v17, %v2181_v5  ;;  %v2125_v39 = vld [vmem:[%s3299_s1 + $0x38] sm:$0xff]   ;;  %v1701_v44 = vld [vmem:[%s3300_s0 + $0x28] sm:$0xff]  }
   0x6   :  { %v162_v26 = vmul.f32 %v1579_v20, %v2181_v5  ;;  %v163_v27 = vmul.f32 %v1580_v21, %v2181_v5  ;;  %v1700_v30 = vld [vmem:[%s3300_s0 + $0x20] sm:$0xff]   ;;  %v1583_v33 = vunpack.c.l.bf16 %v1699_v28  ;;  %v1584_v34 = vunpack.c.h.bf16 %v1699_v28  ;;  %v1702_v49 = vld [vmem:[%s3300_s0 + $0x30] sm:$0xff]  }
   0x7   :  { %1911 = vmatpush3.bf16.msra.mxu0 %v2119_v1  ;;  %v229_v14 = vadd.f32 %v2186_v8, %v158_v9  ;;  %v230_v15 = vadd.f32 %v2186_v8, %v159_v10  ;;  %v231_v31 = vadd.f32 %v2186_v8, %v160_v24  ;;  %v232_v32 = vadd.f32 %v2186_v8, %v161_v25  ;;  %v1703_v1 = vld [vmem:[%s3300_s0 + $0x38] sm:$0xff]   ;;  %v1704_v6 = vld [vmem:[%s3300_s0 + $0x40] sm:$0xff]  }
   0x8   :  { %1912 = vmatprep.subr.bf16.mxu0 %v2120_v2  ;;  %v233_v35 = vadd.f32 %v2186_v8, %v162_v26  ;;  %v234_v36 = vadd.f32 %v2186_v8, %v163_v27  ;;  %v1587_v37 = vunpack.c.l.bf16 %v1700_v30  ;;  %v1588_v38 = vunpack.c.h.bf16 %v1700_v30  ;;  %v1705_v26 = vld [vmem:[%s3300_s0 + $0x48] sm:$0xff]   ;;  %v1706_v27 = vld [vmem:[%s3300_s0 + $0x50] sm:$0xff]  }
   0x9   :  { %v293_v18 = vmax.f32 %v229_v14, 0.0  ;;  %v294_v19 = vmax.f32 %v230_v15, 0.0  ;;  %v295_v40 = vmax.f32 %v231_v31, 0.0  ;;  %v296_v41 = vmax.f32 %v232_v32, 0.0 }
   0xa   :  { %v164_v42 = vmul.f32 %v1583_v33, %v2181_v5  ;;  %v165_v43 = vmul.f32 %v1584_v34, %v2181_v5  ;;  %v297_v45 = vmax.f32 %v233_v35, 0.0  ;;  %v298_v46 = vmax.f32 %v234_v36, 0.0 }
   0xb   :  { %1913 = vmatpush3.bf16.msra.mxu0 %v2120_v2  ;;  %v357_v23 = vpack.c.bf16 %v294_v19, %v293_v18  ;;  %v166_v47 = vmul.f32 %v1587_v37, %v2181_v5  ;;  %v167_v48 = vmul.f32 %v1588_v38, %v2181_v5  ;;  %v1591_v50 = vunpack.c.l.bf16 %v1701_v44 }
   0xc   :  { %1914 = vmatprep.subr.bf16.mxu0 %v2121_v3  ;;  %v1592_v51 = vunpack.c.h.bf16 %v1701_v44  ;;  %v358_v52 = vpack.c.bf16 %v296_v41, %v295_v40  ;;  %v235_v53 = vadd.f32 %v2186_v8, %v164_v42  ;;  %v236_v54 = vadd.f32 %v2186_v8, %v165_v43  ;;  %v1707_v44 = vld [vmem:[%s3300_s0 + $0x58] sm:$0xff]  }
   0xd   :  { %1924 = vmatprep.mubr.bf16.mxu0 %v357_v23  ;;  %v1595_v55 = vunpack.c.l.bf16 %v1702_v49  ;;  %v359_v56 = vpack.c.bf16 %v298_v46, %v297_v45  ;;  %v237_v57 = vadd.f32 %v2186_v8, %v166_v47  ;;  %v238_v58 = vadd.f32 %v2186_v8, %v167_v48  ;;  %v1708_v47 = vld [vmem:[%s3300_s0 + $0x60] sm:$0xff]  }
   0xe   :  { %v1596_v59 = vunpack.c.h.bf16 %v1702_v49  ;;  %v168_v60 = vmul.f32 %v1591_v50, %v2181_v5  ;;  %v169_v61 = vmul.f32 %v1592_v51, %v2181_v5  ;;  %v299_v62 = vmax.f32 %v235_v53, 0.0 }
   0xf   :  { %1915 = vmatpush3.bf16.msra.mxu0 %v2121_v3  ;;  %v300_v63 = vmax.f32 %v236_v54, 0.0  ;;  %v170_v0 = vmul.f32 %v1595_v55, %v2181_v5  ;;  %v301_v2 = vmax.f32 %v237_v57, 0.0  ;;  %v302_v3 = vmax.f32 %v238_v58, 0.0 }
  0x10   :  { %1916 = vmatprep.subr.bf16.mxu0 %v2122_v12  ;;  %v171_v4 = vmul.f32 %v1596_v59, %v2181_v5  ;;  %v239_v7 = vadd.f32 %v2186_v8, %v168_v60  ;;  %v240_v9 = vadd.f32 %v2186_v8, %v169_v61  ;;  %v1599_v10 = vunpack.c.l.bf16 %v1703_v1 }
  0x11   :  { %v1600_v11 = vunpack.c.h.bf16 %v1703_v1  ;;  %v241_v13 = vadd.f32 %v2186_v8, %v170_v0  ;;  %v361_v14 = vpack.c.bf16 %v302_v3, %v301_v2  ;;  %v1603_v16 = vunpack.c.l.bf16 %v1704_v6  ;;  %v1709_v2 = vld [vmem:[%s3300_s0 + $0x68] sm:$0xff]   ;;  %v1710_v3 = vld [vmem:[%s3300_s0 + $0x70] sm:$0xff]  }
  0x12   :  { %v242_v15 = vadd.f32 %v2186_v8, %v171_v4  ;;  %v1604_v17 = vunpack.c.h.bf16 %v1704_v6  ;;  %v303_v18 = vmax.f32 %v239_v7, 0.0  ;;  %v304_v19 = vmax.f32 %v240_v9, 0.0 }
  0x13   :  { %1917 = vmatpush3.bf16.msra.mxu0 %v2122_v12  ;;  %v360_v12 = vpack.c.bf16 %v300_v63, %v299_v62  ;;  %v172_v20 = vmul.f32 %v1599_v10, %v2181_v5  ;;  %v173_v21 = vmul.f32 %v1600_v11, %v2181_v5  ;;  %v174_v24 = vmul.f32 %v1603_v16, %v2181_v5 }
  0x14   :  { %1918 = vmatprep.subr.bf16.mxu0 %v2123_v22  ;;  %v306_v23 = vmax.f32 %v242_v15, 0.0  ;;  %v175_v25 = vmul.f32 %v1604_v17, %v2181_v5  ;;  %v362_v28 = vpack.c.bf16 %v304_v19, %v303_v18  ;;  %v1607_v31 = vunpack.c.l.bf16 %v1705_v26 }
  0x15   :  { %v244_v30 = vadd.f32 %v2186_v8, %v173_v21  ;;  %v1608_v32 = vunpack.c.h.bf16 %v1705_v26  ;;  %v1611_v33 = vunpack.c.l.bf16 %v1706_v27  ;;  %v1612_v34 = vunpack.c.h.bf16 %v1706_v27 }
  0x16   :  { %v245_v36 = vadd.f32 %v2186_v8, %v174_v24  ;;  %v246_v37 = vadd.f32 %v2186_v8, %v175_v25  ;;  %v176_v40 = vmul.f32 %v1607_v31, %v2181_v5  ;;  %v1615_v49 = vunpack.c.l.bf16 %v1707_v44  ;;  %v1712_v25 = vld [vmem:[%s3300_s0 + $0x80] sm:$0xff]  }
  0x17   :  { %1919 = vmatpush3.bf16.msra.mxu0 %v2123_v22  ;;  %v305_v22 = vmax.f32 %v241_v13, 0.0  ;;  %v177_v41 = vmul.f32 %v1608_v32, %v2181_v5  ;;  %v178_v42 = vmul.f32 %v1611_v33, %v2181_v5  ;;  %v179_v43 = vmul.f32 %v1612_v34, %v2181_v5 }
  0x18   :  { %1920 = vmatprep.subr.bf16.mxu0 %v2124_v29  ;;  %v309_v45 = vmax.f32 %v245_v36, 0.0  ;;  %v310_v46 = vmax.f32 %v246_v37, 0.0  ;;  %v1616_v50 = vunpack.c.h.bf16 %v1707_v44  ;;  %v247_v51 = vadd.f32 %v2186_v8, %v176_v40  ;;  %v1713_v44 = vld [vmem:[%s3300_s0 + $0x88] sm:$0xff]  }
  0x19   :  { %v363_v35 = vpack.c.bf16 %v306_v23, %v305_v22  ;;  %v249_v53 = vadd.f32 %v2186_v8, %v178_v42  ;;  %v250_v54 = vadd.f32 %v2186_v8, %v179_v43  ;;  %v1620_v57 = vunpack.c.h.bf16 %v1708_v47 }
  0x1a   :  { %v365_v55 = vpack.c.bf16 %v310_v46, %v309_v45  ;;  %v180_v58 = vmul.f32 %v1615_v49, %v2181_v5  ;;  %v181_v59 = vmul.f32 %v1616_v50, %v2181_v5  ;;  %v311_v60 = vmax.f32 %v247_v51, 0.0  ;;  %v1714_v45 = vld [vmem:[%s3300_s0 + $0x90] sm:$0xff]  }
  0x1b   :  { %1921 = vmatpush3.bf16.msra.mxu0 %v2124_v29  ;;  %v243_v29 = vadd.f32 %v2186_v8, %v172_v20  ;;  %v313_v62 = vmax.f32 %v249_v53, 0.0  ;;  %v314_v63 = vmax.f32 %v250_v54, 0.0  ;;  %v183_v1 = vmul.f32 %v1620_v57, %v2181_v5  ;;  %v1711_v20 = vld [vmem:[%s3300_s0 + $0x78] sm:$0xff]  }
  0x1c   :  { %1922 = vmatprep.subr.bf16.mxu0 %v2125_v39  ;;  %v251_v4 = vadd.f32 %v2186_v8, %v180_v58  ;;  %v252_v6 = vadd.f32 %v2186_v8, %v181_v59  ;;  %v1623_v10 = vunpack.c.l.bf16 %v1709_v2  ;;  %v1624_v11 = vunpack.c.h.bf16 %v1709_v2 }
  0x1d   :  { %v307_v38 = vmax.f32 %v243_v29, 0.0  ;;  %v367_v9 = vpack.c.bf16 %v314_v63, %v313_v62  ;;  %v254_v13 = vadd.f32 %v2186_v8, %v183_v1  ;;  %v1628_v15 = vunpack.c.h.bf16 %v1710_v3  ;;  %v1716_v1 = vld [vmem:[%s3300_s0 + $0xa0] sm:$0xff]  }
  0x1e   :  { %v315_v16 = vmax.f32 %v251_v4, 0.0  ;;  %v316_v17 = vmax.f32 %v252_v6, 0.0  ;;  %v184_v18 = vmul.f32 %v1623_v10, %v2181_v5  ;;  %v185_v19 = vmul.f32 %v1624_v11, %v2181_v5 }
  0x1f   :  { %1923 = vmatpush3.bf16.msra.mxu0 %v2125_v39  ;;  %v308_v39 = vmax.f32 %v244_v30, 0.0  ;;  %v318_v22 = vmax.f32 %v254_v13, 0.0  ;;  %v187_v24 = vmul.f32 %v1628_v15, %v2181_v5  ;;  %v1631_v26 = vunpack.c.l.bf16 %v1711_v20 }
  0x20   :  { %v1632_v27 = vunpack.c.h.bf16 %v1711_v20  ;;  %v255_v29 = vadd.f32 %v2186_v8, %v184_v18  ;;  %v256_v30 = vadd.f32 %v2186_v8, %v185_v19  ;;  %v1635_v31 = vunpack.c.l.bf16 %v1712_v25  ;;  %v1717_v18 = vld [vmem:[%s3300_s0 + $0xa8] sm:$0xff]  }
  0x21   :  { %v364_v48 = vpack.c.bf16 %v308_v39, %v307_v38  ;;  %v258_v34 = vadd.f32 %v2186_v8, %v187_v24  ;;  %v188_v36 = vmul.f32 %v1631_v26, %v2181_v5  ;;  %v1639_v49 = vunpack.c.l.bf16 %v1713_v44 }
  0x22   :  { %1925 = vmatmul.mubr.bf16.vlgmr.msra.gmra.mrb[0].mxu0 %v358_v52  ;;  %v248_v52 = vadd.f32 %v2186_v8, %v177_v41  ;;  %v189_v37 = vmul.f32 %v1632_v27, %v2181_v5  ;;  %v319_v38 = vmax.f32 %v255_v29, 0.0  ;;  %v320_v39 = vmax.f32 %v256_v30, 0.0 }
  0x23   :  { %1928 = vmatprep.mubr.bf16.mxu0 %v359_v56  ;;  %v1619_v56 = vunpack.c.l.bf16 %v1708_v47  ;;  %v322_v41 = vmax.f32 %v258_v34, 0.0  ;;  %v190_v42 = vmul.f32 %v1635_v31, %v2181_v5  ;;  %v259_v46 = vadd.f32 %v2186_v8, %v188_v36 }
  0x24   :  { %v312_v61 = vmax.f32 %v248_v52, 0.0  ;;  %v260_v47 = vadd.f32 %v2186_v8, %v189_v37  ;;  %v1640_v50 = vunpack.c.h.bf16 %v1713_v44  ;;  %v1643_v51 = vunpack.c.l.bf16 %v1714_v45 }
  0x25   :  { %v182_v0 = vmul.f32 %v1619_v56, %v2181_v5  ;;  %v261_v53 = vadd.f32 %v2186_v8, %v190_v42  ;;  %v323_v56 = vmax.f32 %v259_v46, 0.0  ;;  %v192_v58 = vmul.f32 %v1639_v49, %v2181_v5 }
  0x26   :  { %v366_v7 = vpack.c.bf16 %v312_v61, %v311_v60  ;;  %v324_v57 = vmax.f32 %v260_v47, 0.0  ;;  %v193_v59 = vmul.f32 %v1640_v50, %v2181_v5  ;;  %v194_v60 = vmul.f32 %v1643_v51, %v2181_v5  ;;  %v1715_v61 = vld [vmem:[%s3300_s0 + $0x98] sm:$0xff]  }
  0x27   :  { %v325_v62 = vmax.f32 %v261_v53, 0.0  ;;  %v263_v4 = vadd.f32 %v2186_v8, %v192_v58  ;;  %v1652_v13 = vunpack.c.h.bf16 %v1716_v1  ;;  %v1721_v58 = vld [vmem:[%s3300_s0 + $0xc8] sm:$0xff]  }
  0x28   :  { %v372_v2 = vpack.c.bf16 %v324_v57, %v323_v56  ;;  %v264_v6 = vadd.f32 %v2186_v8, %v193_v59 }
  0x29   :  { %v327_v15 = vmax.f32 %v263_v4, 0.0  ;;  %v1672_v4 = vunpack.c.h.bf16 %v1721_v58 }
  0x2a   :  { %1929 = vmatmul.mubr.bf16.gmra.mrb[4].mxu0 %v360_v12  ;;  %v253_v12 = vadd.f32 %v2186_v8, %v182_v0 }
  0x2b   :  { %1932 = vmatprep.mubr.bf16.mxu0 %v361_v14  ;;  %v1627_v14 = vunpack.c.l.bf16 %v1710_v3  ;;  %v1647_v3 = vunpack.c.l.bf16 %v1715_v61 }
  0x2c   :  { %v317_v21 = vmax.f32 %v253_v12, 0.0  ;;  %v1651_v12 = vunpack.c.l.bf16 %v1716_v1 }
  0x2d   :  { %v186_v23 = vmul.f32 %v1627_v14, %v2181_v5  ;;  %v196_v14 = vmul.f32 %v1647_v3, %v2181_v5 }
  0x2e   :  { %v369_v32 = vpack.c.bf16 %v318_v22, %v317_v21  ;;  %v198_v21 = vmul.f32 %v1651_v12, %v2181_v5  ;;  %v199_v22 = vmul.f32 %v1652_v13, %v2181_v5 }
  0x2f   :  { %v257_v33 = vadd.f32 %v2186_v8, %v186_v23  ;;  %v1718_v23 = vld [vmem:[%s3300_s0 + $0xb0] sm:$0xff]   ;;  %v267_v24 = vadd.f32 %v2186_v8, %v196_v14 }
  0x30   :  { %v1659_v29 = vunpack.c.l.bf16 %v1718_v23  ;;  %v269_v31 = vadd.f32 %v2186_v8, %v198_v21  ;;  %v1724_v21 = vld [vmem:[%s3300_s0 + $0xe0] sm:$0xff]  }
  0x31   :  { %v321_v40 = vmax.f32 %v257_v33, 0.0  ;;  %v1660_v33 = vunpack.c.h.bf16 %v1718_v23  ;;  %v331_v34 = vmax.f32 %v267_v24, 0.0 }
  0x32   :  { %1933 = vmatmul.mubr.bf16.gmra.mrb[8].mxu0 %v362_v28  ;;  %v368_v28 = vpack.c.bf16 %v316_v17, %v315_v16  ;;  %v328_v16 = vmax.f32 %v264_v6, 0.0 }
  0x33   :  { %1936 = vmatprep.mubr.bf16.mxu0 %v363_v35  ;;  %v1636_v35 = vunpack.c.h.bf16 %v1712_v25  ;;  %v371_v52 = vpack.c.bf16 %v322_v41, %v321_v40  ;;  %v1655_v25 = vunpack.c.l.bf16 %v1717_v18  ;;  %v333_v40 = vmax.f32 %v269_v31, 0.0 }
  0x34   :  { %v374_v26 = vpack.c.bf16 %v328_v16, %v327_v15  ;;  %v203_v42 = vmul.f32 %v1660_v33, %v2181_v5  ;;  %v209_v15 = vmul.f32 %v1672_v4, %v2181_v5  ;;  %v1684_v31 = vunpack.c.h.bf16 %v1724_v21 }
  0x35   :  { %v191_v43 = vmul.f32 %v1636_v35, %v2181_v5  ;;  %v200_v36 = vmul.f32 %v1655_v25, %v2181_v5 }
  0x36   :  { %v274_v51 = vadd.f32 %v2186_v8, %v203_v42  ;;  %v280_v25 = vadd.f32 %v2186_v8, %v209_v15 }
  0x37   :  { %v262_v54 = vadd.f32 %v2186_v8, %v191_v43  ;;  %v1720_v43 = vld [vmem:[%s3300_s0 + $0xc0] sm:$0xff]   ;;  %v271_v47 = vadd.f32 %v2186_v8, %v200_v36 }
  0x38   :  { %v1668_v53 = vunpack.c.h.bf16 %v1720_v43 }
  0x39   :  { %v326_v63 = vmax.f32 %v262_v54, 0.0  ;;  %v335_v56 = vmax.f32 %v271_v47, 0.0 }
  0x3a   :  { %1937 = vmatmul.mubr.bf16.gmra.mrb[12].mxu0 %v364_v48  ;;  %v370_v48 = vpack.c.bf16 %v320_v39, %v319_v38  ;;  %v202_v38 = vmul.f32 %v1659_v29, %v2181_v5  ;;  %v1719_v39 = vld [vmem:[%s3300_s0 + $0xb8] sm:$0xff]  }
  0x3b   :  { %1940 = vmatprep.mubr.bf16.mxu0 %v365_v55  ;;  %v1644_v55 = vunpack.c.h.bf16 %v1714_v45  ;;  %v373_v10 = vpack.c.bf16 %v326_v63, %v325_v62  ;;  %v1663_v44 = vunpack.c.l.bf16 %v1719_v39  ;;  %v1664_v45 = vunpack.c.h.bf16 %v1719_v39  ;;  %v1722_v63 = vld [vmem:[%s3300_s0 + $0xd0] sm:$0xff]  }
  0x3c   :  { %v273_v49 = vadd.f32 %v2186_v8, %v202_v38  ;;  %v207_v62 = vmul.f32 %v1668_v53, %v2181_v5  ;;  %v1675_v6 = vunpack.c.l.bf16 %v1722_v63  ;;  %v1725_v38 = vld [vmem:[%s3300_s0 + $0xe8] sm:$0xff]  }
  0x3d   :  { %v195_v0 = vmul.f32 %v1644_v55, %v2181_v5  ;;  %v204_v54 = vmul.f32 %v1663_v44, %v2181_v5  ;;  %v205_v55 = vmul.f32 %v1664_v45, %v2181_v5  ;;  %v1688_v47 = vunpack.c.h.bf16 %v1725_v38 }
  0x3e   :  { %v337_v59 = vmax.f32 %v273_v49, 0.0  ;;  %v210_v16 = vmul.f32 %v1675_v6, %v2181_v5 }
  0x3f   :  { %v266_v11 = vadd.f32 %v2186_v8, %v195_v0  ;;  %v275_v0 = vadd.f32 %v2186_v8, %v204_v54  ;;  %v276_v1 = vadd.f32 %v2186_v8, %v205_v55  ;;  %v217_v55 = vmul.f32 %v1688_v47, %v2181_v5 }
  0x41   :  { %v330_v20 = vmax.f32 %v266_v11, 0.0  ;;  %v278_v11 = vadd.f32 %v2186_v8, %v207_v62  ;;  %v339_v12 = vmax.f32 %v275_v0, 0.0  ;;  %v340_v13 = vmax.f32 %v276_v1, 0.0 }
  0x42   :  { %1941 = vmatmul.mubr.bf16.gmra.mrb[16].mxu0 %v366_v7  ;;  %v265_v7 = vadd.f32 %v2186_v8, %v194_v60  ;;  %v338_v60 = vmax.f32 %v274_v51, 0.0 }
  0x43   :  { %1944 = vmatprep.mubr.bf16.mxu0 %v367_v9  ;;  %v1648_v9 = vunpack.c.h.bf16 %v1715_v61 }
  0x44   :  { %v329_v19 = vmax.f32 %v265_v7, 0.0  ;;  %v1676_v7 = vunpack.c.h.bf16 %v1722_v63  ;;  %v288_v63 = vadd.f32 %v2186_v8, %v217_v55 }
  0x45   :  { %v197_v17 = vmul.f32 %v1648_v9, %v2181_v5  ;;  %v379_v9 = vpack.c.bf16 %v338_v60, %v337_v59  ;;  %v1727_v60 = vld [vmem:[%s3300_s0 + $0xf8] sm:$0xff]  }
  0x46   :  { %v375_v30 = vpack.c.bf16 %v330_v20, %v329_v19  ;;  %v342_v20 = vmax.f32 %v278_v11, 0.0  ;;  %v1695_v0 = vunpack.c.l.bf16 %v1727_v60  ;;  %v1696_v1 = vunpack.c.h.bf16 %v1727_v60 }
  0x47   :  { %v268_v27 = vadd.f32 %v2186_v8, %v197_v17  ;;  %v211_v17 = vmul.f32 %v1676_v7, %v2181_v5  ;;  %v352_v7 = vmax.f32 %v288_v63, 0.0 }
  0x49   :  { %v332_v35 = vmax.f32 %v268_v27, 0.0  ;;  %v282_v27 = vadd.f32 %v2186_v8, %v211_v17 }
  0x4a   :  { %1945 = vmatmul.mubr.bf16.gmra.mrb[20].mxu0 %v368_v28  ;;  %v1656_v28 = vunpack.c.h.bf16 %v1717_v18  ;;  %v1723_v18 = vld [vmem:[%s3300_s0 + $0xd8] sm:$0xff]  }
  0x4b   :  { %1948 = vmatprep.mubr.bf16.mxu0 %v369_v32  ;;  %v270_v32 = vadd.f32 %v2186_v8, %v199_v22  ;;  %v376_v46 = vpack.c.bf16 %v332_v35, %v331_v34  ;;  %v380_v22 = vpack.c.bf16 %v340_v13, %v339_v12  ;;  %v1679_v24 = vunpack.c.l.bf16 %v1723_v18 }
  0x4c   :  { %v201_v37 = vmul.f32 %v1656_v28, %v2181_v5  ;;  %v1680_v28 = vunpack.c.h.bf16 %v1723_v18  ;;  %v344_v34 = vmax.f32 %v280_v25, 0.0  ;;  %v346_v36 = vmax.f32 %v282_v27, 0.0 }
  0x4d   :  { %v334_v41 = vmax.f32 %v270_v32, 0.0  ;;  %v212_v33 = vmul.f32 %v1679_v24, %v2181_v5 }
  0x4f   :  { %v377_v50 = vpack.c.bf16 %v334_v41, %v333_v40  ;;  %v215_v40 = vmul.f32 %v1684_v31, %v2181_v5  ;;  %v1726_v41 = vld [vmem:[%s3300_s0 + $0xf0] sm:$0xff]   ;;  %v283_v42 = vadd.f32 %v2186_v8, %v212_v33 }
  0x50   :  { %v1692_v51 = vunpack.c.h.bf16 %v1726_v41 }
  0x51   :  { %v286_v49 = vadd.f32 %v2186_v8, %v215_v40  ;;  %v347_v53 = vmax.f32 %v283_v42, 0.0 }
  0x52   :  { %1949 = vmatmul.mubr.bf16.gmra.mrb[24].mxu0 %v370_v48  ;;  %v272_v48 = vadd.f32 %v2186_v8, %v201_v37  ;;  %v213_v37 = vmul.f32 %v1680_v28, %v2181_v5  ;;  %v219_v59 = vmul.f32 %v1692_v51, %v2181_v5 }
  0x53   :  { %1952 = vmatprep.mubr.bf16.mxu0 %v371_v52  ;;  %v1667_v52 = vunpack.c.l.bf16 %v1720_v43  ;;  %v1687_v43 = vunpack.c.l.bf16 %v1725_v38 }
  0x54   :  { %v336_v57 = vmax.f32 %v272_v48, 0.0  ;;  %v290_v4 = vadd.f32 %v2186_v8, %v219_v59 }
  0x55   :  { %v206_v61 = vmul.f32 %v1667_v52, %v2181_v5  ;;  %v216_v52 = vmul.f32 %v1687_v43, %v2181_v5 }
  0x56   :  { %v378_v3 = vpack.c.bf16 %v336_v57, %v335_v56  ;;  %v350_v57 = vmax.f32 %v286_v49, 0.0  ;;  %v354_v12 = vmax.f32 %v290_v4, 0.0 }
  0x5a   :  { %1953 = vmatmul.mubr.bf16.gmra.mrb[28].mxu0 %v372_v2  ;;  %v1671_v2 = vunpack.c.l.bf16 %v1721_v58 }
  0x5b   :  { %1956 = vmatprep.mubr.bf16.mxu0 %v373_v10  ;;  %v277_v10 = vadd.f32 %v2186_v8, %v206_v61  ;;  %v287_v61 = vadd.f32 %v2186_v8, %v216_v52 }
  0x5c   :  { %v208_v14 = vmul.f32 %v1671_v2, %v2181_v5 }
  0x5d   :  { %v341_v19 = vmax.f32 %v277_v10, 0.0  ;;  %v351_v6 = vmax.f32 %v287_v61, 0.0  ;;  %v221_v10 = vmul.f32 %v1696_v1, %v2181_v5 }
  0x5e   :  { %v279_v23 = vadd.f32 %v2186_v8, %v208_v14 }
  0x5f   :  { %v381_v29 = vpack.c.bf16 %v342_v20, %v341_v19  ;;  %v386_v13 = vpack.c.bf16 %v352_v7, %v351_v6  ;;  %v292_v15 = vadd.f32 %v2186_v8, %v221_v10  ;;  %v3306_v20 = vmov 1.0  }
  0x60   :  { %v343_v32 = vmax.f32 %v279_v23, 0.0  ;;  %813 = vmatprep.mubr.f32.mxu1 %v3306_v20 }
  0x61   :  { %v356_v18 = vmax.f32 %v292_v15, 0.0 }
  0x62   :  { %1957 = vmatmul.mubr.bf16.gmra.mrb[32].mxu0 %v374_v26  ;;  %v281_v26 = vadd.f32 %v2186_v8, %v210_v16  ;;  %v382_v44 = vpack.c.bf16 %v344_v34, %v343_v32 }
  0x63   :  { %1960 = vmatprep.mubr.bf16.mxu0 %v375_v30  ;;  %v1683_v30 = vunpack.c.l.bf16 %v1724_v21 }
  0x64   :  { %v345_v35 = vmax.f32 %v281_v26, 0.0 }
  0x65   :  { %v214_v39 = vmul.f32 %v1683_v30, %v2181_v5 }
  0x66   :  { %v383_v45 = vpack.c.bf16 %v346_v36, %v345_v35 }
  0x67   :  { %v285_v48 = vadd.f32 %v2186_v8, %v214_v39 }
  0x69   :  { %v349_v56 = vmax.f32 %v285_v48, 0.0 }
  0x6a   :  { %1961 = vmatmul.mubr.bf16.gmra.mrb[36].mxu0 %v376_v46  ;;  %v284_v46 = vadd.f32 %v2186_v8, %v213_v37 }
  0x6b   :  { %1964 = vmatprep.mubr.bf16.mxu0 %v377_v50  ;;  %v1691_v50 = vunpack.c.l.bf16 %v1726_v41  ;;  %v385_v2 = vpack.c.bf16 %v350_v57, %v349_v56 }
  0x6c   :  { %v348_v54 = vmax.f32 %v284_v46, 0.0 }
  0x6d   :  { %v218_v58 = vmul.f32 %v1691_v50, %v2181_v5 }
  0x6e   :  { %v384_v62 = vpack.c.bf16 %v348_v54, %v347_v53 }
  0x72   :  { %1965 = vmatmul.mubr.bf16.gmra.mrb[40].mxu0 %v378_v3  ;;  %v289_v3 = vadd.f32 %v2186_v8, %v218_v58 }
  0x73   :  { %1968 = vmatprep.mubr.bf16.mxu0 %v379_v9  ;;  %v220_v9 = vmul.f32 %v1695_v0, %v2181_v5  ;;  %v2425_v5 = vld [vmem:[%s3303_s2] ss:$0 sm:$0xff] }
  0x74   :  { %v353_v11 = vmax.f32 %v289_v3, 0.0 }
  0x75   :  { %v291_v14 = vadd.f32 %v2186_v8, %v220_v9 }
  0x76   :  { %v387_v16 = vpack.c.bf16 %v354_v12, %v353_v11 }
  0x77   :  { %v355_v17 = vmax.f32 %v291_v14, 0.0 }
  0x79   :  { %v388_v19 = vpack.c.bf16 %v356_v18, %v355_v17 }
  0x7a   :  { %1969 = vmatmul.mubr.bf16.gmra.mrb[44].mxu0 %v380_v22 }
  0x7b   :  { %1972 = vmatprep.mubr.bf16.mxu0 %v381_v29 }
  0x82   :  { %1973 = vmatmul.mubr.bf16.gmra.mrb[48].mxu0 %v382_v44 }
  0x83   :  { %1976 = vmatprep.mubr.bf16.mxu0 %v383_v45 }
  0x8a   :  { %1977 = vmatmul.mubr.bf16.gmra.mrb[52].mxu0 %v384_v62 }
  0x8b   :  { %1980 = vmatprep.mubr.bf16.mxu0 %v385_v2 }
  0x92   :  { %1981 = vmatmul.mubr.bf16.gmra.mrb[56].mxu0 %v386_v13 }
  0x93   :  { %1984 = vmatprep.mubr.bf16.mxu0 %v387_v16 }
  0x9a   :  { %1985 = vmatmul.mubr.bf16.gmra.mrb[60].mxu0 %v388_v19 }
  0xf5   :  { %v1926_v21 = vpop.f32.mrb[0].mxu0 }
  0xf6   :  { %v2428_v22 = vadd.f32 %v1926_v21, %v2425_v5  ;;  %v494_v8 = vpop.f32.mrb[1].mxu0 }
  0xf7   :  { %v2431_v23 = vadd.f32 %v2425_v5, %v494_v8  ;;  %v1927_v24 = vpop.f32.mrb[2].mxu0 }
  0xf8   :  { %v1507_v25 = vpack.c.bf16 %v2428_v22, %v2428_v22  ;;  %v2436_v26 = vadd.f32 %v1927_v24, %v2425_v5  ;;  %v497_v27 = vpop.f32.mrb[3].mxu0  ;;  %v2445_v30 = vmul.f32 %v2428_v22, %v2428_v22 }
  0xf9   :  { %v1505_v28 = vpack.c.bf16 %v2431_v23, %v2431_v23  ;;  %v2441_v29 = vadd.f32 %v2425_v5, %v497_v27  ;;  %v2461_v34 = vmul.f32 %v2431_v23, %v2431_v23 }
  0xfa   :  { %1360 = vst.msk [vmem:[%s3304_s5 + $0x8] sm:$0xf] %vm1357_vm0, %v1507_v25  ;;  %v2453_v31 = vmul.f32 %v2436_v26, %v2436_v26  ;;  %v1508_v32 = vpack.c.bf16 %v2436_v26, %v2436_v26  ;;  %v1994_v33 = vpack.c.bf16 %v2436_v26, %v2428_v22 }
  0xfb   :  { %1358 = vst.msk [vmem:[%s3304_s5] sm:$0xf] %vm1357_vm0, %v1505_v28  ;;  %v2469_v35 = vmul.f32 %v2441_v29, %v2441_v29  ;;  %v1506_v36 = vpack.c.bf16 %v2441_v29, %v2441_v29  ;;  %v1990_v37 = vpack.c.bf16 %v2441_v29, %v2431_v23 }
  0xfc   :  { %1361 = vst.msk [vmem:[%s3304_s5 + $0xc] sm:$0xf] %vm1357_vm0, %v1508_v32 }
  0xfd   :  { %1359 = vst.msk [vmem:[%s3304_s5 + $0x4] sm:$0xf] %vm1357_vm0, %v1506_v36  ;;  %v1930_v40 = vpop.f32.mrb[4].mxu0 }
  0xfe   :  { %v2488_v41 = vadd.f32 %v1930_v40, %v2425_v5  ;;  %v510_v42 = vpop.f32.mrb[5].mxu0 }
  0xff   :  { %v2491_v43 = vadd.f32 %v2425_v5, %v510_v42  ;;  %v1931_v44 = vpop.f32.mrb[6].mxu0 }
 0x100   :  { %v1511_v45 = vpack.c.bf16 %v2488_v41, %v2488_v41  ;;  %v2496_v46 = vadd.f32 %v1931_v44, %v2425_v5  ;;  %v513_v47 = vpop.f32.mrb[7].mxu0  ;;  %v2505_v50 = vmul.f32 %v2488_v41, %v2488_v41 }
 0x101   :  { %v1509_v48 = vpack.c.bf16 %v2491_v43, %v2491_v43  ;;  %v2501_v49 = vadd.f32 %v2425_v5, %v513_v47  ;;  %v2521_v54 = vmul.f32 %v2491_v43, %v2491_v43 }
 0x102   :  { %1364 = vst.msk [vmem:[%s3304_s5 + $0x18] sm:$0xf] %vm1357_vm0, %v1511_v45  ;;  %v2513_v51 = vmul.f32 %v2496_v46, %v2496_v46  ;;  %v1512_v52 = vpack.c.bf16 %v2496_v46, %v2496_v46  ;;  %v2002_v53 = vpack.c.bf16 %v2496_v46, %v2488_v41 }
 0x103   :  { %1362 = vst.msk [vmem:[%s3304_s5 + $0x10] sm:$0xf] %vm1357_vm0, %v1509_v48  ;;  %v2529_v55 = vmul.f32 %v2501_v49, %v2501_v49  ;;  %v1510_v56 = vpack.c.bf16 %v2501_v49, %v2501_v49  ;;  %v1998_v57 = vpack.c.bf16 %v2501_v49, %v2491_v43 }
 0x104   :  { %1365 = vst.msk [vmem:[%s3304_s5 + $0x1c] sm:$0xf] %vm1357_vm0, %v1512_v52 }
 0x105   :  { %1363 = vst.msk [vmem:[%s3304_s5 + $0x14] sm:$0xf] %vm1357_vm0, %v1510_v56  ;;  %v1934_v60 = vpop.f32.mrb[8].mxu0 }
 0x106   :  { %v2548_v61 = vadd.f32 %v1934_v60, %v2425_v5  ;;  %v526_v62 = vpop.f32.mrb[9].mxu0 }
 0x107   :  { %v2551_v63 = vadd.f32 %v2425_v5, %v526_v62  ;;  %v1935_v0 = vpop.f32.mrb[10].mxu0 }
 0x108   :  { %v1515_v1 = vpack.c.bf16 %v2548_v61, %v2548_v61  ;;  %v2556_v2 = vadd.f32 %v1935_v0, %v2425_v5  ;;  %v529_v3 = vpop.f32.mrb[11].mxu0  ;;  %v2565_v7 = vmul.f32 %v2548_v61, %v2548_v61 }
 0x109   :  { %v1513_v4 = vpack.c.bf16 %v2551_v63, %v2551_v63  ;;  %v2561_v6 = vadd.f32 %v2425_v5, %v529_v3  ;;  %v2581_v12 = vmul.f32 %v2551_v63, %v2551_v63 }
 0x10a   :  { %1368 = vst.msk [vmem:[%s3304_s5 + $0x28] sm:$0xf] %vm1357_vm0, %v1515_v1  ;;  %v2573_v9 = vmul.f32 %v2556_v2, %v2556_v2  ;;  %v1516_v10 = vpack.c.bf16 %v2556_v2, %v2556_v2  ;;  %v2010_v11 = vpack.c.bf16 %v2556_v2, %v2548_v61 }
 0x10b   :  { %1366 = vst.msk [vmem:[%s3304_s5 + $0x20] sm:$0xf] %vm1357_vm0, %v1513_v4  ;;  %v2589_v13 = vmul.f32 %v2561_v6, %v2561_v6  ;;  %v1514_v14 = vpack.c.bf16 %v2561_v6, %v2561_v6  ;;  %v2006_v15 = vpack.c.bf16 %v2561_v6, %v2551_v63 }
 0x10c   :  { %1369 = vst.msk [vmem:[%s3304_s5 + $0x2c] sm:$0xf] %vm1357_vm0, %v1516_v10 }
 0x10d   :  { %1367 = vst.msk [vmem:[%s3304_s5 + $0x24] sm:$0xf] %vm1357_vm0, %v1514_v14  ;;  %v1938_v18 = vpop.f32.mrb[12].mxu0 }
 0x10e   :  { %v2608_v19 = vadd.f32 %v1938_v18, %v2425_v5  ;;  %v542_v21 = vpop.f32.mrb[13].mxu0 }
 0x10f   :  { %v2611_v8 = vadd.f32 %v2425_v5, %v542_v21  ;;  %v1939_v24 = vpop.f32.mrb[14].mxu0 }
 0x110   :  { %v1519_v25 = vpack.c.bf16 %v2608_v19, %v2608_v19  ;;  %v2616_v27 = vadd.f32 %v1939_v24, %v2425_v5  ;;  %v545_v28 = vpop.f32.mrb[15].mxu0  ;;  %v2625_v40 = vmul.f32 %v2608_v19, %v2608_v19 }
 0x111   :  { %v1517_v32 = vpack.c.bf16 %v2611_v8, %v2611_v8  ;;  %v2621_v36 = vadd.f32 %v2425_v5, %v545_v28  ;;  %v2641_v47 = vmul.f32 %v2611_v8, %v2611_v8 }
 0x112   :  { %3327 = vst [vmem:[#allocation2_spill] sm:$0xff] %v2625_v40  ;;  %1372 = vst.msk [vmem:[%s3304_s5 + $0x38] sm:$0xf] %vm1357_vm0, %v1519_v25  ;;  %v2633_v42 = vmul.f32 %v2616_v27, %v2616_v27  ;;  %v1520_v44 = vpack.c.bf16 %v2616_v27, %v2616_v27  ;;  %v2018_v45 = vpack.c.bf16 %v2616_v27, %v2608_v19 }
 0x113   :  { %1370 = vst.msk [vmem:[%s3304_s5 + $0x30] sm:$0xf] %vm1357_vm0, %v1517_v32  ;;  %v2649_v48 = vmul.f32 %v2621_v36, %v2621_v36  ;;  %v1518_v52 = vpack.c.bf16 %v2621_v36, %v2621_v36  ;;  %v2014_v56 = vpack.c.bf16 %v2621_v36, %v2611_v8 }
 0x114   :  { %1373 = vst.msk [vmem:[%s3304_s5 + $0x3c] sm:$0xf] %vm1357_vm0, %v1520_v44 }
 0x115   :  { %1371 = vst.msk [vmem:[%s3304_s5 + $0x34] sm:$0xf] %vm1357_vm0, %v1518_v52  ;;  %v1942_v0 = vpop.f32.mrb[16].mxu0 }
 0x116   :  { %v567_v1 = vadd.f32 %v1942_v0, %v2425_v5  ;;  %v558_v3 = vpop.f32.mrb[17].mxu0 }
 0x117   :  { %v559_v4 = vadd.f32 %v2425_v5, %v558_v3  ;;  %v1943_v10 = vpop.f32.mrb[18].mxu0 }
 0x118   :  { %v1523_v14 = vpack.c.bf16 %v567_v1, %v567_v1  ;;  %v570_v18 = vadd.f32 %v1943_v10, %v2425_v5  ;;  %v561_v21 = vpop.f32.mrb[19].mxu0  ;;  %v2671_v28 = vmul.f32 %v567_v1, %v567_v1 }
 0x119   :  { %v1521_v24 = vpack.c.bf16 %v559_v4, %v559_v4  ;;  %v562_v25 = vadd.f32 %v2425_v5, %v561_v21  ;;  %v2679_v0 = vmul.f32 %v559_v4, %v559_v4 }
 0x11a   :  { %1376 = vst.msk [vmem:[%s3304_s5 + $0x48] sm:$0xf] %vm1357_vm0, %v1523_v14  ;;  %v2677_v32 = vmul.f32 %v570_v18, %v570_v18  ;;  %v1524_v44 = vpack.c.bf16 %v570_v18, %v570_v18  ;;  %v1992_v52 = vpack.c.bf16 %v570_v18, %v567_v1 }
 0x11b   :  { %1374 = vst.msk [vmem:[%s3304_s5 + $0x40] sm:$0xf] %vm1357_vm0, %v1521_v24  ;;  %v2685_v3 = vmul.f32 %v562_v25, %v562_v25  ;;  %v1522_v10 = vpack.c.bf16 %v562_v25, %v562_v25  ;;  %v1988_v21 = vpack.c.bf16 %v562_v25, %v559_v4 }
 0x11c   :  { %1377 = vst.msk [vmem:[%s3304_s5 + $0x4c] sm:$0xf] %vm1357_vm0, %v1524_v44 }
 0x11d   :  { %1375 = vst.msk [vmem:[%s3304_s5 + $0x44] sm:$0xf] %vm1357_vm0, %v1522_v10  ;;  %v1946_v1 = vpop.f32.mrb[20].mxu0  ;;  %1989 = vmatprep.subr.bf16.mxu1 %v1988_v21 }
 0x11e   :  { %v583_v4 = vadd.f32 %v1946_v1, %v2425_v5  ;;  %v574_v24 = vpop.f32.mrb[21].mxu0  ;;  %1991 = vmatpush3.bf16.msra.mxu1 %v1990_v37 }
 0x11f   :  { %v575_v25 = vadd.f32 %v2425_v5, %v574_v24  ;;  %v1947_v44 = vpop.f32.mrb[22].mxu0  ;;  %1993 = vmatprep.subr.bf16.mxu1 %v1992_v52 }
 0x120   :  { %v1527_v60 = vpack.c.bf16 %v583_v4, %v583_v4  ;;  %v586_v62 = vadd.f32 %v1947_v44, %v2425_v5  ;;  %v577_v10 = vpop.f32.mrb[23].mxu0  ;;  %v2706_v17 = vmul.f32 %v583_v4, %v583_v4 }
 0x121   :  { %v1525_v16 = vpack.c.bf16 %v575_v25, %v575_v25  ;;  %v578_v21 = vadd.f32 %v2425_v5, %v577_v10  ;;  %v2717_v52 = vmul.f32 %v575_v25, %v575_v25 }
 0x122   :  { %1380 = vst.msk [vmem:[%s3304_s5 + $0x58] sm:$0xf] %vm1357_vm0, %v1527_v60  ;;  %v2712_v23 = vmul.f32 %v586_v62, %v586_v62  ;;  %v1528_v29 = vpack.c.bf16 %v586_v62, %v586_v62  ;;  %1995 = vmatpush3.bf16.msra.mxu1 %v1994_v33  ;;  %v2000_v37 = vpack.c.bf16 %v586_v62, %v583_v4 }
 0x123   :  { %1378 = vst.msk [vmem:[%s3304_s5 + $0x50] sm:$0xf] %vm1357_vm0, %v1525_v16  ;;  %v2723_v1 = vmul.f32 %v578_v21, %v578_v21  ;;  %v1526_v24 = vpack.c.bf16 %v578_v21, %v578_v21  ;;  %v1996_v44 = vpack.c.bf16 %v578_v21, %v575_v25 }
 0x124   :  { %1381 = vst.msk [vmem:[%s3304_s5 + $0x5c] sm:$0xf] %vm1357_vm0, %v1528_v29 }
 0x125   :  { %1379 = vst.msk [vmem:[%s3304_s5 + $0x54] sm:$0xf] %vm1357_vm0, %v1526_v24  ;;  %v1950_v26 = vpop.f32.mrb[24].mxu0  ;;  %1997 = vmatprep.subr.bf16.mxu1 %v1996_v44 }
 0x126   :  { %v599_v16 = vadd.f32 %v1950_v26, %v2425_v5  ;;  %v590_v60 = vpop.f32.mrb[25].mxu0  ;;  %1999 = vmatpush3.bf16.msra.mxu1 %v1998_v57 }
 0x127   :  { %v591_v62 = vadd.f32 %v2425_v5, %v590_v60  ;;  %v1951_v4 = vpop.f32.mrb[26].mxu0  ;;  %2001 = vmatprep.subr.bf16.mxu1 %v2000_v37 }
 0x128   :  { %v1531_v25 = vpack.c.bf16 %v599_v16, %v599_v16  ;;  %v602_v10 = vadd.f32 %v1951_v4, %v2425_v5  ;;  %v593_v21 = vpop.f32.mrb[27].mxu0  ;;  %v2744_v44 = vmul.f32 %v599_v16, %v599_v16 }
 0x129   :  { %v1529_v29 = vpack.c.bf16 %v591_v62, %v591_v62  ;;  %v594_v24 = vadd.f32 %v2425_v5, %v593_v21  ;;  %v2755_v37 = vmul.f32 %v591_v62, %v591_v62 }
 0x12a   :  { %1384 = vst.msk [vmem:[%s3304_s5 + $0x68] sm:$0xf] %vm1357_vm0, %v1531_v25  ;;  %v2750_v43 = vmul.f32 %v602_v10, %v602_v10  ;;  %v1532_v49 = vpack.c.bf16 %v602_v10, %v602_v10  ;;  %2003 = vmatpush3.bf16.msra.mxu1 %v2002_v53  ;;  %v2008_v57 = vpack.c.bf16 %v602_v10, %v599_v16 }
 0x12b   :  { %1382 = vst.msk [vmem:[%s3304_s5 + $0x60] sm:$0xf] %vm1357_vm0, %v1529_v29  ;;  %v2761_v26 = vmul.f32 %v594_v24, %v594_v24  ;;  %v1530_v60 = vpack.c.bf16 %v594_v24, %v594_v24  ;;  %v2004_v4 = vpack.c.bf16 %v594_v24, %v591_v62 }
 0x12c   :  { %1385 = vst.msk [vmem:[%s3304_s5 + $0x6c] sm:$0xf] %vm1357_vm0, %v1532_v49 }
 0x12d   :  { %1383 = vst.msk [vmem:[%s3304_s5 + $0x64] sm:$0xf] %vm1357_vm0, %v1530_v60  ;;  %v1954_v46 = vpop.f32.mrb[28].mxu0  ;;  %2005 = vmatprep.subr.bf16.mxu1 %v2004_v4 }
 0x12e   :  { %v615_v16 = vadd.f32 %v1954_v46, %v2425_v5  ;;  %v606_v62 = vpop.f32.mrb[29].mxu0  ;;  %2007 = vmatpush3.bf16.msra.mxu1 %v2006_v15 }
 0x12f   :  { %v607_v25 = vadd.f32 %v2425_v5, %v606_v62  ;;  %v1955_v10 = vpop.f32.mrb[30].mxu0  ;;  %2009 = vmatprep.subr.bf16.mxu1 %v2008_v57 }
 0x130   :  { %v1535_v21 = vpack.c.bf16 %v615_v16, %v615_v16  ;;  %v618_v29 = vadd.f32 %v1955_v10, %v2425_v5  ;;  %v609_v24 = vpop.f32.mrb[31].mxu0  ;;  %v2782_v4 = vmul.f32 %v615_v16, %v615_v16 }
 0x131   :  { %v1533_v49 = vpack.c.bf16 %v607_v25, %v607_v25  ;;  %v610_v60 = vadd.f32 %v2425_v5, %v609_v24  ;;  %v2793_v57 = vmul.f32 %v607_v25, %v607_v25 }
 0x132   :  { %1388 = vst.msk [vmem:[%s3304_s5 + $0x78] sm:$0xf] %vm1357_vm0, %v1535_v21  ;;  %v2788_v63 = vmul.f32 %v618_v29, %v618_v29  ;;  %v1536_v6 = vpack.c.bf16 %v618_v29, %v618_v29  ;;  %2011 = vmatpush3.bf16.msra.mxu1 %v2010_v11  ;;  %v2016_v15 = vpack.c.bf16 %v618_v29, %v615_v16 }
 0x133   :  { %1386 = vst.msk [vmem:[%s3304_s5 + $0x70] sm:$0xf] %vm1357_vm0, %v1533_v49  ;;  %v2799_v46 = vmul.f32 %v610_v60, %v610_v60  ;;  %v1534_v62 = vpack.c.bf16 %v610_v60, %v610_v60  ;;  %v2012_v10 = vpack.c.bf16 %v610_v60, %v607_v25 }
 0x134   :  { %1389 = vst.msk [vmem:[%s3304_s5 + $0x7c] sm:$0xf] %vm1357_vm0, %v1536_v6 }
 0x135   :  { %1387 = vst.msk [vmem:[%s3304_s5 + $0x74] sm:$0xf] %vm1357_vm0, %v1534_v62  ;;  %v1958_v2 = vpop.f32.mrb[32].mxu0  ;;  %2013 = vmatprep.subr.bf16.mxu1 %v2012_v10 }
 0x136   :  { %v2814_v16 = vadd.f32 %v1958_v2, %v2425_v5  ;;  %v622_v25 = vpop.f32.mrb[33].mxu0  ;;  %2015 = vmatpush3.bf16.msra.mxu1 %v2014_v56 }
 0x137   :  { %v2820_v21 = vadd.f32 %v2425_v5, %v622_v25  ;;  %v1959_v29 = vpop.f32.mrb[34].mxu0  ;;  %2017 = vmatprep.subr.bf16.mxu1 %v2016_v15 }
 0x138   :  { %v1539_v24 = vpack.c.bf16 %v2814_v16, %v2814_v16  ;;  %v2825_v49 = vadd.f32 %v1959_v29, %v2425_v5  ;;  %v625_v60 = vpop.f32.mrb[35].mxu0  ;;  %v2834_v8 = vmul.f32 %v2814_v16, %v2814_v16 }
 0x139   :  { %v1537_v6 = vpack.c.bf16 %v2820_v21, %v2820_v21  ;;  %v2830_v62 = vadd.f32 %v2425_v5, %v625_v60  ;;  %v2853_v10 = vmul.f32 %v2820_v21, %v2820_v21 }
 0x13a   :  { %3328 = vst [vmem:[#allocation3_spill] sm:$0xff] %v2834_v8  ;;  %1392 = vst.msk [vmem:[%s3304_s5 + $0x88] sm:$0xf] %vm1357_vm0, %v1539_v24  ;;  %v2844_v56 = vmul.f32 %v2825_v49, %v2825_v49  ;;  %v1540_v15 = vpack.c.bf16 %v2825_v49, %v2825_v49  ;;  %2019 = vmatpush3.bf16.msra.mxu1 %v2018_v45 }
 0x13b   :  { %3330 = vst [vmem:[#allocation5_spill] sm:$0xff] %v2853_v10  ;;  %1390 = vst.msk [vmem:[%s3304_s5 + $0x80] sm:$0xf] %vm1357_vm0, %v1537_v6  ;;  %v2863_v25 = vmul.f32 %v2830_v62, %v2830_v62  ;;  %v1538_v19 = vpack.c.bf16 %v2830_v62, %v2830_v62 }
 0x13c   :  { %3329 = vst [vmem:[#allocation4_spill] sm:$0xff] %v2844_v56  ;;  %1393 = vst.msk [vmem:[%s3304_s5 + $0x8c] sm:$0xf] %vm1357_vm0, %v1540_v15 }
 0x13d   :  { %3331 = vst [vmem:[#allocation6_spill] sm:$0xff] %v2863_v25  ;;  %1391 = vst.msk [vmem:[%s3304_s5 + $0x84] sm:$0xf] %vm1357_vm0, %v1538_v19  ;;  %v1962_v29 = vpop.f32.mrb[36].mxu0  ;;  %814 = vmatmul.mubr.f32.vlgmr.msra.gmra.mrb[0].mxu1 %v3306_v20 }
 0x13e   :  { %v2881_v24 = vadd.f32 %v1962_v29, %v2425_v5  ;;  %v638_v60 = vpop.f32.mrb[37].mxu0  ;;  %883 = vmatprep.mubr.f32.mxu1 %v3306_v20 }
 0x13f   :  { %v2885_v6 = vadd.f32 %v2425_v5, %v638_v60  ;;  %v1963_v15 = vpop.f32.mrb[38].mxu0 }
 0x140   :  { %v1543_v27 = vpack.c.bf16 %v2881_v24, %v2881_v24  ;;  %v2890_v45 = vadd.f32 %v1963_v15, %v2425_v5  ;;  %v641_v19 = vpop.f32.mrb[39].mxu0  ;;  %v2899_v11 = vmul.f32 %v2881_v24, %v2881_v24 }
 0x141   :  { %v1541_v61 = vpack.c.bf16 %v2885_v6, %v2885_v6  ;;  %v2895_v29 = vadd.f32 %v2425_v5, %v641_v19  ;;  %v2915_v41 = vmul.f32 %v2885_v6, %v2885_v6 }
 0x142   :  { %3332 = vst [vmem:[#allocation7_spill] sm:$0xff] %v2899_v11  ;;  %1396 = vst.msk [vmem:[%s3304_s5 + $0x98] sm:$0xf] %vm1357_vm0, %v1543_v27  ;;  %v2909_v15 = vmul.f32 %v2890_v45, %v2890_v45  ;;  %v1544_v19 = vpack.c.bf16 %v2890_v45, %v2890_v45 }
 0x143   :  { %3334 = vst [vmem:[#allocation9_spill] sm:$0xff] %v2915_v41  ;;  %1394 = vst.msk [vmem:[%s3304_s5 + $0x90] sm:$0xf] %vm1357_vm0, %v1541_v61  ;;  %v2925_v53 = vmul.f32 %v2895_v29, %v2895_v29  ;;  %v1542_v58 = vpack.c.bf16 %v2895_v29, %v2895_v29 }
 0x144   :  { %3333 = vst [vmem:[#allocation8_spill] sm:$0xff] %v2909_v15  ;;  %1397 = vst.msk [vmem:[%s3304_s5 + $0x9c] sm:$0xf] %vm1357_vm0, %v1544_v19 }
 0x145   :  { %3335 = vst [vmem:[#allocation10_spill] sm:$0xff] %v2925_v53  ;;  %1395 = vst.msk [vmem:[%s3304_s5 + $0x94] sm:$0xf] %vm1357_vm0, %v1542_v58  ;;  %v1966_v59 = vpop.f32.mrb[40].mxu0 }
 0x146   :  { %v2942_v33 = vadd.f32 %v1966_v59, %v2425_v5  ;;  %v654_v38 = vpop.f32.mrb[41].mxu0 }
 0x147   :  { %v2945_v22 = vadd.f32 %v2425_v5, %v654_v38  ;;  %v1967_v14 = vpop.f32.mrb[42].mxu0 }
 0x148   :  { %v1547_v19 = vpack.c.bf16 %v2942_v33, %v2942_v33  ;;  %v2950_v39 = vadd.f32 %v1967_v14, %v2425_v5  ;;  %v657_v61 = vpop.f32.mrb[43].mxu0  ;;  %v2959_v59 = vmul.f32 %v2942_v33, %v2942_v33 }
 0x149   :  { %v1545_v20 = vpack.c.bf16 %v2945_v22, %v2945_v22  ;;  %v2955_v58 = vadd.f32 %v2425_v5, %v657_v61  ;;  %v2975_v18 = vmul.f32 %v2945_v22, %v2945_v22 }
 0x14a   :  { %3336 = vst [vmem:[#allocation11_spill] sm:$0xff] %v2959_v59  ;;  %1400 = vst.msk [vmem:[%s3304_s5 + $0xa8] sm:$0xf] %vm1357_vm0, %v1547_v19  ;;  %v2969_v14 = vmul.f32 %v2950_v39, %v2950_v39  ;;  %v1548_v61 = vpack.c.bf16 %v2950_v39, %v2950_v39 }
 0x14b   :  { %3338 = vst [vmem:[#allocation13_spill] sm:$0xff] %v2975_v18  ;;  %1398 = vst.msk [vmem:[%s3304_s5 + $0xa0] sm:$0xf] %vm1357_vm0, %v1545_v20  ;;  %v2985_v38 = vmul.f32 %v2955_v58, %v2955_v58  ;;  %v1546_v60 = vpack.c.bf16 %v2955_v58, %v2955_v58 }
 0x14c   :  { %3337 = vst [vmem:[#allocation12_spill] sm:$0xff] %v2969_v14  ;;  %1401 = vst.msk [vmem:[%s3304_s5 + $0xac] sm:$0xf] %vm1357_vm0, %v1548_v61 }
 0x14d   :  { %3339 = vst [vmem:[#allocation14_spill] sm:$0xff] %v2985_v38  ;;  %1399 = vst.msk [vmem:[%s3304_s5 + $0xa4] sm:$0xf] %vm1357_vm0, %v1546_v60  ;;  %v1970_v19 = vpop.f32.mrb[44].mxu0 }
 0x14e   :  { %v3002_v36 = vadd.f32 %v1970_v19, %v2425_v5  ;;  %v670_v2 = vpop.f32.mrb[45].mxu0 }
 0x14f   :  { %v3005_v27 = vadd.f32 %v2425_v5, %v670_v2  ;;  %v1971_v59 = vpop.f32.mrb[46].mxu0 }
 0x150   :  { %v1551_v61 = vpack.c.bf16 %v3002_v36, %v3002_v36  ;;  %v3010_v14 = vadd.f32 %v1971_v59, %v2425_v5  ;;  %v673_v20 = vpop.f32.mrb[47].mxu0  ;;  %v3019_v19 = vmul.f32 %v3002_v36, %v3002_v36 }
 0x151   :  { %v1549_v18 = vpack.c.bf16 %v3005_v27, %v3005_v27  ;;  %v3015_v60 = vadd.f32 %v2425_v5, %v673_v20  ;;  %v3035_v38 = vmul.f32 %v3005_v27, %v3005_v27 }
 0x152   :  { %3340 = vst [vmem:[#allocation15_spill] sm:$0xff] %v3019_v19  ;;  %1404 = vst.msk [vmem:[%s3304_s5 + $0xb8] sm:$0xf] %vm1357_vm0, %v1551_v61  ;;  %v3029_v59 = vmul.f32 %v3010_v14, %v3010_v14  ;;  %v1552_v20 = vpack.c.bf16 %v3010_v14, %v3010_v14 }
 0x153   :  { %3342 = vst [vmem:[#allocation17_spill] sm:$0xff] %v3035_v38  ;;  %1402 = vst.msk [vmem:[%s3304_s5 + $0xb0] sm:$0xf] %vm1357_vm0, %v1549_v18  ;;  %v3045_v2 = vmul.f32 %v3015_v60, %v3015_v60  ;;  %v1550_v11 = vpack.c.bf16 %v3015_v60, %v3015_v60 }
 0x154   :  { %3341 = vst [vmem:[#allocation16_spill] sm:$0xff] %v3029_v59  ;;  %1405 = vst.msk [vmem:[%s3304_s5 + $0xbc] sm:$0xf] %vm1357_vm0, %v1552_v20 }
 0x155   :  { %3343 = vst [vmem:[#allocation18_spill] sm:$0xff] %v3045_v2  ;;  %1403 = vst.msk [vmem:[%s3304_s5 + $0xb4] sm:$0xf] %vm1357_vm0, %v1550_v11  ;;  %v1974_v61 = vpop.f32.mrb[48].mxu0 }
 0x156   :  { %v695_v41 = vadd.f32 %v1974_v61, %v2425_v5  ;;  %v686_v53 = vpop.f32.mrb[49].mxu0 }
 0x157   :  { %v687_v8 = vadd.f32 %v2425_v5, %v686_v53  ;;  %v1975_v15 = vpop.f32.mrb[50].mxu0 }
 0x158   :  { %v1555_v19 = vpack.c.bf16 %v695_v41, %v695_v41  ;;  %v698_v59 = vadd.f32 %v1975_v15, %v2425_v5  ;;  %v689_v56 = vpop.f32.mrb[51].mxu0  ;;  %v3065_v18 = vmul.f32 %v695_v41, %v695_v41 }
 0x159   :  { %v1553_v20 = vpack.c.bf16 %v687_v8, %v687_v8  ;;  %v690_v10 = vadd.f32 %v2425_v5, %v689_v56  ;;  %v3073_v53 = vmul.f32 %v687_v8, %v687_v8 }
 0x15a   :  { %3344 = vst [vmem:[#allocation19_spill] sm:$0xff] %v3065_v18  ;;  %1408 = vst.msk [vmem:[%s3304_s5 + $0xc8] sm:$0xf] %vm1357_vm0, %v1555_v19  ;;  %v3071_v11 = vmul.f32 %v698_v59, %v698_v59  ;;  %v1556_v61 = vpack.c.bf16 %v698_v59, %v698_v59  ;;  %v2024_v38 = vpack.c.bf16 %v698_v59, %v695_v41 }
 0x15b   :  { %1406 = vst.msk [vmem:[%s3304_s5 + $0xc0] sm:$0xf] %vm1357_vm0, %v1553_v20  ;;  %v3079_v15 = vmul.f32 %v690_v10, %v690_v10  ;;  %v1554_v56 = vpack.c.bf16 %v690_v10, %v690_v10  ;;  %v2020_v2 = vpack.c.bf16 %v690_v10, %v687_v8  ;;  %v3346_v20 = vpack.c.bf16 %v2830_v62, %v2820_v21 }
 0x15c   :  { %3345 = vst [vmem:[#allocation20_spill] sm:$0xff] %v3071_v11  ;;  %1409 = vst.msk [vmem:[%s3304_s5 + $0xcc] sm:$0xf] %vm1357_vm0, %v1556_v61 }
 0x15d   :  { %1407 = vst.msk [vmem:[%s3304_s5 + $0xc4] sm:$0xf] %vm1357_vm0, %v1554_v56  ;;  %v1978_v41 = vpop.f32.mrb[52].mxu0  ;;  %2021 = vmatprep.subr.bf16.mxu1 %v2020_v2 }
 0x15e   :  { %v711_v8 = vadd.f32 %v1978_v41, %v2425_v5  ;;  %v702_v10 = vpop.f32.mrb[53].mxu0  ;;  %2023 = vmatpush3.bf16.msra.mxu1 %v3346_v20 }
 0x15f   :  { %v703_v61 = vadd.f32 %v2425_v5, %v702_v10  ;;  %v1979_v19 = vpop.f32.mrb[54].mxu0  ;;  %2025 = vmatprep.subr.bf16.mxu1 %v2024_v38  ;;  %v3347_v38 = vpack.c.bf16 %v2825_v49, %v2814_v16 }
 0x160   :  { %v1559_v18 = vpack.c.bf16 %v711_v8, %v711_v8  ;;  %v714_v11 = vadd.f32 %v1979_v19, %v2425_v5  ;;  %v705_v56 = vpop.f32.mrb[55].mxu0  ;;  %v3100_v40 = vmul.f32 %v711_v8, %v711_v8 }
 0x161   :  { %v1557_v25 = vpack.c.bf16 %v703_v61, %v703_v61  ;;  %v706_v2 = vadd.f32 %v2425_v5, %v705_v56  ;;  %v3111_v19 = vmul.f32 %v703_v61, %v703_v61 }
 0x162   :  { %1412 = vst.msk [vmem:[%s3304_s5 + $0xd8] sm:$0xf] %vm1357_vm0, %v1559_v18  ;;  %v3106_v21 = vmul.f32 %v714_v11, %v714_v11  ;;  %v1560_v62 = vpack.c.bf16 %v714_v11, %v714_v11  ;;  %2027 = vmatpush3.bf16.msra.mxu1 %v3347_v38  ;;  %v2032_v41 = vpack.c.bf16 %v714_v11, %v711_v8 }
 0x163   :  { %1410 = vst.msk [vmem:[%s3304_s5 + $0xd0] sm:$0xf] %vm1357_vm0, %v1557_v25  ;;  %v3117_v10 = vmul.f32 %v706_v2, %v706_v2  ;;  %v1558_v20 = vpack.c.bf16 %v706_v2, %v706_v2  ;;  %v2028_v56 = vpack.c.bf16 %v706_v2, %v703_v61  ;;  %v3348_v8 = vpack.c.bf16 %v2895_v29, %v2885_v6 }
 0x164   :  { %1413 = vst.msk [vmem:[%s3304_s5 + $0xdc] sm:$0xf] %vm1357_vm0, %v1560_v62 }
 0x165   :  { %1411 = vst.msk [vmem:[%s3304_s5 + $0xd4] sm:$0xf] %vm1357_vm0, %v1558_v20  ;;  %v1982_v49 = vpop.f32.mrb[56].mxu0  ;;  %2029 = vmatprep.subr.bf16.mxu1 %v2028_v56 }
 0x166   :  { %v727_v18 = vadd.f32 %v1982_v49, %v2425_v5  ;;  %v718_v11 = vpop.f32.mrb[57].mxu0  ;;  %2031 = vmatpush3.bf16.msra.mxu1 %v3348_v8 }
 0x167   :  { %v719_v61 = vadd.f32 %v2425_v5, %v718_v11  ;;  %v1983_v2 = vpop.f32.mrb[58].mxu0  ;;  %2033 = vmatprep.subr.bf16.mxu1 %v2032_v41  ;;  %v3349_v41 = vpack.c.bf16 %v2890_v45, %v2881_v24 }
 0x168   :  { %v1563_v62 = vpack.c.bf16 %v727_v18, %v727_v18  ;;  %v730_v38 = vadd.f32 %v1983_v2, %v2425_v5  ;;  %v721_v20 = vpop.f32.mrb[59].mxu0  ;;  %v3138_v59 = vmul.f32 %v727_v18, %v727_v18 }
 0x169   :  { %v1561_v16 = vpack.c.bf16 %v719_v61, %v719_v61  ;;  %v722_v56 = vadd.f32 %v2425_v5, %v721_v20  ;;  %v3149_v11 = vmul.f32 %v719_v61, %v719_v61 }
 0x16a   :  { %1416 = vst.msk [vmem:[%s3304_s5 + $0xe8] sm:$0xf] %vm1357_vm0, %v1563_v62  ;;  %v3144_v6 = vmul.f32 %v730_v38, %v730_v38  ;;  %v1564_v29 = vpack.c.bf16 %v730_v38, %v730_v38  ;;  %2035 = vmatpush3.bf16.msra.mxu1 %v3349_v41  ;;  %v2040_v49 = vpack.c.bf16 %v730_v38, %v727_v18 }
 0x16b   :  { %1414 = vst.msk [vmem:[%s3304_s5 + $0xe0] sm:$0xf] %vm1357_vm0, %v1561_v16  ;;  %v3155_v8 = vmul.f32 %v722_v56, %v722_v56  ;;  %v1562_v2 = vpack.c.bf16 %v722_v56, %v722_v56  ;;  %v2036_v20 = vpack.c.bf16 %v722_v56, %v719_v61  ;;  %v3350_v62 = vpack.c.bf16 %v2955_v58, %v2945_v22 }
 0x16c   :  { %1417 = vst.msk [vmem:[%s3304_s5 + $0xec] sm:$0xf] %vm1357_vm0, %v1564_v29  ;;  %v3351_v58 = vpack.c.bf16 %v2950_v39, %v2942_v33  ;;  %v3352_v33 = vpack.c.bf16 %v3015_v60, %v3005_v27  ;;  %v3357_v27 = vpack.c.bf16 %v2677_v32, %v2671_v28  ;;  %v3374_v28 = vld [vmem:[#allocation5_spill] sm:$0xff] }
 0x16d   :  { %1415 = vst.msk [vmem:[%s3304_s5 + $0xe4] sm:$0xf] %vm1357_vm0, %v1562_v2  ;;  %v1986_v24 = vpop.f32.mrb[60].mxu0  ;;  %2037 = vmatprep.subr.bf16.mxu1 %v2036_v20  ;;  %v2100_v16 = vpack.c.bf16 %v3155_v8, %v3149_v11  ;;  %v3391_v60 = vld [vmem:[#allocation13_spill] sm:$0xff] }
 0x16e   :  { %v743_v18 = vadd.f32 %v1986_v24, %v2425_v5  ;;  %v734_v61 = vpop.f32.mrb[61].mxu0  ;;  %2039 = vmatpush3.bf16.msra.mxu1 %v3350_v62 }
 0x16f   :  { %v735_v38 = vadd.f32 %v2425_v5, %v734_v61  ;;  %v1987_v56 = vpop.f32.mrb[62].mxu0  ;;  %2041 = vmatprep.subr.bf16.mxu1 %v2040_v49 }
 0x170   :  { %v1567_v29 = vpack.c.bf16 %v743_v18, %v743_v18  ;;  %v746_v41 = vadd.f32 %v1987_v56, %v2425_v5  ;;  %v737_v2 = vpop.f32.mrb[63].mxu0  ;;  %v953_v25 = vmul.f32 %v743_v18, %v743_v18 }
 0x171   :  { %v1565_v45 = vpack.c.bf16 %v735_v38, %v735_v38  ;;  %v738_v20 = vadd.f32 %v2425_v5, %v737_v2  ;;  %v951_v8 = vmul.f32 %v735_v38, %v735_v38 }
 0x172   :  { %1420 = vst.msk [vmem:[%s3304_s5 + $0xf8] sm:$0xf] %vm1357_vm0, %v1567_v29  ;;  %v954_v11 = vmul.f32 %v746_v41, %v746_v41  ;;  %v1568_v22 = vpack.c.bf16 %v746_v41, %v746_v41  ;;  %2043 = vmatpush3.bf16.msra.mxu1 %v3351_v58  ;;  %v2048_v49 = vpack.c.bf16 %v746_v41, %v743_v18  ;;  %v3400_v41 = vld [vmem:[#allocation16_spill] sm:$0xff] }
 0x173   :  { %1418 = vst.msk [vmem:[%s3304_s5 + $0xf0] sm:$0xf] %vm1357_vm0, %v1565_v45  ;;  %v952_v5 = vmul.f32 %v738_v20, %v738_v20  ;;  %v1566_v24 = vpack.c.bf16 %v738_v20, %v738_v20  ;;  %v2044_v61 = vpack.c.bf16 %v738_v20, %v735_v38  ;;  %v3353_v45 = vpack.c.bf16 %v3010_v14, %v3002_v36  ;;  %v3390_v14 = vld [vmem:[#allocation14_spill] sm:$0xff] }
 0x174   :  { %1421 = vst.msk [vmem:[%s3304_s5 + $0xfc] sm:$0xf] %vm1357_vm0, %v1568_v22  ;;  %v2112_v62 = vpack.c.bf16 %v954_v11, %v953_v25  ;;  %v3354_v18 = vpack.c.bf16 %v2685_v3, %v2679_v0  ;;  %v3355_v25 = vmov 1.0   ;;  %v3356_v38 = vpack.c.bf16 %v2469_v35, %v2461_v34 }
 0x175   :  { %1419 = vst.msk [vmem:[%s3304_s5 + $0xf4] sm:$0xf] %vm1357_vm0, %v1566_v24  ;;  %2045 = vmatprep.subr.bf16.mxu1 %v2044_v61  ;;  %v2108_v39 = vpack.c.bf16 %v952_v5, %v951_v8  ;;  %v3358_v36 = vpack.c.bf16 %v2453_v31, %v2445_v30  ;;  %v3359_v0 = vpack.c.bf16 %v2723_v1, %v2717_v52  ;;  %v3379_v52 = vld [vmem:[#allocation4_spill] sm:$0xff]  ;;  %v3380_v1 = vld [vmem:[#allocation3_spill] sm:$0xff] }
 0x176   :  { %2047 = vmatpush3.bf16.msra.mxu1 %v3352_v33  ;;  %v3360_v3 = vpack.c.bf16 %v2529_v55, %v2521_v54  ;;  %v3361_v34 = vpack.c.bf16 %v2712_v23, %v2706_v17  ;;  %v3362_v35 = vpack.c.bf16 %v2513_v51, %v2505_v50  ;;  %v3363_v30 = vpack.c.bf16 %v2761_v26, %v2755_v37  ;;  %v3384_v37 = vld [vmem:[#allocation9_spill] sm:$0xff] }
 0x177   :  { %2049 = vmatprep.subr.bf16.mxu1 %v2048_v49  ;;  %v3364_v31 = vpack.c.bf16 %v2589_v13, %v2581_v12  ;;  %v3365_v54 = vpack.c.bf16 %v2750_v43, %v2744_v44  ;;  %v3366_v55 = vpack.c.bf16 %v2573_v9, %v2565_v7  ;;  %v3367_v50 = vpack.c.bf16 %v2799_v46, %v2793_v57  ;;  %v3370_v13 = vld [vmem:[#allocation2_spill] sm:$0xff]  ;;  %v3388_v57 = vld [vmem:[#allocation7_spill] sm:$0xff] }
 0x178   :  { %v3368_v51 = vpack.c.bf16 %v2649_v48, %v2641_v47  ;;  %v3369_v12 = vpack.c.bf16 %v2788_v63, %v2782_v4  ;;  %v3371_v17 = vpack.c.bf16 %v2633_v42, %v3370_v13  ;;  %v3372_v7 = vpack.c.bf16 %v3079_v15, %v3073_v53  ;;  %v3373_v9 = vld [vmem:[#allocation6_spill] sm:$0xff]  ;;  %v3376_v47 = vld [vmem:[#allocation20_spill] sm:$0xff]  ;;  %v3377_v48 = vld [vmem:[#allocation19_spill] sm:$0xff] }
 0x179   :  { %v3375_v32 = vpack.c.bf16 %v3373_v9, %v3374_v28  ;;  %v3378_v23 = vpack.c.bf16 %v3376_v47, %v3377_v48  ;;  %v3381_v42 = vpack.c.bf16 %v3379_v52, %v3380_v1  ;;  %v3382_v44 = vpack.c.bf16 %v3117_v10, %v3111_v19  ;;  %v3383_v43 = vld [vmem:[#allocation10_spill] sm:$0xff]  ;;  %v3387_v63 = vld [vmem:[#allocation8_spill] sm:$0xff]  ;;  %v3395_v10 = vld [vmem:[#allocation11_spill] sm:$0xff] }
 0x17a   :  { %2051 = vmatpush3.bf16.msra.mxu1 %v3353_v45  ;;  %v3385_v26 = vpack.c.bf16 %v3383_v43, %v3384_v37  ;;  %v3386_v4 = vpack.c.bf16 %v3106_v21, %v3100_v40  ;;  %v3389_v46 = vpack.c.bf16 %v3387_v63, %v3388_v57  ;;  %v3392_v53 = vpack.c.bf16 %v3390_v14, %v3391_v60  ;;  %v3394_v19 = vld [vmem:[#allocation12_spill] sm:$0xff]  ;;  %v3397_v40 = vld [vmem:[#allocation18_spill] sm:$0xff]  ;;  %v3398_v21 = vld [vmem:[#allocation17_spill] sm:$0xff] }
 0x17b   :  { %2053 = vmatprep.subr.bf16.mxu1 %v3354_v18  ;;  %v3393_v15 = vpack.c.bf16 %v3144_v6, %v3138_v59  ;;  %v3396_v56 = vpack.c.bf16 %v3394_v19, %v3395_v10  ;;  %v3399_v29 = vpack.c.bf16 %v3397_v40, %v3398_v21 }
 0x17d   :  { %884 = vmatmul.mubr.f32.vlgmr.msra.gmra.mrb[2].mxu1 %v3355_v25 }
 0x17e   :  { %2055 = vmatpush3.bf16.msra.mxu1 %v3356_v38  ;;  %1019 = vmatprep.mubr.f32.mxu1 %v3355_v25 }
 0x17f   :  { %2057 = vmatprep.subr.bf16.mxu1 %v3357_v27 }
 0x182   :  { %2059 = vmatpush3.bf16.msra.mxu1 %v3358_v36 }
 0x183   :  { %2061 = vmatprep.subr.bf16.mxu1 %v3359_v0 }
 0x186   :  { %2063 = vmatpush3.bf16.msra.mxu1 %v3360_v3 }
 0x187   :  { %2065 = vmatprep.subr.bf16.mxu1 %v3361_v34 }
 0x18a   :  { %2067 = vmatpush3.bf16.msra.mxu1 %v3362_v35 }
 0x18b   :  { %2069 = vmatprep.subr.bf16.mxu1 %v3363_v30 }
 0x18e   :  { %2071 = vmatpush3.bf16.msra.mxu1 %v3364_v31 }
 0x18f   :  { %2073 = vmatprep.subr.bf16.mxu1 %v3365_v54 }
 0x192   :  { %2075 = vmatpush3.bf16.msra.mxu1 %v3366_v55 }
 0x193   :  { %2077 = vmatprep.subr.bf16.mxu1 %v3367_v50 }
 0x196   :  { %2079 = vmatpush3.bf16.msra.mxu1 %v3368_v51 }
 0x197   :  { %2081 = vmatprep.subr.bf16.mxu1 %v3369_v12 }
 0x19a   :  { %2083 = vmatpush3.bf16.msra.mxu1 %v3371_v17 }
 0x19b   :  { %2085 = vmatprep.subr.bf16.mxu1 %v3372_v7 }
 0x19d   :  { %1020 = vmatmul.mubr.f32.vlgmr.msra.gmra.mrb[4].mxu1 %v3355_v25 }
 0x19e   :  { %2087 = vmatpush3.bf16.msra.mxu1 %v3375_v32  ;;  %1089 = vmatprep.mubr.f32.mxu1 %v3355_v25 }
 0x19f   :  { %2089 = vmatprep.subr.bf16.mxu1 %v3378_v23 }
 0x1a2   :  { %2091 = vmatpush3.bf16.msra.mxu1 %v3381_v42 }
 0x1a3   :  { %2093 = vmatprep.subr.bf16.mxu1 %v3382_v44 }
 0x1a6   :  { %2095 = vmatpush3.bf16.msra.mxu1 %v3385_v26 }
 0x1a7   :  { %2097 = vmatprep.subr.bf16.mxu1 %v3386_v4 }
 0x1aa   :  { %2099 = vmatpush3.bf16.msra.mxu1 %v3389_v46 }
 0x1ab   :  { %2101 = vmatprep.subr.bf16.mxu1 %v2100_v16  ;;  %v3401_v16 = vld [vmem:[#allocation15_spill] sm:$0xff] }
 0x1ac   :  { %v3402_v2 = vpack.c.bf16 %v3400_v41, %v3401_v16 }
 0x1ae   :  { %2103 = vmatpush3.bf16.msra.mxu1 %v3392_v53 }
 0x1af   :  { %2105 = vmatprep.subr.bf16.mxu1 %v3393_v15 }
 0x1b2   :  { %2107 = vmatpush3.bf16.msra.mxu1 %v3396_v56 }
 0x1b3   :  { %2109 = vmatprep.subr.bf16.mxu1 %v2108_v39 }
 0x1b6   :  { %2111 = vmatpush3.bf16.msra.mxu1 %v3399_v29 }
 0x1b7   :  { %2113 = vmatprep.subr.bf16.mxu1 %v2112_v62 }
 0x1ba   :  { %2115 = vmatpush3.bf16.msra.mxu1 %v3402_v2 }
 0x1bd   :  { %1090 = vmatmul.mubr.f32.vlgmr.msra.gmra.mrb[6].mxu1 %v3355_v25 }
 0x210   :  { %v1800_v20 = vpop.f32.mrb[0].mxu1 }
 0x211   :  { %v1801_v11 = vpop.f32.mrb[1].mxu1 }
 0x212   :  { %v1802_v59 = vadd.f32 %v1801_v11, %v1800_v20 }
 0x250   :  { %v1835_v6 = vpop.f32.mrb[2].mxu1 }
 0x251   :  { %v1836_v22 = vpop.f32.mrb[3].mxu1 }
 0x252   :  { %v1837_v58 = vadd.f32 %v1836_v22, %v1835_v6 }
 0x254   :  { %v886_v49 = vadd.f32 %v1837_v58, %v1802_v59 }
 0x256   :  { %890 = vst.msk [vmem:[%s3305_s6] sm:$0x1] %vm889_vm1, %v886_v49 }
 0x270   :  { %v1870_v8 = vpop.f32.mrb[4].mxu1 }
 0x271   :  { %v1871_v5 = vpop.f32.mrb[5].mxu1 }
 0x272   :  { %v1872_v24 = vadd.f32 %v1871_v5, %v1870_v8 }
 0x290   :  { %v1905_v61 = vpop.f32.mrb[6].mxu1 }
 0x291   :  { %v1906_v62 = vpop.f32.mrb[7].mxu1 }
 0x292   :  { %v1907_v39 = vadd.f32 %v1906_v62, %v1905_v61 }
 0x294   :  { %v1092_v33 = vadd.f32 %v1907_v39, %v1872_v24 }
 0x296   :  { %1096 = vrot.lane.b32.xlu0 %v1092_v33, %s2127_s13 }
 0x308   :  { %v1097_v45 = vpop.permute.xlu0 %1096 }
 0x309   :  { %1100 = vst.msk [vmem:[%s3305_s6] sm:$0x1] %vm1099_vm2, %v1097_v45 }

// kernel: bottleneck_apply.7
= control target key start
LH: loop header
LB: loop body
LE: loop exit
PB: predicated region body
PF: predicated region fallthrough
CT: control target
= control target key end

     0   :  { %v67_v0 = vlaneseq  ;;  %s746_s1 = inlined_call_operand.vmem [shape: bf16[32,1024], index: 1, kind: input, shape index: {}]   ;;  %s747_s2 = inlined_call_operand.vmem [shape: f32[1,1024], index: 2, kind: input, shape index: {}]   ;;  %s748_s3 = inlined_call_operand.vmem [shape: f32[1,1024], index: 3, kind: input, shape index: {}]   ;;  %s749_s0 = inlined_call_operand.vmem [shape: f32[32,1024], index: 0, kind: input, shape index: {}]   ;;  %s750_s4 = inlined_call_operand.vmem [shape: f32[32,1024], index: 4, kind: output, shape index: {}]  }
   0x1   :  { %v17_v1 = vld [vmem:[%s746_s1] sm:$0xff]  ;;  %v18_v3 = vld [vmem:[%s746_s1 + $0x8] sm:$0xff]  ;;  %v19_v10 = vld [vmem:[%s746_s1 + $0x10] sm:$0xff] }
   0x2   :  { %v373_v2 = vshrl.u32 %v67_v0, 7  ;;  %v33_v4 = vunpack.c.l.bf16 %v17_v1  ;;  %v381_v5 = vld [vmem:[%s747_s2] sm:$0xff]  ;;  %v34_v7 = vunpack.c.h.bf16 %v17_v1  ;;  %v35_v8 = vunpack.c.l.bf16 %v18_v3  ;;  %v424_v27 = vld [vmem:[%s746_s1 + $0x18] sm:$0xff]  ;;  %v214_v33 = vld [vmem:[%s749_s0 + $0x8] sm:$0xff] }
   0x3   :  { %v386_v6 = vld [vmem:[%s748_s3] sm:$0xff]  ;;  %v36_v9 = vunpack.c.h.bf16 %v18_v3  ;;  %v37_v15 = vunpack.c.l.bf16 %v19_v10  ;;  %v38_v17 = vunpack.c.h.bf16 %v19_v10  ;;  %v215_v40 = vld [vmem:[%s749_s0 + $0x10] sm:$0xff]  ;;  %v216_v41 = vld [vmem:[%s749_s0 + $0x18] sm:$0xff]  ;;  %v39_v43 = vunpack.c.l.bf16 %v424_v27 }
   0x4   :  { %v69_v11 = vsub.s32 0, %v373_v2  ;;  %v73_v12 = vsub.s32 1, %v373_v2  ;;  %v77_v13 = vsub.s32 2, %v373_v2  ;;  %v81_v14 = vsub.s32 3, %v373_v2  ;;  %v213_v32 = vld [vmem:[%s749_s0] sm:$0xff]  ;;  %v218_v52 = vld [vmem:[%s749_s0 + $0x28] sm:$0xff] }
   0x5   :  { %v85_v16 = vsub.s32 4, %v373_v2  ;;  %v89_v18 = vsub.s32 5, %v373_v2  ;;  %v217_v46 = vld [vmem:[%s749_s0 + $0x20] sm:$0xff]  ;;  %v93_v48 = vsub.s32 6, %v373_v2  ;;  %v40_v53 = vunpack.c.h.bf16 %v424_v27  ;;  %v22_v63 = vld [vmem:[%s746_s1 + $0x28] sm:$0xff] }
   0x6   :  { %v398_v19 = vrot.slane %v381_v5, %v69_v11  ;;  %v401_v20 = vrot.slane %v386_v6, %v69_v11  ;;  %v404_v21 = vrot.slane %v381_v5, %v73_v12  ;;  %v407_v22 = vrot.slane %v386_v6, %v73_v12  ;;  %v21_v58 = vld [vmem:[%s746_s1 + $0x20] sm:$0xff]  ;;  %v23_v12 = vld [vmem:[%s746_s1 + $0x30] sm:$0xff] }
   0x7   :  { %v410_v23 = vrot.slane %v381_v5, %v77_v13  ;;  %v413_v24 = vrot.slane %v386_v6, %v77_v13  ;;  %v416_v25 = vrot.slane %v381_v5, %v81_v14  ;;  %v419_v26 = vrot.slane %v386_v6, %v81_v14 }
   0x8   :  { %v107_v28 = vmul.f32 %v398_v19, %v33_v4  ;;  %v108_v29 = vmul.f32 %v404_v21, %v34_v7  ;;  %v429_v30 = vrot.slane %v381_v5, %v85_v16  ;;  %v432_v31 = vrot.slane %v386_v6, %v85_v16 }
   0x9   :  { %v109_v34 = vmul.f32 %v410_v23, %v35_v8  ;;  %v110_v35 = vmul.f32 %v416_v25, %v36_v9  ;;  %v443_v36 = vrot.slane %v381_v5, %v89_v18  ;;  %v446_v37 = vrot.slane %v386_v6, %v89_v18  ;;  %v219_v8 = vld [vmem:[%s749_s0 + $0x30] sm:$0xff] }
   0xa   :  { %v181_v38 = vadd.f32 %v401_v20, %v107_v28  ;;  %v182_v39 = vadd.f32 %v407_v22, %v108_v29  ;;  %v111_v42 = vmul.f32 %v429_v30, %v37_v15  ;;  %v472_v57 = vrot.slane %v381_v5, %v93_v48  ;;  %v221_v29 = vld [vmem:[%s749_s0 + $0x40] sm:$0xff] }
   0xb   :  { %v183_v44 = vadd.f32 %v413_v24, %v109_v34  ;;  %v184_v45 = vadd.f32 %v419_v26, %v110_v35  ;;  %v112_v47 = vmul.f32 %v443_v36, %v38_v17  ;;  %v478_v62 = vrot.slane %v386_v6, %v93_v48 }
   0xc   :  { %v245_v49 = vadd.f32 %v213_v32, %v181_v38  ;;  %v246_v50 = vadd.f32 %v214_v33, %v182_v39  ;;  %v185_v51 = vadd.f32 %v432_v31, %v111_v42  ;;  %v113_v4 = vmul.f32 %v472_v57, %v39_v43  ;;  %v223_v39 = vld [vmem:[%s749_s0 + $0x50] sm:$0xff]  ;;  %v24_v42 = vld [vmem:[%s746_s1 + $0x38] sm:$0xff] }
   0xd   :  { %v247_v54 = vadd.f32 %v215_v40, %v183_v44  ;;  %v248_v55 = vadd.f32 %v216_v41, %v184_v45  ;;  %v186_v56 = vadd.f32 %v446_v37, %v112_v47  ;;  %v97_v9 = vsub.s32 7, %v373_v2  ;;  %v224_v40 = vld [vmem:[%s749_s0 + $0x58] sm:$0xff] }
   0xe   :  { %v277_v59 = vmax.f32 %v245_v49, 0.0  ;;  %v278_v60 = vmax.f32 %v246_v50, 0.0  ;;  %v249_v61 = vadd.f32 %v217_v46, %v185_v51  ;;  %v41_v10 = vunpack.c.l.bf16 %v21_v58  ;;  %v220_v44 = vld [vmem:[%s749_s0 + $0x38] sm:$0xff]  ;;  %v225_v51 = vld [vmem:[%s749_s0 + $0x60] sm:$0xff] }
   0xf   :  { %v279_v0 = vmax.f32 %v247_v54, 0.0  ;;  %v280_v1 = vmax.f32 %v248_v55, 0.0  ;;  %v250_v3 = vadd.f32 %v218_v52, %v186_v56  ;;  %v42_v11 = vunpack.c.h.bf16 %v21_v58  ;;  %v226_v56 = vld [vmem:[%s749_s0 + $0x68] sm:$0xff] }
  0x10   :  { %309 = vst [vmem:[%s750_s4] sm:$0xff] %v277_v59  ;;  %310 = vst [vmem:[%s750_s4 + $0x8] sm:$0xff] %v278_v60  ;;  %v281_v7 = vmax.f32 %v249_v61, 0.0  ;;  %v187_v14 = vadd.f32 %v478_v62, %v113_v4  ;;  %v43_v15 = vunpack.c.l.bf16 %v22_v63  ;;  %v44_v16 = vunpack.c.h.bf16 %v22_v63  ;;  %v25_v59 = vld [vmem:[%s746_s1 + $0x40] sm:$0xff] }
  0x11   :  { %311 = vst [vmem:[%s750_s4 + $0x10] sm:$0xff] %v279_v0  ;;  %312 = vst [vmem:[%s750_s4 + $0x18] sm:$0xff] %v280_v1  ;;  %v282_v13 = vmax.f32 %v250_v3, 0.0  ;;  %v508_v2 = vrot.slane %v381_v5, %v97_v9  ;;  %v511_v17 = vrot.slane %v386_v6, %v97_v9  ;;  %v115_v18 = vmul.f32 %v398_v19, %v41_v10  ;;  %v222_v5 = vld [vmem:[%s749_s0 + $0x48] sm:$0xff] }
  0x12   :  { %313 = vst [vmem:[%s750_s4 + $0x20] sm:$0xff] %v281_v7  ;;  %v116_v27 = vmul.f32 %v404_v21, %v42_v11  ;;  %v251_v28 = vadd.f32 %v219_v8, %v187_v14  ;;  %v117_v6 = vmul.f32 %v410_v23, %v43_v15  ;;  %v118_v32 = vmul.f32 %v416_v25, %v44_v16  ;;  %v26_v1 = vld [vmem:[%s746_s1 + $0x48] sm:$0xff]  ;;  %v227_v11 = vld [vmem:[%s749_s0 + $0x70] sm:$0xff] }
  0x13   :  { %314 = vst [vmem:[%s750_s4 + $0x28] sm:$0xff] %v282_v13  ;;  %v45_v33 = vunpack.c.l.bf16 %v23_v12  ;;  %v114_v34 = vmul.f32 %v508_v2, %v40_v53  ;;  %v189_v35 = vadd.f32 %v401_v20, %v115_v18  ;;  %v46_v41 = vunpack.c.h.bf16 %v23_v12  ;;  %v27_v14 = vld [vmem:[%s746_s1 + $0x50] sm:$0xff] }
  0x14   :  { %v190_v38 = vadd.f32 %v407_v22, %v116_v27  ;;  %v283_v43 = vmax.f32 %v251_v28, 0.0  ;;  %v191_v45 = vadd.f32 %v413_v24, %v117_v6  ;;  %v192_v46 = vadd.f32 %v419_v26, %v118_v32 }
  0x15   :  { %v119_v47 = vmul.f32 %v429_v30, %v45_v33  ;;  %v188_v48 = vadd.f32 %v511_v17, %v114_v34  ;;  %v253_v49 = vadd.f32 %v221_v29, %v189_v35  ;;  %v120_v52 = vmul.f32 %v443_v36, %v46_v41  ;;  %v228_v33 = vld [vmem:[%s749_s0 + $0x78] sm:$0xff]  ;;  %v229_v34 = vld [vmem:[%s749_s0 + $0x80] sm:$0xff] }
  0x16   :  { %v254_v50 = vadd.f32 %v222_v5, %v190_v38  ;;  %315 = vst [vmem:[%s750_s4 + $0x30] sm:$0xff] %v283_v43  ;;  %v255_v53 = vadd.f32 %v223_v39, %v191_v45  ;;  %v256_v54 = vadd.f32 %v224_v40, %v192_v46  ;;  %v47_v58 = vunpack.c.l.bf16 %v24_v42  ;;  %v231_v43 = vld [vmem:[%s749_s0 + $0x90] sm:$0xff]  ;;  %v28_v46 = vld [vmem:[%s746_s1 + $0x58] sm:$0xff] }
  0x17   :  { %v193_v55 = vadd.f32 %v432_v31, %v119_v47  ;;  %v252_v60 = vadd.f32 %v220_v44, %v188_v48  ;;  %v285_v61 = vmax.f32 %v253_v49, 0.0  ;;  %v194_v0 = vadd.f32 %v446_v37, %v120_v52 }
  0x18   :  { %v286_v63 = vmax.f32 %v254_v50, 0.0  ;;  %v287_v3 = vmax.f32 %v255_v53, 0.0  ;;  %v288_v4 = vmax.f32 %v256_v54, 0.0  ;;  %v121_v8 = vmul.f32 %v472_v57, %v47_v58  ;;  %v232_v50 = vld [vmem:[%s749_s0 + $0x98] sm:$0xff] }
  0x19   :  { %v257_v7 = vadd.f32 %v225_v51, %v193_v55  ;;  %v284_v9 = vmax.f32 %v252_v60, 0.0  ;;  %317 = vst [vmem:[%s750_s4 + $0x40] sm:$0xff] %v285_v61  ;;  %v258_v10 = vadd.f32 %v226_v56, %v194_v0  ;;  %v48_v12 = vunpack.c.h.bf16 %v24_v42  ;;  %v230_v42 = vld [vmem:[%s749_s0 + $0x88] sm:$0xff]  ;;  %v233_v55 = vld [vmem:[%s749_s0 + $0xa0] sm:$0xff] }
  0x1a   :  { %318 = vst [vmem:[%s750_s4 + $0x48] sm:$0xff] %v286_v63  ;;  %v49_v13 = vunpack.c.l.bf16 %v25_v59  ;;  %319 = vst [vmem:[%s750_s4 + $0x50] sm:$0xff] %v287_v3  ;;  %v195_v16 = vadd.f32 %v478_v62, %v121_v8  ;;  %v50_v18 = vunpack.c.h.bf16 %v25_v59  ;;  %v51_v27 = vunpack.c.l.bf16 %v26_v1  ;;  %v234_v61 = vld [vmem:[%s749_s0 + $0xa8] sm:$0xff]  ;;  %v29_v0 = vld [vmem:[%s746_s1 + $0x60] sm:$0xff] }
  0x1b   :  { %320 = vst [vmem:[%s750_s4 + $0x58] sm:$0xff] %v288_v4  ;;  %v289_v15 = vmax.f32 %v257_v7, 0.0  ;;  %316 = vst [vmem:[%s750_s4 + $0x38] sm:$0xff] %v284_v9  ;;  %v290_v28 = vmax.f32 %v258_v10, 0.0  ;;  %v122_v29 = vmul.f32 %v508_v2, %v48_v12  ;;  %v52_v6 = vunpack.c.h.bf16 %v26_v1  ;;  %v30_v8 = vld [vmem:[%s746_s1 + $0x68] sm:$0xff] }
  0x1c   :  { %v123_v5 = vmul.f32 %v398_v19, %v49_v13  ;;  %v259_v32 = vadd.f32 %v227_v11, %v195_v16  ;;  %v124_v35 = vmul.f32 %v404_v21, %v50_v18  ;;  %v125_v38 = vmul.f32 %v410_v23, %v51_v27  ;;  %v31_v27 = vld [vmem:[%s746_s1 + $0x70] sm:$0xff] }
  0x1d   :  { %321 = vst [vmem:[%s750_s4 + $0x60] sm:$0xff] %v289_v15  ;;  %v53_v39 = vunpack.c.l.bf16 %v27_v14  ;;  %322 = vst [vmem:[%s750_s4 + $0x68] sm:$0xff] %v290_v28  ;;  %v196_v40 = vadd.f32 %v511_v17, %v122_v29  ;;  %v126_v44 = vmul.f32 %v416_v25, %v52_v6  ;;  %v54_v45 = vunpack.c.h.bf16 %v27_v14  ;;  %v235_v15 = vld [vmem:[%s749_s0 + $0xb0] sm:$0xff] }
  0x1e   :  { %v197_v41 = vadd.f32 %v401_v20, %v123_v5  ;;  %v291_v47 = vmax.f32 %v259_v32, 0.0  ;;  %v198_v48 = vadd.f32 %v407_v22, %v124_v35  ;;  %v199_v49 = vadd.f32 %v413_v24, %v125_v38 }
  0x1f   :  { %v127_v51 = vmul.f32 %v429_v30, %v53_v39  ;;  %v260_v52 = vadd.f32 %v228_v33, %v196_v40  ;;  %v200_v54 = vadd.f32 %v419_v26, %v126_v44  ;;  %v128_v56 = vmul.f32 %v443_v36, %v54_v45  ;;  %v236_v39 = vld [vmem:[%s749_s0 + $0xb8] sm:$0xff]  ;;  %v237_v40 = vld [vmem:[%s749_s0 + $0xc0] sm:$0xff]  ;;  %v238_v45 = vld [vmem:[%s749_s0 + $0xc8] sm:$0xff] }
  0x20   :  { %v261_v53 = vadd.f32 %v229_v34, %v197_v41  ;;  %323 = vst [vmem:[%s750_s4 + $0x70] sm:$0xff] %v291_v47  ;;  %v262_v58 = vadd.f32 %v230_v42, %v198_v48  ;;  %v263_v59 = vadd.f32 %v231_v43, %v199_v49  ;;  %v55_v63 = vunpack.c.l.bf16 %v28_v46  ;;  %v32_v47 = vld [vmem:[%s746_s1 + $0x78] sm:$0xff] }
  0x21   :  { %v201_v60 = vadd.f32 %v432_v31, %v127_v51  ;;  %v292_v1 = vmax.f32 %v260_v52, 0.0  ;;  %v264_v4 = vadd.f32 %v232_v50, %v200_v54  ;;  %v202_v7 = vadd.f32 %v446_v37, %v128_v56  ;;  %v240_v50 = vld [vmem:[%s749_s0 + $0xd8] sm:$0xff]  ;;  %v241_v54 = vld [vmem:[%s749_s0 + $0xe0] sm:$0xff] }
  0x22   :  { %v293_v3 = vmax.f32 %v261_v53, 0.0  ;;  %v294_v9 = vmax.f32 %v262_v58, 0.0  ;;  %v295_v10 = vmax.f32 %v263_v59, 0.0  ;;  %v129_v12 = vmul.f32 %v472_v57, %v55_v63 }
  0x23   :  { %v265_v11 = vadd.f32 %v233_v55, %v201_v60  ;;  %324 = vst [vmem:[%s750_s4 + $0x78] sm:$0xff] %v292_v1  ;;  %v296_v13 = vmax.f32 %v264_v4, 0.0  ;;  %v266_v14 = vadd.f32 %v234_v61, %v202_v7  ;;  %v56_v16 = vunpack.c.h.bf16 %v28_v46  ;;  %v239_v46 = vld [vmem:[%s749_s0 + $0xd0] sm:$0xff] }
  0x24   :  { %325 = vst [vmem:[%s750_s4 + $0x80] sm:$0xff] %v293_v3  ;;  %v57_v18 = vunpack.c.l.bf16 %v29_v0  ;;  %326 = vst [vmem:[%s750_s4 + $0x88] sm:$0xff] %v294_v9  ;;  %v203_v29 = vadd.f32 %v478_v62, %v129_v12  ;;  %v58_v5 = vunpack.c.h.bf16 %v29_v0  ;;  %v59_v6 = vunpack.c.l.bf16 %v30_v8  ;;  %v243_v4 = vld [vmem:[%s749_s0 + $0xf0] sm:$0xff] }
  0x25   :  { %327 = vst [vmem:[%s750_s4 + $0x90] sm:$0xff] %v295_v10  ;;  %v297_v28 = vmax.f32 %v265_v11, 0.0  ;;  %328 = vst [vmem:[%s750_s4 + $0x98] sm:$0xff] %v296_v13  ;;  %v298_v32 = vmax.f32 %v266_v14, 0.0  ;;  %v130_v33 = vmul.f32 %v508_v2, %v56_v16  ;;  %v60_v35 = vunpack.c.h.bf16 %v30_v8  ;;  %v244_v11 = vld [vmem:[%s749_s0 + $0xf8] sm:$0xff] }
  0x26   :  { %v131_v34 = vmul.f32 %v398_v19, %v57_v18  ;;  %v267_v38 = vadd.f32 %v235_v15, %v203_v29  ;;  %v132_v41 = vmul.f32 %v404_v21, %v58_v5  ;;  %v133_v42 = vmul.f32 %v410_v23, %v59_v6 }
  0x27   :  { %329 = vst [vmem:[%s750_s4 + $0xa0] sm:$0xff] %v297_v28  ;;  %v61_v43 = vunpack.c.l.bf16 %v31_v27  ;;  %330 = vst [vmem:[%s750_s4 + $0xa8] sm:$0xff] %v298_v32  ;;  %v204_v19 = vadd.f32 %v511_v17, %v130_v33  ;;  %v134_v21 = vmul.f32 %v416_v25, %v60_v35  ;;  %v62_v23 = vunpack.c.h.bf16 %v31_v27 }
  0x28   :  { %v205_v44 = vadd.f32 %v401_v20, %v131_v34  ;;  %v299_v48 = vmax.f32 %v267_v38, 0.0  ;;  %v206_v49 = vadd.f32 %v407_v22, %v132_v41  ;;  %v207_v20 = vadd.f32 %v413_v24, %v133_v42 }
  0x29   :  { %v135_v51 = vmul.f32 %v429_v30, %v61_v43  ;;  %v268_v52 = vadd.f32 %v236_v39, %v204_v19  ;;  %v208_v25 = vadd.f32 %v419_v26, %v134_v21  ;;  %v136_v55 = vmul.f32 %v443_v36, %v62_v23  ;;  %v242_v30 = vld [vmem:[%s749_s0 + $0xe8] sm:$0xff] }
  0x2a   :  { %v269_v53 = vadd.f32 %v237_v40, %v205_v44  ;;  %331 = vst [vmem:[%s750_s4 + $0xb0] sm:$0xff] %v299_v48  ;;  %v270_v22 = vadd.f32 %v238_v45, %v206_v49  ;;  %v271_v24 = vadd.f32 %v239_v46, %v207_v20  ;;  %v63_v58 = vunpack.c.l.bf16 %v32_v47 }
  0x2b   :  { %v209_v56 = vadd.f32 %v432_v31, %v135_v51  ;;  %v300_v26 = vmax.f32 %v268_v52, 0.0  ;;  %v272_v60 = vadd.f32 %v240_v50, %v208_v25  ;;  %v210_v61 = vadd.f32 %v446_v37, %v136_v55 }
  0x2c   :  { %v301_v59 = vmax.f32 %v269_v53, 0.0  ;;  %v302_v63 = vmax.f32 %v270_v22, 0.0  ;;  %v303_v36 = vmax.f32 %v271_v24, 0.0  ;;  %v137_v1 = vmul.f32 %v472_v57, %v63_v58 }
  0x2d   :  { %v273_v0 = vadd.f32 %v241_v54, %v209_v56  ;;  %332 = vst [vmem:[%s750_s4 + $0xb8] sm:$0xff] %v300_v26  ;;  %v304_v31 = vmax.f32 %v272_v60, 0.0  ;;  %v274_v3 = vadd.f32 %v242_v30, %v210_v61  ;;  %v64_v37 = vunpack.c.h.bf16 %v32_v47 }
  0x2e   :  { %333 = vst [vmem:[%s750_s4 + $0xc0] sm:$0xff] %v301_v59  ;;  %334 = vst [vmem:[%s750_s4 + $0xc8] sm:$0xff] %v302_v63  ;;  %v211_v7 = vadd.f32 %v478_v62, %v137_v1 }
  0x2f   :  { %335 = vst [vmem:[%s750_s4 + $0xd0] sm:$0xff] %v303_v36  ;;  %v305_v57 = vmax.f32 %v273_v0, 0.0  ;;  %336 = vst [vmem:[%s750_s4 + $0xd8] sm:$0xff] %v304_v31  ;;  %v306_v8 = vmax.f32 %v274_v3, 0.0  ;;  %v138_v9 = vmul.f32 %v508_v2, %v64_v37 }
  0x30   :  { %v275_v10 = vadd.f32 %v243_v4, %v211_v7 }
  0x31   :  { %337 = vst [vmem:[%s750_s4 + $0xe0] sm:$0xff] %v305_v57  ;;  %338 = vst [vmem:[%s750_s4 + $0xe8] sm:$0xff] %v306_v8  ;;  %v212_v62 = vadd.f32 %v511_v17, %v138_v9 }
  0x32   :  { %v307_v12 = vmax.f32 %v275_v10, 0.0 }
  0x33   :  { %v276_v13 = vadd.f32 %v244_v11, %v212_v62 }
  0x34   :  { %339 = vst [vmem:[%s750_s4 + $0xf0] sm:$0xff] %v307_v12 }
  0x35   :  { %v308_v2 = vmax.f32 %v276_v13, 0.0 }
  0x37   :  { %340 = vst [vmem:[%s750_s4 + $0xf8] sm:$0xff] %v308_v2 }

// kernel: bottleneck_apply.5
= control target key start
LH: loop header
LB: loop body
LE: loop exit
PB: predicated region body
PF: predicated region fallthrough
CT: control target
= control target key end

     0   :  { %s4872_s21 = smov 0   ;;  %s5841_s0 = inlined_call_operand.vmem [shape: bf16[2,16,16,128], index: 0, kind: input, shape index: {}]   ;;  %s5842_s1 = inlined_call_operand.vmem [shape: bf16[1152,128], index: 1, kind: input, shape index: {}]   ;;  %s5843_s2 = inlined_call_operand.vmem [shape: f32[1,128], index: 2, kind: input, shape index: {}]   ;;  %s5844_s3 = inlined_call_operand.vmem [shape: f32[1,128], index: 3, kind: input, shape index: {}]   ;;  %s5845_s4 = inlined_call_operand.vmem [shape: f32[1,128], index: 4, kind: input, shape index: {}]   ;;  %s5846_s5 = inlined_call_operand.vmem [shape: bf16[2,16,16,128], index: 5, kind: output, shape index: {0}]   ;;  %s5847_s6 = inlined_call_operand.vmem [shape: f32[2,1,256], index: 6, kind: output, shape index: {1}]  }
   0x1 LB: > { %s3380_s22 = sadd.s32 4294967295, %s4833_s21   ;;  %p3384_p0 = scmp.ge.s32.totalorder %s4833_s21, 1  ;;  %s4833_s21 = sphi %s4872_s21, %s17_s21  }
   0x2   : > { %p215_p1 = scmp.lt.s32.totalorder %s4833_s21, 3 }
   0x4   : > { %p216_p2 = pnand %p3384_p0, %p215_p1 }
   0x5   : > { %v4755_v0 = vld [vmem:[%s5842_s1 + $0x40] sm:$0xff] (!%p216_p2)   ;;  %v4835_v2 = vmov (!%p216_p2), 0   ;;  %v4757_v3 = vld [vmem:[%s5842_s1 + $0x48] sm:$0xff] (!%p216_p2)   ;;  %p249_p3 = scmp.lt.s32.totalorder (!%p216_p2), %s3380_s22, 1  ;;  %v4759_v5 = vld [vmem:[%s5842_s1 + $0x50] sm:$0xff] (!%p216_p2)   ;;  %vm649_vm0 = vcmask (!%p216_p2), 1047552  }
   0x6   : > { %219 = sbr.rel (%p216_p2) target bundleno = 828 (0x33c), region = 40  ;;  %v4756_v1 = vld [vmem:[%s5842_s1 + $0x100] sm:$0xff] (!%p216_p2)   ;;  %4009 = vmatprep.mubr.bf16.mxu1 (!%p216_p2), %v4835_v2  ;;  %3993 = vmatprep.subr.bf16.mxu1 (!%p216_p2), %v4755_v0  ;;  %v4758_v4 = vld [vmem:[%s5842_s1 + $0x108] sm:$0xff] (!%p216_p2)   ;;  %v4760_v6 = vld [vmem:[%s5842_s1 + $0x110] sm:$0xff] (!%p216_p2)   ;;  %vm650_vm1 = vsmask.f32 (!%p216_p2), 7424 }
   0x7   : > { %4185 = vmatprep.subr.bf16.mxu0 (!%p216_p2), %v4756_v1  ;;  %3994 = vmatpush3.bf16.msra.mxu1 (!%p216_p2), %v4755_v0  ;;  %v4761_v7 = vld [vmem:[%s5842_s1 + $0x58] sm:$0xff] (!%p216_p2)   ;;  %v4763_v9 = vld [vmem:[%s5842_s1 + $0x60] sm:$0xff] (!%p216_p2)   ;;  %v4765_v11 = vld [vmem:[%s5842_s1 + $0x68] sm:$0xff] (!%p216_p2)   ;;  %vm582_vm2 = vcmask (!%p216_p2), 1040384   ;;  %vm583_vm4 = vsmask.f32 (!%p216_p2), 256 }
   0x8   : > { %4186 = vmatpush3.bf16.msra.mxu0 (!%p216_p2), %v4756_v1  ;;  %3995 = vmatprep.subr.bf16.mxu1 (!%p216_p2), %v4757_v3  ;;  %v4762_v8 = vld [vmem:[%s5842_s1 + $0x118] sm:$0xff] (!%p216_p2)   ;;  %v4764_v10 = vld [vmem:[%s5842_s1 + $0x120] sm:$0xff] (!%p216_p2)   ;;  %v4766_v14 = vld [vmem:[%s5842_s1 + $0x128] sm:$0xff] (!%p216_p2)  }
   0x9   : > { %4187 = vmatprep.subr.bf16.mxu0 (!%p216_p2), %v4758_v4  ;;  %v4927_v12 = vld [vmem:[%s5844_s3] ss:$0 sm:$0xff] (!%p216_p2)  ;;  %v4767_v27 = vld [vmem:[%s5842_s1 + $0x70] sm:$0xff] (!%p216_p2)   ;;  %v4769_v42 = vld [vmem:[%s5842_s1 + $0x78] sm:$0xff] (!%p216_p2)  }
   0xa   : > { %v4938_v19 = vld [vmem:[%s5845_s4] ss:$0 sm:$0xff] (!%p216_p2)  ;;  %v4768_v31 = vld [vmem:[%s5842_s1 + $0x130] sm:$0xff] (!%p216_p2)   ;;  %v4770_v46 = vld [vmem:[%s5842_s1 + $0x138] sm:$0xff] (!%p216_p2)  }
   0xb   : > { %3996 = vmatpush3.bf16.msra.mxu1 (!%p216_p2), %v4757_v3  ;;  %v4772_v53 = vld [vmem:[%s5842_s1] sm:$0xff] (!%p216_p2)   ;;  %vm5153_vm3 = vmand (!%p216_p2), %vm649_vm0, %vm650_vm1 }
   0xc   : > { %4188 = vmatpush3.bf16.msra.mxu0 (!%p216_p2), %v4758_v4  ;;  %3997 = vmatprep.subr.bf16.mxu1 (!%p216_p2), %v4759_v5  ;;  %v4771_v60 = vld [vmem:[%s5842_s1 + $0x140] sm:$0xff] (!%p216_p2)   ;;  %vm5168_vm5 = vmand (!%p216_p2), %vm582_vm2, %vm583_vm4 }
   0xd   : > { %s5853_s22 = smov (!%p249_p3, %s3380_s22), 1  ;;  %4189 = vmatprep.subr.bf16.mxu0 %v4760_v6 }
   0xe   : > { %s3499_s15 = sshll.u32 %s5853_s22, 7 }
   0xf   : > { %3998 = vmatpush3.bf16.msra.mxu1 %v4759_v5  ;;  %s4919_s24 = scalar_lea.vmem %s5841_s0, %s3499_s15  ;;  %s5623_s9 = scalar_lea.vmem %s5846_s5, %s3499_s15 }
  0x10   : > { %4190 = vmatpush3.bf16.msra.mxu0 %v4760_v6  ;;  %3999 = vmatprep.subr.bf16.mxu1 %v4761_v7  ;;  %v3534_v13 = vld [vmem:[%s4919_s24] sm:$0xff]   ;;  %v3677_v17 = vld [vmem:[%s4919_s24 + $0x8] sm:$0xff]   ;;  %v3678_v18 = vld [vmem:[%s4919_s24 + $0x10] sm:$0xff]   ;;  %s3389_s15 = sshll.u32 %s5853_s22, 1 }
  0x11   : > { %4191 = vmatprep.subr.bf16.mxu0 %v4762_v8  ;;  %v3535_v15 = vunpack.c.l.bf16 %v3534_v13  ;;  %v3536_v16 = vunpack.c.h.bf16 %v3534_v13  ;;  %v3539_v20 = vunpack.c.l.bf16 %v3677_v17  ;;  %v3540_v21 = vunpack.c.h.bf16 %v3677_v17  ;;  %v3679_v26 = vld [vmem:[%s4919_s24 + $0x18] sm:$0xff]   ;;  %v3680_v35 = vld [vmem:[%s4919_s24 + $0x20] sm:$0xff]   ;;  %v3681_v51 = vld [vmem:[%s4919_s24 + $0x28] sm:$0xff]   ;;  %s262_s12 = scalar_lea.vmem %s5847_s6, %s3389_s15 }
  0x12   : > { %v3543_v22 = vunpack.c.l.bf16 %v3678_v18  ;;  %v3544_v23 = vunpack.c.h.bf16 %v3678_v18  ;;  %v3547_v36 = vunpack.c.l.bf16 %v3679_v26  ;;  %v3548_v37 = vunpack.c.h.bf16 %v3679_v26  ;;  %v3682_v52 = vld [vmem:[%s4919_s24 + $0x30] sm:$0xff]   ;;  %v3684_v17 = vld [vmem:[%s4919_s24 + $0x40] sm:$0xff]  }
  0x13   : > { %4000 = vmatpush3.bf16.msra.mxu1 %v4761_v7  ;;  %v336_v24 = vmul.f32 %v3535_v15, %v4927_v12  ;;  %v337_v25 = vmul.f32 %v3536_v16, %v4927_v12  ;;  %v338_v28 = vmul.f32 %v3539_v20, %v4927_v12  ;;  %v339_v29 = vmul.f32 %v3540_v21, %v4927_v12 }
  0x14   : > { %4192 = vmatpush3.bf16.msra.mxu0 %v4762_v8  ;;  %4001 = vmatprep.subr.bf16.mxu1 %v4763_v9  ;;  %v340_v30 = vmul.f32 %v3543_v22, %v4927_v12  ;;  %v341_v34 = vmul.f32 %v3544_v23, %v4927_v12  ;;  %v3551_v45 = vunpack.c.l.bf16 %v3680_v35  ;;  %v3552_v48 = vunpack.c.h.bf16 %v3680_v35  ;;  %v4774_v8 = vld [vmem:[%s5842_s1 + $0x148] sm:$0xff]   ;;  %v4776_v23 = vld [vmem:[%s5842_s1 + $0x150] sm:$0xff]  }
  0x15   : > { %4193 = vmatprep.subr.bf16.mxu0 %v4764_v10  ;;  %v374_v32 = vadd.f32 %v4938_v19, %v336_v24  ;;  %v375_v33 = vadd.f32 %v4938_v19, %v337_v25  ;;  %v376_v40 = vadd.f32 %v4938_v19, %v338_v28  ;;  %v377_v41 = vadd.f32 %v4938_v19, %v339_v29  ;;  %v4775_v25 = vld [vmem:[%s5842_s1 + $0x10] sm:$0xff]   ;;  %v3685_v35 = vld [vmem:[%s4919_s24 + $0x48] sm:$0xff]  }
  0x16   : > { %v378_v43 = vadd.f32 %v4938_v19, %v340_v30  ;;  %v379_v44 = vadd.f32 %v4938_v19, %v341_v34  ;;  %v342_v49 = vmul.f32 %v3547_v36, %v4927_v12  ;;  %v343_v50 = vmul.f32 %v3548_v37, %v4927_v12  ;;  %v3686_v36 = vld [vmem:[%s4919_s24 + $0x50] sm:$0xff]   ;;  %v4778_v37 = vld [vmem:[%s5842_s1 + $0x158] sm:$0xff]  }
  0x17   : > { %4002 = vmatpush3.bf16.msra.mxu1 %v4763_v9  ;;  %v406_v38 = vmax.f32 %v374_v32, 0.0  ;;  %v407_v39 = vmax.f32 %v375_v33, 0.0  ;;  %v408_v54 = vmax.f32 %v376_v40, 0.0  ;;  %v409_v55 = vmax.f32 %v377_v41, 0.0 }
  0x18   : > { %4194 = vmatpush3.bf16.msra.mxu0 %v4764_v10  ;;  %4003 = vmatprep.subr.bf16.mxu1 %v4765_v11  ;;  %v410_v56 = vmax.f32 %v378_v43, 0.0  ;;  %v411_v57 = vmax.f32 %v379_v44, 0.0  ;;  %v344_v58 = vmul.f32 %v3551_v45, %v4927_v12  ;;  %v345_v59 = vmul.f32 %v3552_v48, %v4927_v12  ;;  %v3683_v10 = vld [vmem:[%s4919_s24 + $0x38] sm:$0xff]   ;;  %v4780_v43 = vld [vmem:[%s5842_s1 + $0x160] sm:$0xff]  }
  0x19   : > { %4195 = vmatprep.subr.bf16.mxu0 %v4766_v14  ;;  %v4966_v47 = vpack.c.bf16 %v407_v39, %v406_v38  ;;  %v380_v61 = vadd.f32 %v4938_v19, %v342_v49  ;;  %v381_v62 = vadd.f32 %v4938_v19, %v343_v50  ;;  %v4983_v63 = vpack.c.bf16 %v409_v55, %v408_v54  ;;  %v4777_v39 = vld [vmem:[%s5842_s1 + $0x18] sm:$0xff]   ;;  %v4779_v54 = vld [vmem:[%s5842_s1 + $0x20] sm:$0xff]  }
  0x1a   : > { %v3555_v0 = vunpack.c.l.bf16 %v3681_v51  ;;  %v3556_v1 = vunpack.c.h.bf16 %v3681_v51  ;;  %v3559_v3 = vunpack.c.l.bf16 %v3682_v52  ;;  %v4985_v4 = vpack.c.bf16 %v411_v57, %v410_v56  ;;  %v3691_v48 = vld [vmem:[%s4919_s24 + $0x78] sm:$0xff]  }
  0x1b   : > { %4004 = vmatpush3.bf16.msra.mxu1 %v4765_v11  ;;  %4201 = vmatprep.mubr.bf16.mxu0 %v4966_v47  ;;  %v382_v5 = vadd.f32 %v4938_v19, %v344_v58  ;;  %v383_v6 = vadd.f32 %v4938_v19, %v345_v59  ;;  %v3560_v7 = vunpack.c.h.bf16 %v3682_v52  ;;  %v412_v9 = vmax.f32 %v380_v61, 0.0  ;;  %v4773_v11 = vld [vmem:[%s5842_s1 + $0x8] sm:$0xff]  }
  0x1c   : > { %4196 = vmatpush3.bf16.msra.mxu0 %v4766_v14  ;;  %4005 = vmatprep.subr.bf16.mxu1 %v4767_v27  ;;  %v413_v13 = vmax.f32 %v381_v62, 0.0  ;;  %v346_v14 = vmul.f32 %v3555_v0, %v4927_v12  ;;  %v347_v15 = vmul.f32 %v3556_v1, %v4927_v12  ;;  %v348_v16 = vmul.f32 %v3559_v3, %v4927_v12  ;;  %v4782_v62 = vld [vmem:[%s5842_s1 + $0x168] sm:$0xff]  }
  0x1d   : > { %4197 = vmatprep.subr.bf16.mxu0 %v4768_v31  ;;  %v414_v18 = vmax.f32 %v382_v5, 0.0  ;;  %v415_v20 = vmax.f32 %v383_v6, 0.0  ;;  %v349_v21 = vmul.f32 %v3560_v7, %v4927_v12  ;;  %v3563_v22 = vunpack.c.l.bf16 %v3683_v10 }
  0x1e   : > { %v3564_v24 = vunpack.c.h.bf16 %v3683_v10  ;;  %v5011_v26 = vpack.c.bf16 %v413_v13, %v412_v9  ;;  %v385_v28 = vadd.f32 %v4938_v19, %v347_v15  ;;  %v386_v29 = vadd.f32 %v4938_v19, %v348_v16  ;;  %v3687_v10 = vld [vmem:[%s4919_s24 + $0x58] sm:$0xff]   ;;  %v3688_v16 = vld [vmem:[%s4919_s24 + $0x60] sm:$0xff]  }
  0x1f   : > { %4006 = vmatpush3.bf16.msra.mxu1 %v4767_v27  ;;  %v384_v27 = vadd.f32 %v4938_v19, %v346_v14  ;;  %v5016_v30 = vpack.c.bf16 %v415_v20, %v414_v18  ;;  %v3567_v32 = vunpack.c.l.bf16 %v3684_v17  ;;  %v3568_v33 = vunpack.c.h.bf16 %v3684_v17  ;;  %v4784_v20 = vld [vmem:[%s5842_s1 + $0x170] sm:$0xff]  }
  0x20   : > { %4198 = vmatpush3.bf16.msra.mxu0 %v4768_v31  ;;  %4007 = vmatprep.subr.bf16.mxu1 %v4769_v42  ;;  %v387_v31 = vadd.f32 %v4938_v19, %v349_v21  ;;  %v350_v34 = vmul.f32 %v3563_v22, %v4927_v12  ;;  %v351_v38 = vmul.f32 %v3564_v24, %v4927_v12  ;;  %v417_v41 = vmax.f32 %v385_v28, 0.0 }
  0x21   : > { %4199 = vmatprep.subr.bf16.mxu0 %v4770_v46  ;;  %v416_v40 = vmax.f32 %v384_v27, 0.0  ;;  %v352_v45 = vmul.f32 %v3567_v32, %v4927_v12  ;;  %v3571_v51 = vunpack.c.l.bf16 %v3685_v35  ;;  %v3572_v52 = vunpack.c.h.bf16 %v3685_v35 }
  0x22   : > { %v419_v44 = vmax.f32 %v387_v31, 0.0  ;;  %v388_v49 = vadd.f32 %v4938_v19, %v350_v34  ;;  %v389_v50 = vadd.f32 %v4938_v19, %v351_v38  ;;  %v3576_v56 = vunpack.c.h.bf16 %v3686_v36 }
  0x23   : > { %4008 = vmatpush3.bf16.msra.mxu1 %v4769_v42  ;;  %v418_v42 = vmax.f32 %v386_v29, 0.0  ;;  %v5044_v55 = vpack.c.bf16 %v417_v41, %v416_v40  ;;  %v3595_v57 = vunpack.c.l.bf16 %v3691_v48  ;;  %v390_v59 = vadd.f32 %v4938_v19, %v352_v45  ;;  %v4785_v40 = vld [vmem:[%s5842_s1 + $0x38] sm:$0xff]  }
  0x24   : > { %4200 = vmatpush3.bf16.msra.mxu0 %v4770_v46  ;;  %4041 = vmatprep.subr.bf16.mxu1 %v4772_v53  ;;  %v353_v46 = vmul.f32 %v3568_v33, %v4927_v12  ;;  %v420_v61 = vmax.f32 %v388_v49, 0.0  ;;  %v3596_v0 = vunpack.c.h.bf16 %v3691_v48  ;;  %v421_v3 = vmax.f32 %v389_v50, 0.0  ;;  %v3690_v48 = vld [vmem:[%s4919_s24 + $0x70] sm:$0xff]   ;;  %v5105_v49 = vld [vmem:[%s5842_s1 + $0x180] sm:$0xff]  }
  0x25   : > { %4233 = vmatprep.subr.bf16.mxu0 %v4771_v60  ;;  %v5046_v58 = vpack.c.bf16 %v419_v44, %v418_v42  ;;  %v366_v1 = vmul.f32 %v3595_v57, %v4927_v12  ;;  %v354_v5 = vmul.f32 %v3571_v51, %v4927_v12  ;;  %v355_v6 = vmul.f32 %v3572_v52, %v4927_v12  ;;  %v5113_v52 = vld [vmem:[%s5842_s1 + $0x80] sm:$0xff]  }
  0x26   : > { %4010 = vmatmul.mubr.bf16.vlgmr.msra.gmra.mrb[0].mxu1 %v4966_v47  ;;  %v357_v9 = vmul.f32 %v3576_v56, %v4927_v12  ;;  %v422_v14 = vmax.f32 %v390_v59, 0.0  ;;  %v5073_v21 = vpack.c.bf16 %v421_v3, %v420_v61  ;;  %v3579_v24 = vunpack.c.l.bf16 %v3687_v10 }
  0x27   : > { %4202 = vmatmul.mubr.bf16.vlgmr.msra.gmra.mrb[0].mxu0 %v4983_v63  ;;  %4013 = vmatprep.mubr.bf16.mxu1 %v4983_v63  ;;  %v404_v13 = vadd.f32 %v4938_v19, %v366_v1  ;;  %v392_v22 = vadd.f32 %v4938_v19, %v354_v5  ;;  %v3580_v29 = vunpack.c.h.bf16 %v3687_v10  ;;  %v3583_v33 = vunpack.c.l.bf16 %v3688_v16 }
  0x28   : > { %4205 = vmatprep.mubr.bf16.mxu0 %v4985_v4  ;;  %4234 = vmatpush3.bf16.msra.mxu0 %v4771_v60  ;;  %v391_v60 = vadd.f32 %v4938_v19, %v353_v46  ;;  %v395_v28 = vadd.f32 %v4938_v19, %v357_v9  ;;  %v3584_v34 = vunpack.c.h.bf16 %v3688_v16  ;;  %v3689_v46 = vld [vmem:[%s4919_s24 + $0x68] sm:$0xff]   ;;  %v3591_v61 = vunpack.c.l.bf16 %v3690_v48 }
  0x29   : > { %4042 = vmatpush3.bf16.msra.mxu1 %v4772_v53  ;;  %4235 = vmatprep.subr.bf16.mxu0 %v4774_v8  ;;  %v3575_v53 = vunpack.c.l.bf16 %v3686_v36  ;;  %v436_v18 = vmax.f32 %v404_v13, 0.0  ;;  %v4786_v36 = vld [vmem:[%s5842_s1 + $0x178] sm:$0xff]   ;;  %v360_v44 = vmul.f32 %v3583_v33, %v4927_v12  ;;  %v3587_v56 = vunpack.c.l.bf16 %v3689_v46 }
  0x2a   : > { %4043 = vmatprep.subr.bf16.mxu1 %v4773_v11  ;;  %v423_v15 = vmax.f32 %v391_v60, 0.0  ;;  %v427_v42 = vmax.f32 %v395_v28, 0.0  ;;  %v361_v45 = vmul.f32 %v3584_v34, %v4927_v12  ;;  %v3588_v57 = vunpack.c.h.bf16 %v3689_v46 }
  0x2b   : > { %v356_v7 = vmul.f32 %v3575_v53, %v4927_v12  ;;  %v398_v59 = vadd.f32 %v4938_v19, %v360_v44  ;;  %v362_v3 = vmul.f32 %v3587_v56, %v4927_v12  ;;  %v465_v28 = vshll.u32 %v4983_v63, 16 }
  0x2c   : > { %4236 = vmatpush3.bf16.msra.mxu0 %v4774_v8  ;;  %v4781_v8 = vld [vmem:[%s5842_s1 + $0x28] sm:$0xff]   ;;  %v5082_v32 = vpack.c.bf16 %v423_v15, %v422_v14  ;;  %v399_v60 = vadd.f32 %v4938_v19, %v361_v45  ;;  %v363_v5 = vmul.f32 %v3588_v57, %v4927_v12  ;;  %v472_v33 = vshll.u32 %v4985_v4, 16 }
  0x2d   : > { %4044 = vmatpush3.bf16.msra.mxu1 %v4773_v11  ;;  %4237 = vmatprep.subr.bf16.mxu0 %v4776_v23  ;;  %v367_v11 = vmul.f32 %v3596_v0, %v4927_v12  ;;  %v394_v27 = vadd.f32 %v4938_v19, %v356_v7  ;;  %v603_v34 = vrot.slane %v465_v28, 1 }
  0x2e   : > { %4014 = vmatmul.mubr.bf16.gmra.mrb[4].mxu1 %v4985_v4  ;;  %4045 = vmatprep.subr.bf16.mxu1 %v4775_v25  ;;  %v431_v7 = vmax.f32 %v399_v60, 0.0  ;;  %v401_v13 = vadd.f32 %v4938_v19, %v363_v5 }
  0x2f   : > { %4206 = vmatmul.mubr.bf16.gmra.mrb[4].mxu0 %v5011_v26  ;;  %4017 = vmatprep.mubr.bf16.mxu1 %v5011_v26  ;;  %v405_v17 = vadd.f32 %v4938_v19, %v367_v11  ;;  %v426_v41 = vmax.f32 %v394_v27, 0.0  ;;  %v400_v11 = vadd.f32 %v4938_v19, %v362_v3  ;;  %v4789_v3 = vld [vmem:[%s5842_s1 + $0x88] sm:$0xff]  }
  0x30   : > { %4209 = vmatprep.mubr.bf16.mxu0 %v5016_v30  ;;  %4238 = vmatpush3.bf16.msra.mxu0 %v4776_v23  ;;  %v393_v23 = vadd.f32 %v4938_v19, %v355_v6  ;;  %v430_v6 = vmax.f32 %v398_v59, 0.0 }
  0x31   : > { %4046 = vmatpush3.bf16.msra.mxu1 %v4775_v25  ;;  %4239 = vmatprep.subr.bf16.mxu0 %v4778_v37  ;;  %v4783_v25 = vld [vmem:[%s5842_s1 + $0x30] sm:$0xff]   ;;  %v437_v31 = vmax.f32 %v405_v17, 0.0  ;;  %v5115_v53 = vpack.c.bf16 %v427_v42, %v426_v41  ;;  %v432_v17 = vmax.f32 %v400_v11, 0.0  ;;  %v479_v42 = vshll.u32 %v5011_v26, 16  ;;  %v4820_v41 = vld [vmem:[%s5842_s1 + $0x208] sm:$0xff]  }
  0x32   : > { %4047 = vmatprep.subr.bf16.mxu1 %v4777_v39  ;;  %v425_v38 = vmax.f32 %v393_v23, 0.0  ;;  %v5134_v14 = vpack.c.bf16 %v431_v7, %v430_v6  ;;  %v500_v11 = vshll.u32 %v5046_v58, 16 }
  0x33   : > { %v5084_v35 = vpack.c.bf16 %v437_v31, %v436_v18  ;;  %v607_v59 = vrot.slane %v479_v42, 1  ;;  %v4805_v31 = vld [vmem:[%s5842_s1 + $0xc8] sm:$0xff]  }
  0x34   : > { %4240 = vmatpush3.bf16.msra.mxu0 %v4778_v37  ;;  %v424_v37 = vmax.f32 %v392_v22, 0.0  ;;  %v458_v22 = vshll.u32 %v4966_v47, 16 }
  0x35   : > { %4048 = vmatpush3.bf16.msra.mxu1 %v4777_v39  ;;  %4241 = vmatprep.subr.bf16.mxu0 %v4780_v43  ;;  %v358_v39 = vmul.f32 %v3579_v24, %v4927_v12 }
  0x36   : > { %4018 = vmatmul.mubr.bf16.gmra.mrb[8].mxu1 %v5016_v30  ;;  %4049 = vmatprep.subr.bf16.mxu1 %v4779_v54  ;;  %v5107_v50 = vpack.c.bf16 %v425_v38, %v424_v37  ;;  %v469_v38 = vshrl.u32 %v4985_v4, 16 }
  0x37   : > { %4210 = vmatmul.mubr.bf16.gmra.mrb[8].mxu0 %v5044_v55  ;;  %4021 = vmatprep.mubr.bf16.mxu1 %v5044_v55  ;;  %v396_v51 = vadd.f32 %v4938_v19, %v358_v39  ;;  %v605_v39 = vrot.slane %v472_v33, 1 }
  0x38   : > { %4213 = vmatprep.mubr.bf16.mxu0 %v5046_v58  ;;  %4242 = vmatpush3.bf16.msra.mxu0 %v4780_v43  ;;  %v359_v43 = vmul.f32 %v3580_v29, %v4927_v12 }
  0x39   : > { %4050 = vmatpush3.bf16.msra.mxu1 %v4779_v54  ;;  %4243 = vmatprep.subr.bf16.mxu0 %v4782_v62  ;;  %v428_v0 = vmax.f32 %v396_v51, 0.0  ;;  %v606_v46 = vor.u32 %v605_v39, %v469_v38  ;;  %v4796_v39 = vld [vmem:[%s5842_s1 + $0x1a0] sm:$0xff]  }
  0x3a   : > { %4051 = vmatprep.subr.bf16.mxu1 %v4781_v8  ;;  %v397_v54 = vadd.f32 %v4938_v19, %v359_v43  ;;  %v486_v43 = vshll.u32 %v5016_v30, 16 }
  0x3c   : > { %4244 = vmatpush3.bf16.msra.mxu0 %v4782_v62  ;;  %v3592_v62 = vunpack.c.h.bf16 %v3690_v48  ;;  %v429_v1 = vmax.f32 %v397_v54, 0.0  ;;  %v476_v48 = vshrl.u32 %v5011_v26, 16  ;;  %v471_v54 = vrot.slane %v469_v38, 7 }
  0x3d   : > { %4052 = vmatpush3.bf16.msra.mxu1 %v4781_v8  ;;  %4245 = vmatprep.subr.bf16.mxu0 %v4784_v20  ;;  %v364_v8 = vmul.f32 %v3591_v61, %v4927_v12  ;;  %v5190_v61 = vsel %vm5153_vm3, %v606_v46, 0  ;;  %v514_v38 = vshll.u32 %v5082_v32, 16 }
  0x3e   : > { %4022 = vmatmul.mubr.bf16.gmra.mrb[12].mxu1 %v5046_v58  ;;  %4053 = vmatprep.subr.bf16.mxu1 %v4783_v25  ;;  %v365_v9 = vmul.f32 %v3592_v62, %v4927_v12  ;;  %v5130_v10 = vpack.c.bf16 %v429_v1, %v428_v0  ;;  %v433_v12 = vmax.f32 %v401_v13, 0.0  ;;  %v478_v60 = vrot.slane %v476_v48, 7  ;;  %v4790_v1 = vld [vmem:[%s5842_s1 + $0x188] sm:$0xff]   ;;  %v4792_v13 = vld [vmem:[%s5842_s1 + $0x190] sm:$0xff]  }
  0x3f   : > { %4214 = vmatmul.mubr.bf16.gmra.mrb[12].mxu0 %v5073_v21  ;;  %4025 = vmatprep.mubr.bf16.mxu1 %v5073_v21  ;;  %v402_v15 = vadd.f32 %v4938_v19, %v364_v8  ;;  %v483_v62 = vshrl.u32 %v5016_v30, 16  ;;  %v609_v0 = vrot.slane %v486_v43, 1  ;;  %v474_v5 = vor.u32 %v472_v33, %v471_v54 }
  0x40   : > { %4217 = vmatprep.mubr.bf16.mxu0 %v5082_v32  ;;  %4246 = vmatpush3.bf16.msra.mxu0 %v4784_v20  ;;  %v403_v16 = vadd.f32 %v4938_v19, %v365_v9  ;;  %v5143_v23 = vpack.c.bf16 %v433_v12, %v432_v17  ;;  %v455_v19 = vshrl.u32 %v4966_v47, 16  ;;  %v462_v47 = vshrl.u32 %v4983_v63, 16 }
  0x41   : > { %4054 = vmatpush3.bf16.msra.mxu1 %v4783_v25  ;;  %4247 = vmatprep.subr.bf16.mxu0 %v4786_v36  ;;  %v434_v18 = vmax.f32 %v402_v15, 0.0  ;;  %v601_v25 = vrot.slane %v458_v22, 1  ;;  %v608_v6 = vor.u32 %v607_v59, %v476_v48  ;;  %v481_v7 = vor.u32 %v479_v42, %v478_v60  ;;  %v4795_v42 = vld [vmem:[%s5842_s1 + $0xa0] sm:$0xff]  }
  0x42   : > { %4055 = vmatprep.subr.bf16.mxu1 %v4785_v40  ;;  %v435_v20 = vmax.f32 %v403_v16, 0.0  ;;  %v457_v27 = vrot.slane %v455_v19, 7  ;;  %v604_v44 = vor.u32 %v603_v34, %v462_v47  ;;  %v493_v8 = vshll.u32 %v5044_v55, 16  ;;  %v4791_v16 = vld [vmem:[%s5842_s1 + $0x90] sm:$0xff]  }
  0x43   : > { %v602_v29 = vor.u32 %v601_v25, %v455_v19  ;;  %v610_v9 = vor.u32 %v609_v0, %v483_v62  ;;  %v490_v15 = vshrl.u32 %v5044_v55, 16  ;;  %v485_v17 = vrot.slane %v483_v62, 7  ;;  %v4798_v0 = vld [vmem:[%s5842_s1 + $0x1a8] sm:$0xff]  }
  0x44   : > { %4248 = vmatpush3.bf16.msra.mxu0 %v4786_v36  ;;  %v5145_v24 = vpack.c.bf16 %v435_v20, %v434_v18  ;;  %v464_v36 = vrot.slane %v462_v47, 7  ;;  %v5182_v56 = vsel %vm5153_vm3, %v604_v44, 0  ;;  %v5224_v12 = vsel %vm5168_vm5, 0, %v481_v7 }
  0x45   : > { %4056 = vmatpush3.bf16.msra.mxu1 %v4785_v40  ;;  %4281 = vmatprep.subr.bf16.mxu0 %v5105_v49  ;;  %v5161_v37 = vsel %vm5153_vm3, %v602_v29, 0  ;;  %v460_v40 = vor.u32 %v458_v22, %v457_v27  ;;  %v611_v18 = vrot.slane %v493_v8, 1  ;;  %v492_v20 = vrot.slane %v490_v15, 7  ;;  %v4794_v27 = vld [vmem:[%s5842_s1 + $0x198] sm:$0xff]  }
  0x46   : > { %4026 = vmatmul.mubr.bf16.gmra.mrb[16].mxu1 %v5082_v32  ;;  %4089 = vmatprep.subr.bf16.mxu1 %v5113_v52  ;;  %v467_v45 = vor.u32 %v465_v28, %v464_v36  ;;  %v5228_v22 = vsel %vm5153_vm3, %v610_v9, 0  ;;  %v497_v19 = vshrl.u32 %v5046_v58, 16  ;;  %v613_v25 = vrot.slane %v500_v11, 1  ;;  %v4793_v28 = vld [vmem:[%s5842_s1 + $0x98] sm:$0xff]  }
  0x47   : > { %4218 = vmatmul.mubr.bf16.gmra.mrb[16].mxu0 %v5107_v50  ;;  %4029 = vmatprep.mubr.bf16.mxu1 %v5107_v50  ;;  %v5178_v51 = vsel %vm5168_vm5, 0, %v460_v40  ;;  %v488_v29 = vor.u32 %v486_v43, %v485_v17  ;;  %v612_v47 = vor.u32 %v611_v18, %v490_v15  ;;  %v495_v33 = vor.u32 %v493_v8, %v492_v20 }
  0x48   : > { %4221 = vmatprep.mubr.bf16.mxu0 %v5115_v53  ;;  %v5186_v57 = vsel %vm5168_vm5, 0, %v467_v45  ;;  %v507_v34 = vshll.u32 %v5073_v21, 16  ;;  %v614_v36 = vor.u32 %v613_v25, %v497_v19  ;;  %v504_v40 = vshrl.u32 %v5073_v21, 16 }
  0x49   : > { %v5252_v43 = vsel %vm5168_vm5, 0, %v488_v29  ;;  %v499_v44 = vrot.slane %v497_v19, 7  ;;  %v5256_v45 = vsel %vm5153_vm3, %v612_v47, 0  ;;  %v5260_v46 = vsel %vm5168_vm5, 0, %v495_v33  ;;  %v4802_v47 = vld [vmem:[%s5842_s1 + $0x1b8] sm:$0xff]  }
  0x4a   : > { %v615_v48 = vrot.slane %v507_v34, 1  ;;  %v506_v54 = vrot.slane %v504_v40, 7  ;;  %v5264_v59 = vsel %vm5153_vm3, %v614_v36, 0  ;;  %v511_v60 = vshrl.u32 %v5082_v32, 16  ;;  %v4801_v33 = vld [vmem:[%s5842_s1 + $0xb8] sm:$0xff]  }
  0x4b   : > { %v617_v62 = vrot.slane %v514_v38, 1  ;;  %v521_v7 = vshll.u32 %v5107_v50, 16  ;;  %v528_v9 = vshll.u32 %v5115_v53, 16  ;;  %v518_v15 = vshrl.u32 %v5107_v50, 16 }
  0x4c   : > { %v513_v17 = vrot.slane %v511_v60, 7 }
  0x4d   : > { %v618_v8 = vor.u32 %v617_v62, %v511_v60  ;;  %v619_v19 = vrot.slane %v521_v7, 1  ;;  %v520_v25 = vrot.slane %v518_v15, 7  ;;  %v621_v29 = vrot.slane %v528_v9, 1 }
  0x4e   : > { %4030 = vmatmul.mubr.bf16.gmra.mrb[20].mxu1 %v5115_v53 }
  0x4f   : > { %4222 = vmatmul.mubr.bf16.gmra.mrb[20].mxu0 %v5130_v10  ;;  %4033 = vmatprep.mubr.bf16.mxu1 %v5130_v10  ;;  %v620_v36 = vor.u32 %v619_v19, %v518_v15 }
  0x50   : > { %4225 = vmatprep.mubr.bf16.mxu0 %v5134_v14 }
  0x56   : > { %4034 = vmatmul.mubr.bf16.gmra.mrb[24].mxu1 %v5134_v14 }
  0x57   : > { %4226 = vmatmul.mubr.bf16.gmra.mrb[24].mxu0 %v5143_v23  ;;  %4037 = vmatprep.mubr.bf16.mxu1 %v5143_v23 }
  0x58   : > { %4229 = vmatprep.mubr.bf16.mxu0 %v5145_v24 }
  0x5e   : > { %4038 = vmatmul.mubr.bf16.gmra.mrb[28].mxu1 %v5145_v24 }
  0x5f   : > { %4230 = vmatmul.mubr.bf16.gmra.mrb[28].mxu0 %v5084_v35  ;;  %4057 = vmatprep.mubr.bf16.mxu1 %v4835_v2 }
  0x60   : > { %4249 = vmatprep.mubr.bf16.mxu0 %v5161_v37 }
  0x66   : > { %4058 = vmatmul.mubr.bf16.vlgmr.msra.gmra.mrb[0].mxu1 %v5178_v51 }
  0x67   : > { %4250 = vmatmul.mubr.bf16.vlgmr.msra.gmra.mrb[0].mxu0 %v5182_v56  ;;  %4061 = vmatprep.mubr.bf16.mxu1 %v5186_v57 }
  0x68   : > { %4253 = vmatprep.mubr.bf16.mxu0 %v5190_v61  ;;  %4282 = vmatpush3.bf16.msra.mxu0 %v5105_v49  ;;  %v5216_v49 = vsel %vm5168_vm5, 0, %v474_v5  ;;  %v616_v5 = vor.u32 %v615_v48, %v504_v40  ;;  %v535_v40 = vshll.u32 %v5130_v10, 16  ;;  %v5318_v48 = vld [vmem:[%s5842_s1 + $0x1c0] sm:$0xff]  }
  0x69   : > { %4090 = vmatpush3.bf16.msra.mxu1 %v5113_v52  ;;  %4283 = vmatprep.subr.bf16.mxu0 %v4790_v1  ;;  %v5220_v52 = vsel %vm5153_vm3, %v608_v6, 0  ;;  %v509_v6 = vor.u32 %v507_v34, %v506_v54  ;;  %v516_v34 = vor.u32 %v514_v38, %v513_v17  ;;  %v532_v54 = vshrl.u32 %v5130_v10, 16  ;;  %v5324_v38 = vld [vmem:[%s5842_s1 + $0xc0] sm:$0xff]  }
  0x6a   : > { %4091 = vmatprep.subr.bf16.mxu1 %v4789_v3  ;;  %v5292_v18 = vsel %vm5153_vm3, %v616_v5, 0  ;;  %v549_v17 = vshll.u32 %v5143_v23, 16 }
  0x6b   : > { %v5296_v20 = vsel %vm5168_vm5, 0, %v509_v6  ;;  %v5328_v60 = vsel %vm5168_vm5, 0, %v516_v34  ;;  %v534_v5 = vrot.slane %v532_v54, 7 }
  0x6c   : > { %4284 = vmatpush3.bf16.msra.mxu0 %v4790_v1  ;;  %v4797_v1 = vld [vmem:[%s5842_s1 + $0xa8] sm:$0xff]   ;;  %v627_v34 = vrot.slane %v549_v17, 1 }
  0x6d   : > { %4092 = vmatpush3.bf16.msra.mxu1 %v4789_v3  ;;  %4285 = vmatprep.subr.bf16.mxu0 %v4792_v13  ;;  %v502_v3 = vor.u32 %v500_v11, %v499_v44  ;;  %v4799_v11 = vld [vmem:[%s5842_s1 + $0xb0] sm:$0xff]   ;;  %v542_v44 = vshll.u32 %v5134_v14, 16 }
  0x6e   : > { %4062 = vmatmul.mubr.bf16.gmra.mrb[4].mxu1 %v5216_v49  ;;  %4093 = vmatprep.subr.bf16.mxu1 %v4791_v16 }
  0x6f   : > { %4254 = vmatmul.mubr.bf16.gmra.mrb[4].mxu0 %v5220_v52  ;;  %4065 = vmatprep.mubr.bf16.mxu1 %v5224_v12 }
  0x70   : > { %4257 = vmatprep.mubr.bf16.mxu0 %v5228_v22  ;;  %4286 = vmatpush3.bf16.msra.mxu0 %v4792_v13  ;;  %v4800_v13 = vld [vmem:[%s5842_s1 + $0x1b0] sm:$0xff]  }
  0x71   : > { %4094 = vmatpush3.bf16.msra.mxu1 %v4791_v16  ;;  %4287 = vmatprep.subr.bf16.mxu0 %v4794_v27  ;;  %v5288_v16 = vsel %vm5168_vm5, 0, %v502_v3  ;;  %v623_v3 = vrot.slane %v535_v40, 1 }
  0x72   : > { %4095 = vmatprep.subr.bf16.mxu1 %v4793_v28 }
  0x73   : > { %v624_v15 = vor.u32 %v623_v3, %v532_v54 }
  0x74   : > { %4288 = vmatpush3.bf16.msra.mxu0 %v4794_v27  ;;  %v5300_v27 = vsel %vm5153_vm3, %v618_v8, 0  ;;  %v625_v8 = vrot.slane %v542_v44, 1 }
  0x75   : > { %4096 = vmatpush3.bf16.msra.mxu1 %v4793_v28  ;;  %4289 = vmatprep.subr.bf16.mxu0 %v4796_v39  ;;  %v525_v28 = vshrl.u32 %v5115_v53, 16 }
  0x76   : > { %4066 = vmatmul.mubr.bf16.gmra.mrb[8].mxu1 %v5252_v43  ;;  %4097 = vmatprep.subr.bf16.mxu1 %v4795_v42 }
  0x77   : > { %4258 = vmatmul.mubr.bf16.gmra.mrb[8].mxu0 %v5256_v45  ;;  %4069 = vmatprep.mubr.bf16.mxu1 %v5260_v46  ;;  %v527_v62 = vrot.slane %v525_v28, 7 }
  0x78   : > { %4261 = vmatprep.mubr.bf16.mxu0 %v5264_v59  ;;  %4290 = vmatpush3.bf16.msra.mxu0 %v4796_v39  ;;  %v523_v39 = vor.u32 %v521_v7, %v520_v25  ;;  %v539_v7 = vshrl.u32 %v5134_v14, 16  ;;  %v556_v25 = vshll.u32 %v5145_v24, 16 }
  0x79   : > { %4098 = vmatpush3.bf16.msra.mxu1 %v4795_v42  ;;  %4291 = vmatprep.subr.bf16.mxu0 %v4798_v0  ;;  %v622_v42 = vor.u32 %v621_v29, %v525_v28  ;;  %v546_v28 = vshrl.u32 %v5143_v23, 16 }
  0x7a   : > { %4099 = vmatprep.subr.bf16.mxu1 %v4797_v1  ;;  %v626_v19 = vor.u32 %v625_v8, %v539_v7 }
  0x7b   : > { %v5340_v6 = vsel %vm5153_vm3, %v622_v42, 0  ;;  %v629_v42 = vrot.slane %v556_v25, 1 }
  0x7c   : > { %4292 = vmatpush3.bf16.msra.mxu0 %v4798_v0  ;;  %v5332_v0 = vsel %vm5153_vm3, %v620_v36, 0  ;;  %v548_v36 = vrot.slane %v546_v28, 7 }
  0x7d   : > { %4100 = vmatpush3.bf16.msra.mxu1 %v4797_v1  ;;  %4293 = vmatprep.subr.bf16.mxu0 %v4800_v13  ;;  %v5336_v1 = vsel %vm5168_vm5, 0, %v523_v39  ;;  %v5366_v39 = vsel %vm5153_vm3, %v626_v19, 0 }
  0x7e   : > { %4070 = vmatmul.mubr.bf16.gmra.mrb[12].mxu1 %v5288_v16  ;;  %4101 = vmatprep.subr.bf16.mxu1 %v4799_v11  ;;  %v551_v3 = vor.u32 %v549_v17, %v548_v36 }
  0x7f   : > { %4262 = vmatmul.mubr.bf16.gmra.mrb[12].mxu0 %v5292_v18  ;;  %4073 = vmatprep.mubr.bf16.mxu1 %v5296_v20 }
  0x80   : > { %4265 = vmatprep.mubr.bf16.mxu0 %v5300_v27  ;;  %4294 = vmatpush3.bf16.msra.mxu0 %v4800_v13  ;;  %v530_v13 = vor.u32 %v528_v9, %v527_v62  ;;  %v628_v62 = vor.u32 %v627_v34, %v546_v28 }
  0x81   : > { %4102 = vmatpush3.bf16.msra.mxu1 %v4799_v11  ;;  %4295 = vmatprep.subr.bf16.mxu0 %v4802_v47  ;;  %v537_v11 = vor.u32 %v535_v40, %v534_v5  ;;  %v553_v40 = vshrl.u32 %v5145_v24, 16  ;;  %v563_v5 = vshll.u32 %v5084_v35, 16 }
  0x82   : > { %4103 = vmatprep.subr.bf16.mxu1 %v4801_v33  ;;  %v5354_v29 = vsel %vm5168_vm5, 0, %v530_v13 }
  0x83   : > { %v5362_v9 = vsel %vm5168_vm5, 0, %v537_v11  ;;  %v555_v13 = vrot.slane %v553_v40, 7  ;;  %v5384_v11 = vsel %vm5168_vm5, 0, %v551_v3  ;;  %v631_v17 = vrot.slane %v563_v5, 1  ;;  %v4813_v3 = vld [vmem:[%s5842_s1 + $0xe8] sm:$0xff]  }
  0x84   : > { %4296 = vmatpush3.bf16.msra.mxu0 %v4802_v47  ;;  %v541_v47 = vrot.slane %v539_v7, 7  ;;  %v630_v7 = vor.u32 %v629_v42, %v553_v40  ;;  %v4808_v40 = vld [vmem:[%s5842_s1 + $0x1d0] sm:$0xff]   ;;  %v4810_v42 = vld [vmem:[%s5842_s1 + $0x1d8] sm:$0xff]  }
  0x85   : > { %4104 = vmatpush3.bf16.msra.mxu1 %v4801_v33  ;;  %4329 = vmatprep.subr.bf16.mxu0 %v5318_v48  ;;  %v5358_v33 = vsel %vm5153_vm3, %v624_v15, 0  ;;  %v5380_v15 = vsel %vm5153_vm3, %v628_v62, 0  ;;  %v558_v28 = vor.u32 %v556_v25, %v555_v13  ;;  %v4806_v25 = vld [vmem:[%s5842_s1 + $0x1c8] sm:$0xff]   ;;  %v4815_v13 = vld [vmem:[%s5842_s1 + $0xf0] sm:$0xff]  }
  0x86   : > { %4074 = vmatmul.mubr.bf16.gmra.mrb[16].mxu1 %v5328_v60  ;;  %4137 = vmatprep.subr.bf16.mxu1 %v5324_v38  ;;  %v544_v54 = vor.u32 %v542_v44, %v541_v47  ;;  %v560_v44 = vshrl.u32 %v5084_v35, 16  ;;  %v5391_v19 = vsel %vm5153_vm3, %v630_v7, 0  ;;  %v4814_v62 = vld [vmem:[%s5842_s1 + $0x1e8] sm:$0xff]   ;;  %v4816_v7 = vld [vmem:[%s5842_s1 + $0x1f0] sm:$0xff]  }
  0x87   : > { %4266 = vmatmul.mubr.bf16.gmra.mrb[16].mxu0 %v5332_v0  ;;  %4077 = vmatprep.mubr.bf16.mxu1 %v5336_v1  ;;  %v5401_v34 = vsel %vm5168_vm5, 0, %v558_v28  ;;  %v4817_v28 = vld [vmem:[%s5842_s1 + $0xf8] sm:$0xff]  }
  0x88   : > { %4269 = vmatprep.mubr.bf16.mxu0 %v5340_v6  ;;  %v5376_v8 = vsel %vm5168_vm5, 0, %v544_v54  ;;  %v632_v47 = vor.u32 %v631_v17, %v560_v44  ;;  %v4811_v54 = vld [vmem:[%s5842_s1 + $0xe0] sm:$0xff]   ;;  %v4818_v17 = vld [vmem:[%s5842_s1 + $0x1f8] sm:$0xff]  }
  0x8a   : > { %v5405_v36 = vsel %vm5153_vm3, %v632_v47, 0  ;;  %v4819_v47 = vld [vmem:[%s5842_s1 + $0x200] sm:$0xff]  }
  0x8e   : > { %4078 = vmatmul.mubr.bf16.gmra.mrb[20].mxu1 %v5354_v29 }
  0x8f   : > { %4270 = vmatmul.mubr.bf16.gmra.mrb[20].mxu0 %v5358_v33  ;;  %4081 = vmatprep.mubr.bf16.mxu1 %v5362_v9 }
  0x90   : > { %4273 = vmatprep.mubr.bf16.mxu0 %v5366_v39 }
  0x96   : > { %4082 = vmatmul.mubr.bf16.gmra.mrb[24].mxu1 %v5376_v8 }
  0x97   : > { %4274 = vmatmul.mubr.bf16.gmra.mrb[24].mxu0 %v5380_v15  ;;  %4085 = vmatprep.mubr.bf16.mxu1 %v5384_v11 }
  0x98   : > { %4277 = vmatprep.mubr.bf16.mxu0 %v5391_v19 }
  0x9e   : > { %4086 = vmatmul.mubr.bf16.gmra.mrb[28].mxu1 %v5401_v34 }
  0x9f   : > { %4278 = vmatmul.mubr.bf16.gmra.mrb[28].mxu0 %v5405_v36  ;;  %4105 = vmatprep.mubr.bf16.mxu1 %v4835_v2 }
  0xa0   : > { %4297 = vmatprep.mubr.bf16.mxu0 %v5186_v57 }
  0xa6   : > { %4106 = vmatmul.mubr.bf16.vlgmr.msra.gmra.mrb[0].mxu1 %v5161_v37  ;;  %v4807_v37 = vld [vmem:[%s5842_s1 + $0xd0] sm:$0xff]  }
  0xa7   : > { %4298 = vmatmul.mubr.bf16.vlgmr.msra.gmra.mrb[0].mxu0 %v5216_v49  ;;  %4109 = vmatprep.mubr.bf16.mxu1 %v5182_v56 }
  0xa8   : > { %4301 = vmatprep.mubr.bf16.mxu0 %v5224_v12  ;;  %4330 = vmatpush3.bf16.msra.mxu0 %v5318_v48  ;;  %v4809_v48 = vld [vmem:[%s5842_s1 + $0xd8] sm:$0xff]  }
  0xa9   : > { %4138 = vmatpush3.bf16.msra.mxu1 %v5324_v38  ;;  %4331 = vmatprep.subr.bf16.mxu0 %v4806_v25  ;;  %v4812_v38 = vld [vmem:[%s5842_s1 + $0x1e0] sm:$0xff]  }
  0xaa   : > { %4139 = vmatprep.subr.bf16.mxu1 %v4805_v31 }
  0xac   : > { %4332 = vmatpush3.bf16.msra.mxu0 %v4806_v25  ;;  %v562_v25 = vrot.slane %v560_v44, 7 }
  0xad   : > { %4140 = vmatpush3.bf16.msra.mxu1 %v4805_v31  ;;  %4333 = vmatprep.subr.bf16.mxu0 %v4808_v40 }
  0xae   : > { %4110 = vmatmul.mubr.bf16.gmra.mrb[4].mxu1 %v5190_v61  ;;  %4141 = vmatprep.subr.bf16.mxu1 %v4807_v37  ;;  %v565_v31 = vor.u32 %v563_v5, %v562_v25  ;;  %v5613_v5 = vld [vmem:[%s5843_s2] ss:$0 sm:$0xff] }
  0xaf   : > { %4302 = vmatmul.mubr.bf16.gmra.mrb[4].mxu0 %v5252_v43  ;;  %4113 = vmatprep.mubr.bf16.mxu1 %v5220_v52 }
  0xb0   : > { %4305 = vmatprep.mubr.bf16.mxu0 %v5260_v46  ;;  %4334 = vmatpush3.bf16.msra.mxu0 %v4808_v40  ;;  %v600_v40 = vsel %vm5168_vm5, 0, %v565_v31 }
  0xb1   : > { %4142 = vmatpush3.bf16.msra.mxu1 %v4807_v37  ;;  %4335 = vmatprep.subr.bf16.mxu0 %v4810_v42 }
  0xb2   : > { %4143 = vmatprep.subr.bf16.mxu1 %v4809_v48 }
  0xb4   : > { %4336 = vmatpush3.bf16.msra.mxu0 %v4810_v42 }
  0xb5   : > { %4144 = vmatpush3.bf16.msra.mxu1 %v4809_v48  ;;  %4337 = vmatprep.subr.bf16.mxu0 %v4812_v38 }
  0xb6   : > { %4114 = vmatmul.mubr.bf16.gmra.mrb[8].mxu1 %v5228_v22  ;;  %4145 = vmatprep.subr.bf16.mxu1 %v4811_v54 }
  0xb7   : > { %4306 = vmatmul.mubr.bf16.gmra.mrb[8].mxu0 %v5288_v16  ;;  %4117 = vmatprep.mubr.bf16.mxu1 %v5256_v45 }
  0xb8   : > { %4309 = vmatprep.mubr.bf16.mxu0 %v5296_v20  ;;  %4338 = vmatpush3.bf16.msra.mxu0 %v4812_v38 }
  0xb9   : > { %4146 = vmatpush3.bf16.msra.mxu1 %v4811_v54  ;;  %4339 = vmatprep.subr.bf16.mxu0 %v4814_v62 }
  0xba   : > { %4147 = vmatprep.subr.bf16.mxu1 %v4813_v3 }
  0xbc   : > { %4340 = vmatpush3.bf16.msra.mxu0 %v4814_v62 }
  0xbd   : > { %4148 = vmatpush3.bf16.msra.mxu1 %v4813_v3  ;;  %4341 = vmatprep.subr.bf16.mxu0 %v4816_v7 }
  0xbe   : > { %4118 = vmatmul.mubr.bf16.gmra.mrb[12].mxu1 %v5264_v59  ;;  %4149 = vmatprep.subr.bf16.mxu1 %v4815_v13 }
  0xbf   : > { %4310 = vmatmul.mubr.bf16.gmra.mrb[12].mxu0 %v5328_v60  ;;  %4121 = vmatprep.mubr.bf16.mxu1 %v5292_v18 }
  0xc0   : > { %4313 = vmatprep.mubr.bf16.mxu0 %v5336_v1  ;;  %4342 = vmatpush3.bf16.msra.mxu0 %v4816_v7 }
  0xc1   : > { %4150 = vmatpush3.bf16.msra.mxu1 %v4815_v13  ;;  %4343 = vmatprep.subr.bf16.mxu0 %v4818_v17 }
  0xc2   : > { %4151 = vmatprep.subr.bf16.mxu1 %v4817_v28 }
  0xc4   : > { %4344 = vmatpush3.bf16.msra.mxu0 %v4818_v17 }
  0xc5   : > { %4152 = vmatpush3.bf16.msra.mxu1 %v4817_v28  ;;  %4377 = vmatprep.subr.bf16.mxu0 %v4819_v47 }
  0xc6   : > { %4122 = vmatmul.mubr.bf16.gmra.mrb[16].mxu1 %v5300_v27 }
  0xc7   : > { %4314 = vmatmul.mubr.bf16.gmra.mrb[16].mxu0 %v5354_v29  ;;  %4125 = vmatprep.mubr.bf16.mxu1 %v5332_v0 }
  0xc8   : > { %4317 = vmatprep.mubr.bf16.mxu0 %v5362_v9 }
  0xce   : > { %4126 = vmatmul.mubr.bf16.gmra.mrb[20].mxu1 %v5340_v6 }
  0xcf   : > { %4318 = vmatmul.mubr.bf16.gmra.mrb[20].mxu0 %v5376_v8  ;;  %4129 = vmatprep.mubr.bf16.mxu1 %v5358_v33 }
  0xd0   : > { %4321 = vmatprep.mubr.bf16.mxu0 %v5384_v11 }
  0xd6   : > { %4130 = vmatmul.mubr.bf16.gmra.mrb[24].mxu1 %v5366_v39 }
  0xd7   : > { %4322 = vmatmul.mubr.bf16.gmra.mrb[24].mxu0 %v5401_v34  ;;  %4133 = vmatprep.mubr.bf16.mxu1 %v5380_v15 }
  0xd8   : > { %4325 = vmatprep.mubr.bf16.mxu0 %v600_v40 }
  0xde   : > { %4134 = vmatmul.mubr.bf16.gmra.mrb[28].mxu1 %v5391_v19 }
  0xdf   : > { %4326 = vmatmul.mubr.bf16.gmra.mrb[28].mxu0 %v4835_v2  ;;  %4153 = vmatprep.mubr.bf16.mxu1 %v5178_v51  ;;  %v4821_v51 = vld [vmem:[%s5842_s1 + $0x210] sm:$0xff]  }
  0xe0   : > { %4345 = vmatprep.mubr.bf16.mxu0 %v4983_v63  ;;  %v4822_v63 = vld [vmem:[%s5842_s1 + $0x218] sm:$0xff]  }
  0xe6   : > { %4154 = vmatmul.mubr.bf16.vlgmr.msra.gmra.mrb[0].mxu1 %v5186_v57 }
  0xe7   : > { %4346 = vmatmul.mubr.bf16.vlgmr.msra.gmra.mrb[0].mxu0 %v4985_v4  ;;  %4157 = vmatprep.mubr.bf16.mxu1 %v5216_v49  ;;  %v4823_v4 = vld [vmem:[%s5842_s1 + $0x220] sm:$0xff]  }
  0xe8   : > { %4349 = vmatprep.mubr.bf16.mxu0 %v5011_v26  ;;  %4378 = vmatpush3.bf16.msra.mxu0 %v4819_v47  ;;  %v4824_v26 = vld [vmem:[%s5842_s1 + $0x228] sm:$0xff]  }
  0xe9   : > { %4379 = vmatprep.subr.bf16.mxu0 %v4820_v41 }
  0xec   : > { %4380 = vmatpush3.bf16.msra.mxu0 %v4820_v41 }
  0xed   : > { %4381 = vmatprep.subr.bf16.mxu0 %v4821_v51 }
  0xee   : > { %4158 = vmatmul.mubr.bf16.gmra.mrb[4].mxu1 %v5224_v12 }
  0xef   : > { %4350 = vmatmul.mubr.bf16.gmra.mrb[4].mxu0 %v5016_v30  ;;  %4161 = vmatprep.mubr.bf16.mxu1 %v5252_v43  ;;  %v4825_v30 = vld [vmem:[%s5842_s1 + $0x230] sm:$0xff]  }
  0xf0   : > { %4353 = vmatprep.mubr.bf16.mxu0 %v5044_v55  ;;  %4382 = vmatpush3.bf16.msra.mxu0 %v4821_v51  ;;  %v4826_v55 = vld [vmem:[%s5842_s1 + $0x238] sm:$0xff]  }
  0xf1   : > { %4383 = vmatprep.subr.bf16.mxu0 %v4822_v63 }
  0xf4   : > { %4384 = vmatpush3.bf16.msra.mxu0 %v4822_v63 }
  0xf5   : > { %4385 = vmatprep.subr.bf16.mxu0 %v4823_v4 }
  0xf6   : > { %4162 = vmatmul.mubr.bf16.gmra.mrb[8].mxu1 %v5260_v46 }
  0xf7   : > { %4354 = vmatmul.mubr.bf16.gmra.mrb[8].mxu0 %v5046_v58  ;;  %4165 = vmatprep.mubr.bf16.mxu1 %v5288_v16 }
  0xf8   : > { %4357 = vmatprep.mubr.bf16.mxu0 %v5073_v21  ;;  %4386 = vmatpush3.bf16.msra.mxu0 %v4823_v4 }
  0xf9   : > { %4387 = vmatprep.subr.bf16.mxu0 %v4824_v26 }
  0xfc   : > { %4388 = vmatpush3.bf16.msra.mxu0 %v4824_v26 }
  0xfd   : > { %4389 = vmatprep.subr.bf16.mxu0 %v4825_v30 }
  0xfe   : > { %4166 = vmatmul.mubr.bf16.gmra.mrb[12].mxu1 %v5296_v20 }
  0xff   : > { %4358 = vmatmul.mubr.bf16.gmra.mrb[12].mxu0 %v5082_v32  ;;  %4169 = vmatprep.mubr.bf16.mxu1 %v5328_v60 }
 0x100   : > { %4361 = vmatprep.mubr.bf16.mxu0 %v5107_v50  ;;  %4390 = vmatpush3.bf16.msra.mxu0 %v4825_v30 }
 0x101   : > { %4391 = vmatprep.subr.bf16.mxu0 %v4826_v55 }
 0x104   : > { %4392 = vmatpush3.bf16.msra.mxu0 %v4826_v55 }
 0x106   : > { %4170 = vmatmul.mubr.bf16.gmra.mrb[16].mxu1 %v5336_v1 }
 0x107   : > { %4362 = vmatmul.mubr.bf16.gmra.mrb[16].mxu0 %v5115_v53  ;;  %4173 = vmatprep.mubr.bf16.mxu1 %v5354_v29 }
 0x108   : > { %4365 = vmatprep.mubr.bf16.mxu0 %v5130_v10 }
 0x10e   : > { %4174 = vmatmul.mubr.bf16.gmra.mrb[20].mxu1 %v5362_v9 }
 0x10f   : > { %4366 = vmatmul.mubr.bf16.gmra.mrb[20].mxu0 %v5134_v14  ;;  %4177 = vmatprep.mubr.bf16.mxu1 %v5376_v8  ;;  %v4836_v14 = vmov 1.0  }
 0x110   : > { %4369 = vmatprep.mubr.bf16.mxu0 %v5143_v23 }
 0x116   : > { %4178 = vmatmul.mubr.bf16.gmra.mrb[24].mxu1 %v5384_v11 }
 0x117   : > { %4370 = vmatmul.mubr.bf16.gmra.mrb[24].mxu0 %v5145_v24  ;;  %4181 = vmatprep.mubr.bf16.mxu1 %v5401_v34 }
 0x118   : > { %4373 = vmatprep.mubr.bf16.mxu0 %v5084_v35 }
 0x11e   : > { %4182 = vmatmul.mubr.bf16.gmra.mrb[28].mxu1 %v600_v40 }
 0x11f   : > { %4374 = vmatmul.mubr.bf16.gmra.mrb[28].mxu0 %v4835_v2  ;;  %3020 = vmatprep.mubr.f32.mxu1 %v4836_v14 }
 0x120   : > { %4393 = vmatprep.mubr.bf16.mxu0 %v5182_v56 }
 0x127   : > { %4394 = vmatmul.mubr.bf16.vlgmr.msra.gmra.mrb[0].mxu0 %v5190_v61 }
 0x128   : > { %4397 = vmatprep.mubr.bf16.mxu0 %v5220_v52 }
 0x12f   : > { %4398 = vmatmul.mubr.bf16.gmra.mrb[4].mxu0 %v5228_v22 }
 0x130   : > { %4401 = vmatprep.mubr.bf16.mxu0 %v5256_v45 }
 0x137   : > { %4402 = vmatmul.mubr.bf16.gmra.mrb[8].mxu0 %v5264_v59 }
 0x138   : > { %4405 = vmatprep.mubr.bf16.mxu0 %v5292_v18 }
 0x13f   : > { %4406 = vmatmul.mubr.bf16.gmra.mrb[12].mxu0 %v5300_v27 }
 0x140   : > { %4409 = vmatprep.mubr.bf16.mxu0 %v5332_v0 }
 0x147   : > { %4410 = vmatmul.mubr.bf16.gmra.mrb[16].mxu0 %v5340_v6 }
 0x148   : > { %4413 = vmatprep.mubr.bf16.mxu0 %v5358_v33 }
 0x14f   : > { %4414 = vmatmul.mubr.bf16.gmra.mrb[20].mxu0 %v5366_v39 }
 0x150   : > { %4417 = vmatprep.mubr.bf16.mxu0 %v5380_v15 }
 0x157   : > { %4418 = vmatmul.mubr.bf16.gmra.mrb[24].mxu0 %v5391_v19 }
 0x158   : > { %4421 = vmatprep.mubr.bf16.mxu0 %v5405_v36 }
 0x15f   : > { %4422 = vmatmul.mubr.bf16.gmra.mrb[28].mxu0 %v4835_v2 }
 0x1b9   : > { %v4155_v58 = vpop.f32.mrb[0].mxu1 }
 0x1ba   : > { %v1473_v21 = vpop.f32.mrb[1].mxu1 }
 0x1bb   : > { %v4156_v32 = vpop.f32.mrb[2].mxu1 }
 0x1bc   : > { %v1476_v35 = vpop.f32.mrb[3].mxu1 }
 0x1c1   : > { %v4159_v50 = vpop.f32.mrb[4].mxu1 }
 0x1c2   : > { %v1489_v53 = vpop.f32.mrb[5].mxu1 }
 0x1c3   : > { %v4160_v10 = vpop.f32.mrb[6].mxu1 }
 0x1c4   : > { %v1492_v23 = vpop.f32.mrb[7].mxu1 }
 0x1c9   : > { %v5562_v24 = vpop.f32.mrb[8].mxu1 }
 0x1ca   : > { %v5564_v56 = vpop.f32.mrb[9].mxu1 }
 0x1cb   : > { %v5566_v57 = vpop.f32.mrb[10].mxu1 }
 0x1cc   : > { %v5568_v61 = vpop.f32.mrb[11].mxu1 }
 0x1d1   : > { %v5570_v2 = vpop.f32.mrb[12].mxu1 }
 0x1d2   : > { %v5572_v49 = vpop.f32.mrb[13].mxu1 }
 0x1d3   : > { %v5574_v52 = vpop.f32.mrb[14].mxu1 }
 0x1d4   : > { %v5576_v12 = vpop.f32.mrb[15].mxu1 }
 0x1d9   : > { %v5578_v22 = vpop.f32.mrb[16].mxu1 }
 0x1da   : > { %v5580_v43 = vpop.f32.mrb[17].mxu1 }
 0x1db   : > { %v5582_v45 = vpop.f32.mrb[18].mxu1 }
 0x1dc   : > { %v5584_v46 = vpop.f32.mrb[19].mxu1 }
 0x1e1   : > { %v5586_v59 = vpop.f32.mrb[20].mxu1 }
 0x1e2   : > { %v5588_v16 = vpop.f32.mrb[21].mxu1 }
 0x1e3   : > { %v5590_v18 = vpop.f32.mrb[22].mxu1 }
 0x1e4   : > { %v5592_v20 = vpop.f32.mrb[23].mxu1 }
 0x1e9   : > { %v5594_v27 = vpop.f32.mrb[24].mxu1 }
 0x1ea   : > { %v5596_v60 = vpop.f32.mrb[25].mxu1 }
 0x1eb   : > { %v5598_v0 = vpop.f32.mrb[26].mxu1 }
 0x1ec   : > { %v5600_v1 = vpop.f32.mrb[27].mxu1 }
 0x1f1   : > { %v5602_v6 = vpop.f32.mrb[28].mxu1 }
 0x1f2   : > { %v5604_v29 = vpop.f32.mrb[29].mxu1 }
 0x1f3   : > { %v5606_v33 = vpop.f32.mrb[30].mxu1 }
 0x1f4   : > { %v5608_v9 = vpop.f32.mrb[31].mxu1 }
 0x1fa   : > { %v4395_v39 = vpop.f32.mrb[0].mxu0 }
 0x1fb   : > { %v4489_v8 = vadd.f32 %v4395_v39, %v4155_v58  ;;  %v2758_v15 = vpop.f32.mrb[1].mxu0 }
 0x1fc   : > { %v4490_v11 = vadd.f32 %v2758_v15, %v1473_v21  ;;  %v4396_v44 = vpop.f32.mrb[2].mxu0 }
 0x1fd   : > { %v2926_v19 = vadd.f32 %v4489_v8, %v5613_v5  ;;  %v4491_v34 = vadd.f32 %v4396_v44, %v4156_v32  ;;  %v2761_v36 = vpop.f32.mrb[3].mxu0 }
 0x1fe   : > { %v2924_v37 = vadd.f32 %v4490_v11, %v5613_v5  ;;  %v4492_v42 = vadd.f32 %v2761_v36, %v1476_v35 }
 0x1ff   : > { %v2927_v48 = vadd.f32 %v4491_v34, %v5613_v5  ;;  %v5626_v54 = vmul.f32 %v2926_v19, %v2926_v19 }
 0x200   : > { %v2925_v38 = vadd.f32 %v4492_v42, %v5613_v5  ;;  %v5632_v7 = vmul.f32 %v2924_v37, %v2924_v37 }
 0x201   : > { %v5628_v62 = vpack.c.bf16 %v2927_v48, %v2926_v19  ;;  %v5630_v3 = vmul.f32 %v2927_v48, %v2927_v48 }
 0x202   : > { %v5634_v13 = vpack.c.bf16 %v2925_v38, %v2924_v37  ;;  %v5636_v17 = vmul.f32 %v2925_v38, %v2925_v38  ;;  %v4399_v28 = vpop.f32.mrb[4].mxu0 }
 0x203   : > { %v4463_v47 = vpack.c.bf16 %v5630_v3, %v5626_v54  ;;  %3692 = vst [vmem:[%s5623_s9 + $0x8] sm:$0xff] %v5628_v62   ;;  %v4493_v25 = vadd.f32 %v4399_v28, %v4159_v50  ;;  %v2774_v31 = vpop.f32.mrb[5].mxu0 }
 0x204   : > { %v4459_v40 = vpack.c.bf16 %v5636_v17, %v5632_v7  ;;  %3601 = vst [vmem:[%s5623_s9] sm:$0xff] %v5634_v13   ;;  %v4494_v41 = vadd.f32 %v2774_v31, %v1489_v53  ;;  %v4400_v51 = vpop.f32.mrb[6].mxu0 }
 0x205   : > { %v2930_v63 = vadd.f32 %v4493_v25, %v5613_v5  ;;  %v4495_v4 = vadd.f32 %v4400_v51, %v4160_v10  ;;  %v2777_v26 = vpop.f32.mrb[7].mxu0 }
 0x206   : > { %v2928_v30 = vadd.f32 %v4494_v41, %v5613_v5  ;;  %v4496_v55 = vadd.f32 %v2777_v26, %v1492_v23 }
 0x207   : > { %v2931_v58 = vadd.f32 %v4495_v4, %v5613_v5  ;;  %v5650_v32 = vmul.f32 %v2930_v63, %v2930_v63 }
 0x208   : > { %v2929_v21 = vadd.f32 %v4496_v55, %v5613_v5  ;;  %v5656_v53 = vmul.f32 %v2928_v30, %v2928_v30 }
 0x209   : > { %v5652_v35 = vpack.c.bf16 %v2931_v58, %v2930_v63  ;;  %v5654_v50 = vmul.f32 %v2931_v58, %v2931_v58 }
 0x20a   : > { %v5658_v39 = vpack.c.bf16 %v2929_v21, %v2928_v30  ;;  %v5660_v10 = vmul.f32 %v2929_v21, %v2929_v21  ;;  %v4403_v8 = vpop.f32.mrb[8].mxu0 }
 0x20b   : > { %v4471_v23 = vpack.c.bf16 %v5654_v50, %v5650_v32  ;;  %3694 = vst [vmem:[%s5623_s9 + $0x18] sm:$0xff] %v5652_v35   ;;  %v4497_v15 = vadd.f32 %v4403_v8, %v5562_v24  ;;  %v2790_v11 = vpop.f32.mrb[9].mxu0 }
 0x20c   : > { %v4467_v44 = vpack.c.bf16 %v5660_v10, %v5656_v53  ;;  %3693 = vst [vmem:[%s5623_s9 + $0x10] sm:$0xff] %v5658_v39   ;;  %v4498_v19 = vadd.f32 %v2790_v11, %v5564_v56  ;;  %v4404_v34 = vpop.f32.mrb[10].mxu0 }
 0x20d   : > { %v2934_v36 = vadd.f32 %v4497_v15, %v5613_v5  ;;  %v4499_v37 = vadd.f32 %v4404_v34, %v5566_v57  ;;  %v2793_v42 = vpop.f32.mrb[11].mxu0 }
 0x20e   : > { %v2932_v48 = vadd.f32 %v4498_v19, %v5613_v5  ;;  %v4500_v24 = vadd.f32 %v2793_v42, %v5568_v61 }
 0x20f   : > { %v2935_v38 = vadd.f32 %v4499_v37, %v5613_v5  ;;  %v5678_v25 = vmul.f32 %v2934_v36, %v2934_v36 }
 0x210   : > { %v2933_v28 = vadd.f32 %v4500_v24, %v5613_v5  ;;  %v5684_v41 = vmul.f32 %v2932_v48, %v2932_v48 }
 0x211   : > { %v5680_v31 = vpack.c.bf16 %v2935_v38, %v2934_v36  ;;  %v5682_v56 = vmul.f32 %v2935_v38, %v2935_v38 }
 0x212   : > { %v5686_v51 = vpack.c.bf16 %v2933_v28, %v2932_v48  ;;  %v5688_v57 = vmul.f32 %v2933_v28, %v2933_v28  ;;  %v4407_v63 = vpop.f32.mrb[12].mxu0 }
 0x213   : > { %v4479_v61 = vpack.c.bf16 %v5682_v56, %v5678_v25  ;;  %3696 = vst [vmem:[%s5623_s9 + $0x28] sm:$0xff] %v5680_v31   ;;  %v4501_v4 = vadd.f32 %v4407_v63, %v5570_v2  ;;  %v2806_v26 = vpop.f32.mrb[13].mxu0 }
 0x214   : > { %v4475_v30 = vpack.c.bf16 %v5688_v57, %v5684_v41  ;;  %3695 = vst [vmem:[%s5623_s9 + $0x20] sm:$0xff] %v5686_v51   ;;  %v4502_v55 = vadd.f32 %v2806_v26, %v5572_v49  ;;  %v4408_v58 = vpop.f32.mrb[14].mxu0 }
 0x215   : > { %v2938_v21 = vadd.f32 %v4501_v4, %v5613_v5  ;;  %v4503_v8 = vadd.f32 %v4408_v58, %v5574_v52  ;;  %v2809_v15 = vpop.f32.mrb[15].mxu0 }
 0x216   : > { %v2936_v11 = vadd.f32 %v4502_v55, %v5613_v5  ;;  %v4504_v2 = vadd.f32 %v2809_v15, %v5576_v12 }
 0x217   : > { %v2939_v19 = vadd.f32 %v4503_v8, %v5613_v5  ;;  %v5706_v36 = vmul.f32 %v2938_v21, %v2938_v21 }
 0x218   : > { %v2937_v34 = vadd.f32 %v4504_v2, %v5613_v5  ;;  %v5712_v42 = vmul.f32 %v2936_v11, %v2936_v11 }
 0x219   : > { %v5708_v37 = vpack.c.bf16 %v2939_v19, %v2938_v21  ;;  %v5710_v49 = vmul.f32 %v2939_v19, %v2939_v19 }
 0x21a   : > { %v5714_v48 = vpack.c.bf16 %v2937_v34, %v2936_v11  ;;  %v5716_v52 = vmul.f32 %v2937_v34, %v2937_v34  ;;  %v4411_v24 = vpop.f32.mrb[16].mxu0 }
 0x21b   : > { %v4487_v12 = vpack.c.bf16 %v5710_v49, %v5706_v36  ;;  %3698 = vst [vmem:[%s5623_s9 + $0x38] sm:$0xff] %v5708_v37   ;;  %v4505_v38 = vadd.f32 %v4411_v24, %v5578_v22  ;;  %v2822_v28 = vpop.f32.mrb[17].mxu0 }
 0x21c   : > { %v4483_v63 = vpack.c.bf16 %v5716_v52, %v5712_v42  ;;  %3697 = vst [vmem:[%s5623_s9 + $0x30] sm:$0xff] %v5714_v48   ;;  %v4506_v4 = vadd.f32 %v2822_v28, %v5580_v43  ;;  %v4412_v26 = vpop.f32.mrb[18].mxu0 }
 0x21d   : > { %v2942_v55 = vadd.f32 %v4505_v38, %v5613_v5  ;;  %v4507_v58 = vadd.f32 %v4412_v26, %v5582_v45  ;;  %v2825_v21 = vpop.f32.mrb[19].mxu0 }
 0x21e   : > { %v2940_v8 = vadd.f32 %v4506_v4, %v5613_v5  ;;  %v4508_v15 = vadd.f32 %v2825_v21, %v5584_v46 }
 0x21f   : > { %v2943_v22 = vadd.f32 %v4507_v58, %v5613_v5  ;;  %v5734_v2 = vmul.f32 %v2942_v55, %v2942_v55 }
 0x220   : > { %v2941_v11 = vadd.f32 %v4508_v15, %v5613_v5  ;;  %v5738_v34 = vmul.f32 %v2940_v8, %v2940_v8 }
 0x221   : > { %v5736_v19 = vmul.f32 %v2943_v22, %v2943_v22  ;;  %v4429_v43 = vpack.c.bf16 %v2943_v22, %v2942_v55 }
 0x222   : > { %v5740_v24 = vmul.f32 %v2941_v11, %v2941_v11  ;;  %v4415_v45 = vpop.f32.mrb[20].mxu0  ;;  %v4425_v38 = vpack.c.bf16 %v2941_v11, %v2940_v8 }
 0x223   : > { %v4509_v28 = vadd.f32 %v4415_v45, %v5586_v59  ;;  %v2838_v4 = vpop.f32.mrb[21].mxu0  ;;  %3700 = vst [vmem:[%s5623_s9 + $0x48] sm:$0xff] %v4429_v43   ;;  %v4461_v46 = vpack.c.bf16 %v5736_v19, %v5734_v2 }
 0x224   : > { %v4510_v26 = vadd.f32 %v2838_v4, %v5588_v16  ;;  %v4416_v58 = vpop.f32.mrb[22].mxu0  ;;  %4426 = vmatprep.subr.bf16.mxu1 %v4425_v38  ;;  %3699 = vst [vmem:[%s5623_s9 + $0x40] sm:$0xff] %v4425_v38   ;;  %v4457_v55 = vpack.c.bf16 %v5740_v24, %v5738_v34 }
 0x225   : > { %v2946_v21 = vadd.f32 %v4509_v28, %v5613_v5  ;;  %v4511_v15 = vadd.f32 %v4416_v58, %v5590_v18  ;;  %v2841_v8 = vpop.f32.mrb[23].mxu0  ;;  %4428 = vmatpush3.bf16.msra.mxu1 %v5634_v13 }
 0x226   : > { %v2944_v59 = vadd.f32 %v4510_v26, %v5613_v5  ;;  %v4512_v22 = vadd.f32 %v2841_v8, %v5592_v20  ;;  %4430 = vmatprep.subr.bf16.mxu1 %v4429_v43 }
 0x227   : > { %v2947_v16 = vadd.f32 %v4511_v15, %v5613_v5  ;;  %v5757_v45 = vmul.f32 %v2946_v21, %v2946_v21 }
 0x228   : > { %v2945_v11 = vadd.f32 %v4512_v22, %v5613_v5  ;;  %v5762_v28 = vmul.f32 %v2944_v59, %v2944_v59 }
 0x229   : > { %v5759_v38 = vmul.f32 %v2947_v16, %v2947_v16  ;;  %4432 = vmatpush3.bf16.msra.mxu1 %v5628_v62  ;;  %v4437_v18 = vpack.c.bf16 %v2947_v16, %v2946_v21 }
 0x22a   : > { %v5764_v13 = vmul.f32 %v2945_v11, %v2945_v11  ;;  %v4419_v4 = vpop.f32.mrb[24].mxu0  ;;  %v4433_v26 = vpack.c.bf16 %v2945_v11, %v2944_v59 }
 0x22b   : > { %v4513_v20 = vadd.f32 %v4419_v4, %v5594_v27  ;;  %v2854_v43 = vpop.f32.mrb[25].mxu0  ;;  %3702 = vst [vmem:[%s5623_s9 + $0x58] sm:$0xff] %v4437_v18   ;;  %v4469_v58 = vpack.c.bf16 %v5759_v38, %v5757_v45 }
 0x22c   : > { %v4514_v15 = vadd.f32 %v2854_v43, %v5596_v60  ;;  %v4420_v8 = vpop.f32.mrb[26].mxu0  ;;  %4434 = vmatprep.subr.bf16.mxu1 %v4433_v26  ;;  %3701 = vst [vmem:[%s5623_s9 + $0x50] sm:$0xff] %v4433_v26   ;;  %v4465_v62 = vpack.c.bf16 %v5764_v13, %v5762_v28 }
 0x22d   : > { %v2950_v21 = vadd.f32 %v4513_v20, %v5613_v5  ;;  %v4515_v22 = vadd.f32 %v4420_v8, %v5598_v0  ;;  %v2857_v59 = vpop.f32.mrb[27].mxu0  ;;  %4436 = vmatpush3.bf16.msra.mxu1 %v5658_v39 }
 0x22e   : > { %v2948_v27 = vadd.f32 %v4514_v15, %v5613_v5  ;;  %v4516_v16 = vadd.f32 %v2857_v59, %v5600_v1  ;;  %4438 = vmatprep.subr.bf16.mxu1 %v4437_v18 }
 0x22f   : > { %v2951_v60 = vadd.f32 %v4515_v22, %v5613_v5  ;;  %v3057_v4 = vmul.f32 %v2950_v21, %v2950_v21 }
 0x230   : > { %v2949_v11 = vadd.f32 %v4516_v16, %v5613_v5  ;;  %v3055_v0 = vmul.f32 %v2948_v27, %v2948_v27 }
 0x231   : > { %v3058_v28 = vmul.f32 %v2951_v60, %v2951_v60  ;;  %4440 = vmatpush3.bf16.msra.mxu1 %v5652_v35  ;;  %v4445_v13 = vpack.c.bf16 %v2951_v60, %v2950_v21 }
 0x232   : > { %v3056_v26 = vmul.f32 %v2949_v11, %v2949_v11  ;;  %v4423_v20 = vpop.f32.mrb[28].mxu0  ;;  %v4441_v39 = vpack.c.bf16 %v2949_v11, %v2948_v27 }
 0x233   : > { %v4517_v43 = vadd.f32 %v4423_v20, %v5602_v6  ;;  %v2870_v15 = vpop.f32.mrb[29].mxu0  ;;  %3704 = vst [vmem:[%s5623_s9 + $0x68] sm:$0xff] %v4445_v13   ;;  %v4477_v1 = vpack.c.bf16 %v3058_v28, %v3057_v4 }
 0x234   : > { %v4518_v18 = vadd.f32 %v2870_v15, %v5604_v29  ;;  %v4424_v8 = vpop.f32.mrb[30].mxu0  ;;  %4442 = vmatprep.subr.bf16.mxu1 %v4441_v39  ;;  %3703 = vst [vmem:[%s5623_s9 + $0x60] sm:$0xff] %v4441_v39   ;;  %v4473_v22 = vpack.c.bf16 %v3056_v26, %v3055_v0 }
 0x235   : > { %v2954_v59 = vadd.f32 %v4517_v43, %v5613_v5  ;;  %v4519_v35 = vadd.f32 %v4424_v8, %v5606_v33  ;;  %v2873_v21 = vpop.f32.mrb[31].mxu0  ;;  %4444 = vmatpush3.bf16.msra.mxu1 %v5686_v51 }
 0x236   : > { %v2952_v6 = vadd.f32 %v4518_v18, %v5613_v5  ;;  %v4520_v27 = vadd.f32 %v2873_v21, %v5608_v9  ;;  %4446 = vmatprep.subr.bf16.mxu1 %v4445_v13  ;;  %v3026_v9 = vlaneseq }
 0x237   : > { %v2955_v29 = vadd.f32 %v4519_v35, %v5613_v5  ;;  %v3061_v60 = vmul.f32 %v2954_v59, %v2954_v59 }
 0x238   : > { %v2953_v16 = vadd.f32 %v4520_v27, %v5613_v5  ;;  %v3059_v28 = vmul.f32 %v2952_v6, %v2952_v6  ;;  %vm3028_vm6 = vcmp.lt.s32.totalorder %v3026_v9, 128 }
 0x239   : > { %v3062_v11 = vmul.f32 %v2955_v29, %v2955_v29  ;;  %4448 = vmatpush3.bf16.msra.mxu1 %v5680_v31  ;;  %v4453_v4 = vpack.c.bf16 %v2955_v29, %v2954_v59 }
 0x23a   : > { %v3060_v33 = vmul.f32 %v2953_v16, %v2953_v16  ;;  %v4449_v0 = vpack.c.bf16 %v2953_v16, %v2952_v6 }
 0x23b   : > { %3706 = vst [vmem:[%s5623_s9 + $0x78] sm:$0xff] %v4453_v4   ;;  %v4485_v51 = vpack.c.bf16 %v3062_v11, %v3061_v60 }
 0x23c   : > { %4450 = vmatprep.subr.bf16.mxu1 %v4449_v0  ;;  %3705 = vst [vmem:[%s5623_s9 + $0x70] sm:$0xff] %v4449_v0   ;;  %v4481_v26 = vpack.c.bf16 %v3060_v33, %v3059_v28 }
 0x23d   : > { %4452 = vmatpush3.bf16.msra.mxu1 %v5714_v48 }
 0x23e   : > { %4454 = vmatprep.subr.bf16.mxu1 %v4453_v4 }
 0x241   : > { %4456 = vmatpush3.bf16.msra.mxu1 %v5708_v37 }
 0x242   : > { %4458 = vmatprep.subr.bf16.mxu1 %v4457_v55 }
 0x244   : > { %3021 = vmatmul.mubr.f32.vlgmr.msra.gmra.mrb[32].mxu1 %v4836_v14 }
 0x245   : > { %4460 = vmatpush3.bf16.msra.mxu1 %v4459_v40  ;;  %3127 = vmatprep.mubr.f32.mxu1 %v4836_v14 }
 0x246   : > { %4462 = vmatprep.subr.bf16.mxu1 %v4461_v46 }
 0x249   : > { %4464 = vmatpush3.bf16.msra.mxu1 %v4463_v47 }
 0x24a   : > { %4466 = vmatprep.subr.bf16.mxu1 %v4465_v62 }
 0x24d   : > { %4468 = vmatpush3.bf16.msra.mxu1 %v4467_v44 }
 0x24e   : > { %4470 = vmatprep.subr.bf16.mxu1 %v4469_v58 }
 0x251   : > { %4472 = vmatpush3.bf16.msra.mxu1 %v4471_v23 }
 0x252   : > { %4474 = vmatprep.subr.bf16.mxu1 %v4473_v22 }
 0x255   : > { %4476 = vmatpush3.bf16.msra.mxu1 %v4475_v30 }
 0x256   : > { %4478 = vmatprep.subr.bf16.mxu1 %v4477_v1 }
 0x259   : > { %4480 = vmatpush3.bf16.msra.mxu1 %v4479_v61 }
 0x25a   : > { %4482 = vmatprep.subr.bf16.mxu1 %v4481_v26 }
 0x25d   : > { %4484 = vmatpush3.bf16.msra.mxu1 %v4483_v63 }
 0x25e   : > { %4486 = vmatprep.subr.bf16.mxu1 %v4485_v51 }
 0x261   : > { %4488 = vmatpush3.bf16.msra.mxu1 %v4487_v12 }
 0x264   : > { %3128 = vmatmul.mubr.f32.vlgmr.msra.gmra.mrb[34].mxu1 %v4836_v14 }
 0x317   : > { %v3955_v5 = vpop.f32.mrb[32].mxu1 }
 0x318   : > { %v3956_v54 = vpop.f32.mrb[33].mxu1 }
 0x319   : > { %v3957_v3 = vadd.f32 %v3956_v54, %v3955_v5 }
 0x31b   : > { %3030 = vst.msk [vmem:[%s262_s12] sm:$0x1] %vm3028_vm6, %v3957_v3 }
 0x337   : > { %v3990_v7 = vpop.f32.mrb[34].mxu1 }
 0x338   : > { %v3991_v17 = vpop.f32.mrb[35].mxu1 }
 0x339   : > { %v3992_v47 = vadd.f32 %v3991_v17, %v3990_v7 }
 0x33b   : > { %3133 = vst.msk [vmem:[%s262_s12 + $0x1] sm:$0x1] %vm3028_vm6, %v3992_v47 }
 0x33c PF: > { %s17_s21 = sadd.s32 1, %s4833_s21  }
 0x33d   : > { %p14_p4 = scmp.ge.s32.totalorder %s17_s21, 4  }
 0x33f   :  { %16 = sbr.rel (!%p14_p4) target bundleno = 1 (0x1), region = 82 }

</bundles_post_ra>
